<compile_context>
chip_gen: v6e
topology: v6e:2x2x1
jax: 0.10.0
libtpu: 0.0.40
codegen_flags: <defaults>
</compile_context>

<pallas_src>
import functools

import numpy as np
import jax
import jax.numpy as jnp
from jax.experimental import pallas as pl
from jax.experimental.pallas import tpu as pltpu

BN_EPS = 1e-5
PREC = jax.lax.Precision.HIGHEST


# ------------------------------ fused kernel --------------------------------

def _detection_head_kernel(
    x_ref, mfirst_ref, mlast_ref,
    fdw_ref, fpw_ref, fb_ref,
    cdw_ref, cpw_ref, cb_ref,
    bdw_ref, bpw_ref, bb_ref,
    qdw_ref, qpw_ref, qb_ref,
    hcw_ref, hbw_ref, hqw_ref, hb_ref, hsig_ref,
    o_ref, *, H, W):
    """One batch element: full DetectionHead forward, everything VMEM-resident.

    x_ref    : [H*W, 256] f32 (NHWC, spatial flattened row-major)
    m*_ref   : [H*W, 1]   f32 column-boundary masks for the depthwise shifts
    *dw_ref  : [3, 3, C]  f32 depthwise taps
    *pw_ref  : [C, Cout]  bf16 pointwise weights (BN scale folded in)
    *b_ref   : [1, Cout]  f32 folded BN bias
    h*w_ref  : [Cf, 128]  bf16 merged head weights (lane-dense, per-anchor
                          [box|conf|cls] column order, zero padded)
    hb_ref   : [1, 128]   f32 head bias,  hsig_ref: [1, 128] sigmoid column mask
    o_ref    : [H*W, 128] f32
    """
    N = H * W
    m_first = mfirst_ref[...]      # 0 where w == 0      (reading w-1 invalid)
    m_last = mlast_ref[...]        # 0 where w == W - 1  (reading w+1 invalid)

    def dw3x3(xf, w):
        # Depthwise 3x3, stride 1, zero padding 1, on a flattened [N, C] map.
        C = xf.shape[1]
        z1 = jnp.zeros((1, C), jnp.float32)
        zW = jnp.zeros((W, C), jnp.float32)
        # W-direction shifted copies (built once; boundary masked).
        cols = (m_first * jnp.concatenate([z1, xf[:N - 1]], axis=0),   # x[., w-1]
                xf,                                                    # x[., w  ]
                m_last * jnp.concatenate([xf[1:], z1], axis=0))        # x[., w+1]
        acc = jnp.zeros((N, C), jnp.float32)
        for di in range(3):            # di - 1 = dh
            for dj in range(3):        # dj - 1 = dw
                xs = cols[dj]
                if di == 0:            # read row h-1
                    xs = jnp.concatenate([zW, xs[:N - W]], axis=0)
                elif di == 2:          # read row h+1
                    xs = jnp.concatenate([xs[W:], zW], axis=0)
                acc = acc + xs * w[di, dj:dj + 1, :]
        return acc

    def ds_conv(xf, dw_ref, pw_ref, b_ref):
        # DepthwiseSeparableConv: dw3x3 -> 1x1 (bf16 MXU) -> BN(folded) -> LeakyReLU
        y = dw3x3(xf, dw_ref[...])
        y = jnp.dot(y.astype(jnp.bfloat16), pw_ref[...],
                    preferred_element_type=jnp.float32)
        y = y + b_ref[...]
        return jnp.where(y > 0, y, 0.1 * y)          # LeakyReLU(0.1), f32

    x = x_ref[...]                                            # [N, 256] f32
    feat = ds_conv(x, fdw_ref, fpw_ref, fb_ref)               # [N, 256]
    cls_f = ds_conv(feat, cdw_ref, cpw_ref, cb_ref)           # [N, 128]
    box_f = ds_conv(feat, bdw_ref, bpw_ref, bb_ref)           # [N, 128]
    conf_f = ds_conv(feat, qdw_ref, qpw_ref, qb_ref)          # [N, 64]

    # Merged lane-dense head (3 MXU dots accumulate into one 128-wide output).
    y = (jnp.dot(cls_f.astype(jnp.bfloat16), hcw_ref[...],
                 preferred_element_type=jnp.float32)
         + jnp.dot(box_f.astype(jnp.bfloat16), hbw_ref[...],
                   preferred_element_type=jnp.float32)
         + jnp.dot(conf_f.astype(jnp.bfloat16), hqw_ref[...],
                   preferred_element_type=jnp.float32))
    y = y + hb_ref[...]
    y = jnp.where(hsig_ref[...] > 0, jax.nn.sigmoid(y), y)   # conf + cls only
    o_ref[...] = y


# ------------------------- parameter packing (offline) ----------------------

def pack_params(params, num_classes, anchors=3):
    """Fold BN, cast MXU operands to bf16, build the merged lane-dense head."""
    K = 5 + num_classes
    OUT = max(128, ((anchors * K + 127) // 128) * 128)

    def fold(p):
        dw = jnp.asarray(p["dw"], jnp.float32)
        pw = (p["pw"] * p["bn_scale"][None, :]).astype(jnp.bfloat16)
        b = jnp.asarray(p["bn_bias"], jnp.float32).reshape(1, -1)
        return dw, pw, b

    packed = {}
    for tag, name in (("f", "feat"), ("c", "cls_ds"), ("b", "box_ds"), ("q", "conf_ds")):
        dw, pw, b = fold(params[name])
        packed[tag + "dw"], packed[tag + "pw"], packed[tag + "b"] = dw, pw, b

    cls_w = np.asarray(params["cls_w"]); cls_b = np.asarray(params["cls_b"])
    box_w = np.asarray(params["box_w"]); box_b = np.asarray(params["box_b"])
    conf_w = np.asarray(params["conf_w"]); conf_b = np.asarray(params["conf_b"])

    hcw = np.zeros((cls_w.shape[0], OUT), np.float32)
    hbw = np.zeros((box_w.shape[0], OUT), np.float32)
    hqw = np.zeros((conf_w.shape[0], OUT), np.float32)
    hb = np.zeros((1, OUT), np.float32)
    sig = np.zeros((1, OUT), np.float32)
    for a in range(anchors):
        o = a * K
        hbw[:, o:o + 4] = box_w[:, a * 4:(a + 1) * 4]                 # box
        hb[0, o:o + 4] = box_b[a * 4:(a + 1) * 4]
        hqw[:, o + 4] = conf_w[:, a]                                  # conf (sigmoid)
        hb[0, o + 4] = conf_b[a]
        sig[0, o + 4] = 1.0
        hcw[:, o + 5:o + 5 + num_classes] = cls_w[:, a * num_classes:(a + 1) * num_classes]
        hb[0, o + 5:o + 5 + num_classes] = cls_b[a * num_classes:(a + 1) * num_classes]
        sig[0, o + 5:o + 5 + num_classes] = 1.0                       # cls (sigmoid)

    packed.update(
        hcw=jnp.asarray(hcw, jnp.bfloat16), hbw=jnp.asarray(hbw, jnp.bfloat16),
        hqw=jnp.asarray(hqw, jnp.bfloat16),
        hb=jnp.asarray(hb, jnp.float32), hsig=jnp.asarray(sig, jnp.float32))
    return packed


# ------------------------------ public forward -------------------------------

def detection_head_forward(x_nchw, packed, num_classes, anchors=3):
    # layout: NCHW (PyTorch) -> NHWC, spatial flattened, at the boundary.
    x = jnp.transpose(x_nchw, (0, 2, 3, 1)).astype(jnp.float32)
    B, H, W, C = x.shape
    N = H * W
    K = 5 + num_classes
    OUT = packed["hb"].shape[1]
    xf = x.reshape(B, N, C)

    # column-boundary masks for the flattened depthwise shifts (constants)
    w_idx = np.arange(N) % W
    m_first = jnp.asarray((w_idx != 0).astype(np.float32).reshape(N, 1))
    m_last = jnp.asarray((w_idx != W - 1).astype(np.float32).reshape(N, 1))

    weight_args = [packed[k] for k in (
        "fdw", "fpw", "fb", "cdw", "cpw", "cb", "bdw", "bpw", "bb",
        "qdw", "qpw", "qb", "hcw", "hbw", "hqw", "hb", "hsig")]

    def const_spec(a):
        nd = a.ndim
        return pl.BlockSpec(a.shape, lambda b: (0,) * nd)

    in_specs = ([pl.BlockSpec((None, N, C), lambda b: (b, 0, 0)),
                 const_spec(m_first), const_spec(m_last)]
                + [const_spec(a) for a in weight_args])

    kernel = functools.partial(_detection_head_kernel, H=H, W=W)
    out = pl.pallas_call(
        kernel,
        out_shape=jax.ShapeDtypeStruct((B, N, OUT), jnp.float32),
        grid=(B,),
        in_specs=in_specs,
        out_specs=pl.BlockSpec((None, N, OUT), lambda b: (b, 0, 0)),
        compiler_params=pltpu.CompilerParams(
            dimension_semantics=("parallel",)),
    )(xf, m_first, m_last, *weight_args)

    pred = out[:, :, :anchors * K].reshape(B, H, W, anchors, K)
    return jnp.transpose(pred, (0, 3, 1, 2, 4))        # [B, A, H, W, 5+NC]


# ----------------------------- parameter init --------------------------------

def _kaiming(key, shape, fan_out):
    return jax.random.normal(key, shape, jnp.float32) * np.sqrt(2.0 / fan_out)


def init_ds_conv(key, cin, cout):
    k = jax.random.split(key, 6)
    dw = _kaiming(k[0], (3, 3, cin), fan_out=9 * cin)
    pw = _kaiming(k[1], (cin, cout), fan_out=cout)
    gamma = 1.0 + 0.1 * jax.random.normal(k[2], (cout,), jnp.float32)
    beta = 0.1 * jax.random.normal(k[3], (cout,), jnp.float32)
    mean = 0.1 * jax.random.normal(k[4], (cout,), jnp.float32)
    var = 1.0 + 0.1 * jax.random.uniform(k[5], (cout,), jnp.float32)
    scale = gamma / jnp.sqrt(var + BN_EPS)
    bias = beta - mean * scale
    return {"dw": dw, "pw": pw, "bn_scale": scale, "bn_bias": bias}


def init_detection_head(key, num_classes, anchors=3):
    ks = jax.random.split(key, 7)
    return {
        "feat":    init_ds_conv(ks[0], 256, 256),
        "cls_ds":  init_ds_conv(ks[1], 256, 128),
        "cls_w":   _kaiming(ks[2], (128, anchors * num_classes), fan_out=anchors * num_classes),
        "cls_b":   jnp.zeros((anchors * num_classes,), jnp.float32),
        "box_ds":  init_ds_conv(ks[3], 256, 128),
        "box_w":   _kaiming(ks[4], (128, anchors * 4), fan_out=anchors * 4),
        "box_b":   jnp.zeros((anchors * 4,), jnp.float32),
        "conf_ds": init_ds_conv(ks[5], 256, 64),
        "conf_w":  _kaiming(ks[6], (64, anchors), fan_out=anchors),
        "conf_b":  jnp.zeros((anchors,), jnp.float32),
    }


# ------------------------------ pure-JAX references --------------------------

def _ref_ds_conv(x, p, mixed):
    C = x.shape[-1]
    dw = p["dw"][:, :, None, :]  # HWIO with I=1 (depthwise)
    y = jax.lax.conv_general_dilated(
        x, dw, window_strides=(1, 1), padding=((1, 1), (1, 1)),
        dimension_numbers=("NHWC", "HWIO", "NHWC"), feature_group_count=C,
        precision=PREC)
    if mixed:   # mirror the kernel's bf16 MXU operands / f32 accumulation
        pw = (p["pw"] * p["bn_scale"][None, :]).astype(jnp.bfloat16)
        y = jnp.einsum("bhwc,cd->bhwd", y.astype(jnp.bfloat16), pw,
                       preferred_element_type=jnp.float32) + p["bn_bias"]
    else:
        y = (jnp.einsum("bhwc,cd->bhwd", y, p["pw"], precision=PREC)
             * p["bn_scale"] + p["bn_bias"])
    return jnp.where(y > 0, y, 0.1 * y)


def _ref_forward(x_nchw, params, num_classes, anchors=3, mixed=False):
    x = jnp.transpose(x_nchw, (0, 2, 3, 1)).astype(jnp.float32)
    B, H, W, _ = x.shape

    def head(f, w, b):
        if mixed:
            return jnp.einsum("bhwc,cd->bhwd", f.astype(jnp.bfloat16),
                              w.astype(jnp.bfloat16),
                              preferred_element_type=jnp.float32) + b
        return jnp.einsum("bhwc,cd->bhwd", f, w, precision=PREC) + b

    feat = _ref_ds_conv(x, params["feat"], mixed)
    cls = jax.nn.sigmoid(head(_ref_ds_conv(feat, params["cls_ds"], mixed),
                              params["cls_w"], params["cls_b"]))
    box = head(_ref_ds_conv(feat, params["box_ds"], mixed),
               params["box_w"], params["box_b"])
    conf = jax.nn.sigmoid(head(_ref_ds_conv(feat, params["conf_ds"], mixed),
                               params["conf_w"], params["conf_b"]))
    cls = cls.reshape(B, H, W, anchors, num_classes)
    box = box.reshape(B, H, W, anchors, 4)
    conf = conf.reshape(B, H, W, anchors, 1)
    pred = jnp.concatenate([box, conf, cls], axis=-1)
    return jnp.transpose(pred, (0, 3, 1, 2, 4))


# ----------------------------------- main ------------------------------------

if __name__ == "__main__":
    num_classes, anchors = 4, 3
    B, C, H, W = 2, 256, 8, 8   # C = 256 is fixed by the module definition

    key = jax.random.PRNGKey(0)
    pkey, xkey = jax.random.split(key)
    params = init_detection_head(pkey, num_classes, anchors)
    x = jax.random.normal(xkey, (B, C, H, W), jnp.float32)

    packed = pack_params(params, num_classes, anchors)
    fwd = jax.jit(functools.partial(detection_head_forward,
                                    num_classes=num_classes, anchors=anchors))
    pred = jax.block_until_ready(fwd(x, packed))
    assert pred.shape == (B, anchors, H, W, 5 + num_classes), pred.shape

    # 1) strict check vs. a reference that mirrors the kernel's bf16 MXU math
    ref_mixed = jax.block_until_ready(
        _ref_forward(x, params, num_classes, anchors, mixed=True))
    np.testing.assert_allclose(np.asarray(pred), np.asarray(ref_mixed),
                               rtol=1e-2, atol=1e-2)
    # 2) loose sanity check vs. the pure-f32 reference (bf16 operand rounding)
    ref_f32 = jax.block_until_ready(
        _ref_forward(x, params, num_classes, anchors, mixed=False))
    np.testing.assert_allclose(np.asarray(pred), np.asarray(ref_f32),
                               rtol=5e-2, atol=5e-2)

    print("KERNEL_OK")
</pallas_src>

<mosaic_0001>
module attributes {stable_mosaic.version = 11 : i64} {
  func.func @_detection_head_kernel(%arg0: i32, %arg1: memref<1x64x256xf32, #tpu.memory_space<vmem>>, %arg2: memref<64x1xf32, #tpu.memory_space<vmem>>, %arg3: memref<64x1xf32, #tpu.memory_space<vmem>>, %arg4: memref<3x3x256xf32, #tpu.memory_space<vmem>>, %arg5: memref<256x256xbf16, #tpu.memory_space<vmem>>, %arg6: memref<1x256xf32, #tpu.memory_space<vmem>>, %arg7: memref<3x3x256xf32, #tpu.memory_space<vmem>>, %arg8: memref<256x128xbf16, #tpu.memory_space<vmem>>, %arg9: memref<1x128xf32, #tpu.memory_space<vmem>>, %arg10: memref<3x3x256xf32, #tpu.memory_space<vmem>>, %arg11: memref<256x128xbf16, #tpu.memory_space<vmem>>, %arg12: memref<1x128xf32, #tpu.memory_space<vmem>>, %arg13: memref<3x3x256xf32, #tpu.memory_space<vmem>>, %arg14: memref<256x64xbf16, #tpu.memory_space<vmem>>, %arg15: memref<1x64xf32, #tpu.memory_space<vmem>>, %arg16: memref<128x128xbf16, #tpu.memory_space<vmem>>, %arg17: memref<128x128xbf16, #tpu.memory_space<vmem>>, %arg18: memref<64x128xbf16, #tpu.memory_space<vmem>>, %arg19: memref<1x128xf32, #tpu.memory_space<vmem>>, %arg20: memref<1x128xf32, #tpu.memory_space<vmem>>, %arg21: memref<1x64x128xf32, #tpu.memory_space<vmem>>) attributes {dimension_semantics = [#tpu.dimension_semantics<parallel>], iteration_bounds = array<i64: 2>, scalar_prefetch = 0 : i64, scratch_operands = 0 : i64, tpu.core_type = #tpu.core_type<tc>, window_params = [{transform_indices = @transform_0, window_bounds = array<i64: 1, 64, 256>}, {pipeline_mode = #tpu.pipeline_mode<synchronous>, transform_indices = @transform_1, window_bounds = array<i64: 64, 1>}, {pipeline_mode = #tpu.pipeline_mode<synchronous>, transform_indices = @transform_2, window_bounds = array<i64: 64, 1>}, {pipeline_mode = #tpu.pipeline_mode<synchronous>, transform_indices = @transform_3, window_bounds = array<i64: 3, 3, 256>}, {pipeline_mode = #tpu.pipeline_mode<synchronous>, transform_indices = @transform_4, window_bounds = array<i64: 256, 256>}, {pipeline_mode = #tpu.pipeline_mode<synchronous>, transform_indices = @transform_5, window_bounds = array<i64: 1, 256>}, {pipeline_mode = #tpu.pipeline_mode<synchronous>, transform_indices = @transform_6, window_bounds = array<i64: 3, 3, 256>}, {pipeline_mode = #tpu.pipeline_mode<synchronous>, transform_indices = @transform_7, window_bounds = array<i64: 256, 128>}, {pipeline_mode = #tpu.pipeline_mode<synchronous>, transform_indices = @transform_8, window_bounds = array<i64: 1, 128>}, {pipeline_mode = #tpu.pipeline_mode<synchronous>, transform_indices = @transform_9, window_bounds = array<i64: 3, 3, 256>}, {pipeline_mode = #tpu.pipeline_mode<synchronous>, transform_indices = @transform_10, window_bounds = array<i64: 256, 128>}, {pipeline_mode = #tpu.pipeline_mode<synchronous>, transform_indices = @transform_11, window_bounds = array<i64: 1, 128>}, {pipeline_mode = #tpu.pipeline_mode<synchronous>, transform_indices = @transform_12, window_bounds = array<i64: 3, 3, 256>}, {pipeline_mode = #tpu.pipeline_mode<synchronous>, transform_indices = @transform_13, window_bounds = array<i64: 256, 64>}, {pipeline_mode = #tpu.pipeline_mode<synchronous>, transform_indices = @transform_14, window_bounds = array<i64: 1, 64>}, {pipeline_mode = #tpu.pipeline_mode<synchronous>, transform_indices = @transform_15, window_bounds = array<i64: 128, 128>}, {pipeline_mode = #tpu.pipeline_mode<synchronous>, transform_indices = @transform_16, window_bounds = array<i64: 128, 128>}, {pipeline_mode = #tpu.pipeline_mode<synchronous>, transform_indices = @transform_17, window_bounds = array<i64: 64, 128>}, {pipeline_mode = #tpu.pipeline_mode<synchronous>, transform_indices = @transform_18, window_bounds = array<i64: 1, 128>}, {pipeline_mode = #tpu.pipeline_mode<synchronous>, transform_indices = @transform_19, window_bounds = array<i64: 1, 128>}, {transform_indices = @transform_20, window_bounds = array<i64: 1, 64, 128>}]} {
    %c0 = arith.constant 0 : index
    %c0_0 = arith.constant 0 : index
    %0 = vector.load %arg2[%c0, %c0_0] : memref<64x1xf32, #tpu.memory_space<vmem>>, vector<64x1xf32>
    %c0_1 = arith.constant 0 : index
    %c0_2 = arith.constant 0 : index
    %1 = vector.load %arg3[%c0_1, %c0_2] : memref<64x1xf32, #tpu.memory_space<vmem>>, vector<64x1xf32>
    %c0_3 = arith.constant 0 : index
    %c0_4 = arith.constant 0 : index
    %c0_5 = arith.constant 0 : index
    %2 = vector.load %arg1[%c0_3, %c0_4, %c0_5] : memref<1x64x256xf32, #tpu.memory_space<vmem>>, vector<1x64x256xf32>
    %3 = vector.shape_cast %2 : vector<1x64x256xf32> to vector<64x256xf32>
    %c0_6 = arith.constant 0 : index
    %c0_7 = arith.constant 0 : index
    %c0_8 = arith.constant 0 : index
    %4 = vector.load %arg4[%c0_6, %c0_7, %c0_8] : memref<3x3x256xf32, #tpu.memory_space<vmem>>, vector<3x3x256xf32>
    %cst = arith.constant 0.000000e+00 : f32
    %5 = vector.broadcast %cst : f32 to vector<1x256xf32>
    %cst_9 = arith.constant 0.000000e+00 : f32
    %6 = vector.broadcast %cst_9 : f32 to vector<8x256xf32>
    %7 = vector.extract_strided_slice %3 {offsets = [0, 0], sizes = [63, 256], strides = [1, 1]} : vector<64x256xf32> to vector<63x256xf32>
    %8 = tpu.concatenate %5, %7 in 0 : vector<1x256xf32>, vector<63x256xf32> -> vector<64x256xf32>
    %9 = vector.broadcast %0 : vector<64x1xf32> to vector<64x256xf32>
    %10 = arith.mulf %9, %8 : vector<64x256xf32>
    %11 = vector.extract_strided_slice %3 {offsets = [1, 0], sizes = [63, 256], strides = [1, 1]} : vector<64x256xf32> to vector<63x256xf32>
    %12 = tpu.concatenate %11, %5 in 0 : vector<63x256xf32>, vector<1x256xf32> -> vector<64x256xf32>
    %13 = vector.broadcast %1 : vector<64x1xf32> to vector<64x256xf32>
    %14 = arith.mulf %13, %12 : vector<64x256xf32>
    %cst_10 = arith.constant 0.000000e+00 : f32
    %15 = vector.broadcast %cst_10 : f32 to vector<64x256xf32>
    %16 = vector.extract_strided_slice %10 {offsets = [0, 0], sizes = [56, 256], strides = [1, 1]} : vector<64x256xf32> to vector<56x256xf32>
    %17 = tpu.concatenate %6, %16 in 0 : vector<8x256xf32>, vector<56x256xf32> -> vector<64x256xf32>
    %18 = vector.extract_strided_slice %4 {offsets = [0, 0, 0], sizes = [1, 1, 256], strides = [1, 1, 1]} : vector<3x3x256xf32> to vector<1x1x256xf32>
    %19 = vector.shape_cast %18 : vector<1x1x256xf32> to vector<1x256xf32>
    %20 = vector.broadcast %19 : vector<1x256xf32> to vector<64x256xf32>
    %21 = arith.mulf %17, %20 : vector<64x256xf32>
    %22 = arith.addf %15, %21 : vector<64x256xf32>
    %23 = vector.extract_strided_slice %3 {offsets = [0, 0], sizes = [56, 256], strides = [1, 1]} : vector<64x256xf32> to vector<56x256xf32>
    %24 = tpu.concatenate %6, %23 in 0 : vector<8x256xf32>, vector<56x256xf32> -> vector<64x256xf32>
    %25 = vector.extract_strided_slice %4 {offsets = [0, 1, 0], sizes = [1, 1, 256], strides = [1, 1, 1]} : vector<3x3x256xf32> to vector<1x1x256xf32>
    %26 = vector.shape_cast %25 : vector<1x1x256xf32> to vector<1x256xf32>
    %27 = vector.broadcast %26 : vector<1x256xf32> to vector<64x256xf32>
    %28 = arith.mulf %24, %27 : vector<64x256xf32>
    %29 = arith.addf %22, %28 : vector<64x256xf32>
    %30 = vector.extract_strided_slice %14 {offsets = [0, 0], sizes = [56, 256], strides = [1, 1]} : vector<64x256xf32> to vector<56x256xf32>
    %31 = tpu.concatenate %6, %30 in 0 : vector<8x256xf32>, vector<56x256xf32> -> vector<64x256xf32>
    %32 = vector.extract_strided_slice %4 {offsets = [0, 2, 0], sizes = [1, 1, 256], strides = [1, 1, 1]} : vector<3x3x256xf32> to vector<1x1x256xf32>
    %33 = vector.shape_cast %32 : vector<1x1x256xf32> to vector<1x256xf32>
    %34 = vector.broadcast %33 : vector<1x256xf32> to vector<64x256xf32>
    %35 = arith.mulf %31, %34 : vector<64x256xf32>
    %36 = arith.addf %29, %35 : vector<64x256xf32>
    %37 = vector.extract_strided_slice %4 {offsets = [1, 0, 0], sizes = [1, 1, 256], strides = [1, 1, 1]} : vector<3x3x256xf32> to vector<1x1x256xf32>
    %38 = vector.shape_cast %37 : vector<1x1x256xf32> to vector<1x256xf32>
    %39 = vector.broadcast %38 : vector<1x256xf32> to vector<64x256xf32>
    %40 = arith.mulf %10, %39 : vector<64x256xf32>
    %41 = arith.addf %36, %40 : vector<64x256xf32>
    %42 = vector.extract_strided_slice %4 {offsets = [1, 1, 0], sizes = [1, 1, 256], strides = [1, 1, 1]} : vector<3x3x256xf32> to vector<1x1x256xf32>
    %43 = vector.shape_cast %42 : vector<1x1x256xf32> to vector<1x256xf32>
    %44 = vector.broadcast %43 : vector<1x256xf32> to vector<64x256xf32>
    %45 = arith.mulf %3, %44 : vector<64x256xf32>
    %46 = arith.addf %41, %45 : vector<64x256xf32>
    %47 = vector.extract_strided_slice %4 {offsets = [1, 2, 0], sizes = [1, 1, 256], strides = [1, 1, 1]} : vector<3x3x256xf32> to vector<1x1x256xf32>
    %48 = vector.shape_cast %47 : vector<1x1x256xf32> to vector<1x256xf32>
    %49 = vector.broadcast %48 : vector<1x256xf32> to vector<64x256xf32>
    %50 = arith.mulf %14, %49 : vector<64x256xf32>
    %51 = arith.addf %46, %50 : vector<64x256xf32>
    %52 = vector.extract_strided_slice %10 {offsets = [8, 0], sizes = [56, 256], strides = [1, 1]} : vector<64x256xf32> to vector<56x256xf32>
    %53 = tpu.concatenate %52, %6 in 0 : vector<56x256xf32>, vector<8x256xf32> -> vector<64x256xf32>
    %54 = vector.extract_strided_slice %4 {offsets = [2, 0, 0], sizes = [1, 1, 256], strides = [1, 1, 1]} : vector<3x3x256xf32> to vector<1x1x256xf32>
    %55 = vector.shape_cast %54 : vector<1x1x256xf32> to vector<1x256xf32>
    %56 = vector.broadcast %55 : vector<1x256xf32> to vector<64x256xf32>
    %57 = arith.mulf %53, %56 : vector<64x256xf32>
    %58 = arith.addf %51, %57 : vector<64x256xf32>
    %59 = vector.extract_strided_slice %3 {offsets = [8, 0], sizes = [56, 256], strides = [1, 1]} : vector<64x256xf32> to vector<56x256xf32>
    %60 = tpu.concatenate %59, %6 in 0 : vector<56x256xf32>, vector<8x256xf32> -> vector<64x256xf32>
    %61 = vector.extract_strided_slice %4 {offsets = [2, 1, 0], sizes = [1, 1, 256], strides = [1, 1, 1]} : vector<3x3x256xf32> to vector<1x1x256xf32>
    %62 = vector.shape_cast %61 : vector<1x1x256xf32> to vector<1x256xf32>
    %63 = vector.broadcast %62 : vector<1x256xf32> to vector<64x256xf32>
    %64 = arith.mulf %60, %63 : vector<64x256xf32>
    %65 = arith.addf %58, %64 : vector<64x256xf32>
    %66 = vector.extract_strided_slice %14 {offsets = [8, 0], sizes = [56, 256], strides = [1, 1]} : vector<64x256xf32> to vector<56x256xf32>
    %67 = tpu.concatenate %66, %6 in 0 : vector<56x256xf32>, vector<8x256xf32> -> vector<64x256xf32>
    %68 = vector.extract_strided_slice %4 {offsets = [2, 2, 0], sizes = [1, 1, 256], strides = [1, 1, 1]} : vector<3x3x256xf32> to vector<1x1x256xf32>
    %69 = vector.shape_cast %68 : vector<1x1x256xf32> to vector<1x256xf32>
    %70 = vector.broadcast %69 : vector<1x256xf32> to vector<64x256xf32>
    %71 = arith.mulf %67, %70 : vector<64x256xf32>
    %72 = arith.addf %65, %71 : vector<64x256xf32>
    %73 = arith.truncf %72 : vector<64x256xf32> to vector<64x256xbf16>
    %c0_11 = arith.constant 0 : index
    %c0_12 = arith.constant 0 : index
    %74 = vector.load %arg5[%c0_11, %c0_12] : memref<256x256xbf16, #tpu.memory_space<vmem>>, vector<256x256xbf16>
    %cst_13 = arith.constant dense<0.000000e+00> : vector<64x256xf32>
    %75 = tpu.matmul %73, %74, %cst_13 {dimension_numbers = #tpu.dot_dimension_numbers<[1], [0], [0], [1], [0, 0, 1, 1], [], []>} : vector<64x256xbf16>, vector<256x256xbf16>, vector<64x256xf32> -> vector<64x256xf32>
    %c0_14 = arith.constant 0 : index
    %c0_15 = arith.constant 0 : index
    %76 = vector.load %arg6[%c0_14, %c0_15] : memref<1x256xf32, #tpu.memory_space<vmem>>, vector<1x256xf32>
    %77 = vector.broadcast %76 : vector<1x256xf32> to vector<64x256xf32>
    %78 = arith.addf %75, %77 : vector<64x256xf32>
    %cst_16 = arith.constant 0.000000e+00 : f32
    %79 = vector.broadcast %cst_16 : f32 to vector<64x256xf32>
    %80 = arith.cmpf ogt, %78, %79 : vector<64x256xf32>
    %cst_17 = arith.constant 1.000000e-01 : f32
    %81 = vector.broadcast %cst_17 : f32 to vector<64x256xf32>
    %82 = arith.mulf %81, %78 : vector<64x256xf32>
    %83 = arith.select %80, %78, %82 : vector<64x256xi1>, vector<64x256xf32>
    %c0_18 = arith.constant 0 : index
    %c0_19 = arith.constant 0 : index
    %c0_20 = arith.constant 0 : index
    %84 = vector.load %arg7[%c0_18, %c0_19, %c0_20] : memref<3x3x256xf32, #tpu.memory_space<vmem>>, vector<3x3x256xf32>
    %cst_21 = arith.constant 0.000000e+00 : f32
    %85 = vector.broadcast %cst_21 : f32 to vector<1x256xf32>
    %cst_22 = arith.constant 0.000000e+00 : f32
    %86 = vector.broadcast %cst_22 : f32 to vector<8x256xf32>
    %87 = vector.extract_strided_slice %83 {offsets = [0, 0], sizes = [63, 256], strides = [1, 1]} : vector<64x256xf32> to vector<63x256xf32>
    %88 = tpu.concatenate %85, %87 in 0 : vector<1x256xf32>, vector<63x256xf32> -> vector<64x256xf32>
    %89 = vector.broadcast %0 : vector<64x1xf32> to vector<64x256xf32>
    %90 = arith.mulf %89, %88 : vector<64x256xf32>
    %91 = vector.extract_strided_slice %83 {offsets = [1, 0], sizes = [63, 256], strides = [1, 1]} : vector<64x256xf32> to vector<63x256xf32>
    %92 = tpu.concatenate %91, %85 in 0 : vector<63x256xf32>, vector<1x256xf32> -> vector<64x256xf32>
    %93 = vector.broadcast %1 : vector<64x1xf32> to vector<64x256xf32>
    %94 = arith.mulf %93, %92 : vector<64x256xf32>
    %cst_23 = arith.constant 0.000000e+00 : f32
    %95 = vector.broadcast %cst_23 : f32 to vector<64x256xf32>
    %96 = vector.extract_strided_slice %90 {offsets = [0, 0], sizes = [56, 256], strides = [1, 1]} : vector<64x256xf32> to vector<56x256xf32>
    %97 = tpu.concatenate %86, %96 in 0 : vector<8x256xf32>, vector<56x256xf32> -> vector<64x256xf32>
    %98 = vector.extract_strided_slice %84 {offsets = [0, 0, 0], sizes = [1, 1, 256], strides = [1, 1, 1]} : vector<3x3x256xf32> to vector<1x1x256xf32>
    %99 = vector.shape_cast %98 : vector<1x1x256xf32> to vector<1x256xf32>
    %100 = vector.broadcast %99 : vector<1x256xf32> to vector<64x256xf32>
    %101 = arith.mulf %97, %100 : vector<64x256xf32>
    %102 = arith.addf %95, %101 : vector<64x256xf32>
    %103 = vector.extract_strided_slice %83 {offsets = [0, 0], sizes = [56, 256], strides = [1, 1]} : vector<64x256xf32> to vector<56x256xf32>
    %104 = tpu.concatenate %86, %103 in 0 : vector<8x256xf32>, vector<56x256xf32> -> vector<64x256xf32>
    %105 = vector.extract_strided_slice %84 {offsets = [0, 1, 0], sizes = [1, 1, 256], strides = [1, 1, 1]} : vector<3x3x256xf32> to vector<1x1x256xf32>
    %106 = vector.shape_cast %105 : vector<1x1x256xf32> to vector<1x256xf32>
    %107 = vector.broadcast %106 : vector<1x256xf32> to vector<64x256xf32>
    %108 = arith.mulf %104, %107 : vector<64x256xf32>
    %109 = arith.addf %102, %108 : vector<64x256xf32>
    %110 = vector.extract_strided_slice %94 {offsets = [0, 0], sizes = [56, 256], strides = [1, 1]} : vector<64x256xf32> to vector<56x256xf32>
    %111 = tpu.concatenate %86, %110 in 0 : vector<8x256xf32>, vector<56x256xf32> -> vector<64x256xf32>
    %112 = vector.extract_strided_slice %84 {offsets = [0, 2, 0], sizes = [1, 1, 256], strides = [1, 1, 1]} : vector<3x3x256xf32> to vector<1x1x256xf32>
    %113 = vector.shape_cast %112 : vector<1x1x256xf32> to vector<1x256xf32>
    %114 = vector.broadcast %113 : vector<1x256xf32> to vector<64x256xf32>
    %115 = arith.mulf %111, %114 : vector<64x256xf32>
    %116 = arith.addf %109, %115 : vector<64x256xf32>
    %117 = vector.extract_strided_slice %84 {offsets = [1, 0, 0], sizes = [1, 1, 256], strides = [1, 1, 1]} : vector<3x3x256xf32> to vector<1x1x256xf32>
    %118 = vector.shape_cast %117 : vector<1x1x256xf32> to vector<1x256xf32>
    %119 = vector.broadcast %118 : vector<1x256xf32> to vector<64x256xf32>
    %120 = arith.mulf %90, %119 : vector<64x256xf32>
    %121 = arith.addf %116, %120 : vector<64x256xf32>
    %122 = vector.extract_strided_slice %84 {offsets = [1, 1, 0], sizes = [1, 1, 256], strides = [1, 1, 1]} : vector<3x3x256xf32> to vector<1x1x256xf32>
    %123 = vector.shape_cast %122 : vector<1x1x256xf32> to vector<1x256xf32>
    %124 = vector.broadcast %123 : vector<1x256xf32> to vector<64x256xf32>
    %125 = arith.mulf %83, %124 : vector<64x256xf32>
    %126 = arith.addf %121, %125 : vector<64x256xf32>
    %127 = vector.extract_strided_slice %84 {offsets = [1, 2, 0], sizes = [1, 1, 256], strides = [1, 1, 1]} : vector<3x3x256xf32> to vector<1x1x256xf32>
    %128 = vector.shape_cast %127 : vector<1x1x256xf32> to vector<1x256xf32>
    %129 = vector.broadcast %128 : vector<1x256xf32> to vector<64x256xf32>
    %130 = arith.mulf %94, %129 : vector<64x256xf32>
    %131 = arith.addf %126, %130 : vector<64x256xf32>
    %132 = vector.extract_strided_slice %90 {offsets = [8, 0], sizes = [56, 256], strides = [1, 1]} : vector<64x256xf32> to vector<56x256xf32>
    %133 = tpu.concatenate %132, %86 in 0 : vector<56x256xf32>, vector<8x256xf32> -> vector<64x256xf32>
    %134 = vector.extract_strided_slice %84 {offsets = [2, 0, 0], sizes = [1, 1, 256], strides = [1, 1, 1]} : vector<3x3x256xf32> to vector<1x1x256xf32>
    %135 = vector.shape_cast %134 : vector<1x1x256xf32> to vector<1x256xf32>
    %136 = vector.broadcast %135 : vector<1x256xf32> to vector<64x256xf32>
    %137 = arith.mulf %133, %136 : vector<64x256xf32>
    %138 = arith.addf %131, %137 : vector<64x256xf32>
    %139 = vector.extract_strided_slice %83 {offsets = [8, 0], sizes = [56, 256], strides = [1, 1]} : vector<64x256xf32> to vector<56x256xf32>
    %140 = tpu.concatenate %139, %86 in 0 : vector<56x256xf32>, vector<8x256xf32> -> vector<64x256xf32>
    %141 = vector.extract_strided_slice %84 {offsets = [2, 1, 0], sizes = [1, 1, 256], strides = [1, 1, 1]} : vector<3x3x256xf32> to vector<1x1x256xf32>
    %142 = vector.shape_cast %141 : vector<1x1x256xf32> to vector<1x256xf32>
    %143 = vector.broadcast %142 : vector<1x256xf32> to vector<64x256xf32>
    %144 = arith.mulf %140, %143 : vector<64x256xf32>
    %145 = arith.addf %138, %144 : vector<64x256xf32>
    %146 = vector.extract_strided_slice %94 {offsets = [8, 0], sizes = [56, 256], strides = [1, 1]} : vector<64x256xf32> to vector<56x256xf32>
    %147 = tpu.concatenate %146, %86 in 0 : vector<56x256xf32>, vector<8x256xf32> -> vector<64x256xf32>
    %148 = vector.extract_strided_slice %84 {offsets = [2, 2, 0], sizes = [1, 1, 256], strides = [1, 1, 1]} : vector<3x3x256xf32> to vector<1x1x256xf32>
    %149 = vector.shape_cast %148 : vector<1x1x256xf32> to vector<1x256xf32>
    %150 = vector.broadcast %149 : vector<1x256xf32> to vector<64x256xf32>
    %151 = arith.mulf %147, %150 : vector<64x256xf32>
    %152 = arith.addf %145, %151 : vector<64x256xf32>
    %153 = arith.truncf %152 : vector<64x256xf32> to vector<64x256xbf16>
    %c0_24 = arith.constant 0 : index
    %c0_25 = arith.constant 0 : index
    %154 = vector.load %arg8[%c0_24, %c0_25] : memref<256x128xbf16, #tpu.memory_space<vmem>>, vector<256x128xbf16>
    %cst_26 = arith.constant dense<0.000000e+00> : vector<64x128xf32>
    %155 = tpu.matmul %153, %154, %cst_26 {dimension_numbers = #tpu.dot_dimension_numbers<[1], [0], [0], [1], [0, 0, 1, 1], [], []>} : vector<64x256xbf16>, vector<256x128xbf16>, vector<64x128xf32> -> vector<64x128xf32>
    %c0_27 = arith.constant 0 : index
    %c0_28 = arith.constant 0 : index
    %156 = vector.load %arg9[%c0_27, %c0_28] : memref<1x128xf32, #tpu.memory_space<vmem>>, vector<1x128xf32>
    %157 = vector.broadcast %156 : vector<1x128xf32> to vector<64x128xf32>
    %158 = arith.addf %155, %157 : vector<64x128xf32>
    %cst_29 = arith.constant 0.000000e+00 : f32
    %159 = vector.broadcast %cst_29 : f32 to vector<64x128xf32>
    %160 = arith.cmpf ogt, %158, %159 : vector<64x128xf32>
    %cst_30 = arith.constant 1.000000e-01 : f32
    %161 = vector.broadcast %cst_30 : f32 to vector<64x128xf32>
    %162 = arith.mulf %161, %158 : vector<64x128xf32>
    %163 = arith.select %160, %158, %162 : vector<64x128xi1>, vector<64x128xf32>
    %c0_31 = arith.constant 0 : index
    %c0_32 = arith.constant 0 : index
    %c0_33 = arith.constant 0 : index
    %164 = vector.load %arg10[%c0_31, %c0_32, %c0_33] : memref<3x3x256xf32, #tpu.memory_space<vmem>>, vector<3x3x256xf32>
    %cst_34 = arith.constant 0.000000e+00 : f32
    %165 = vector.broadcast %cst_34 : f32 to vector<1x256xf32>
    %cst_35 = arith.constant 0.000000e+00 : f32
    %166 = vector.broadcast %cst_35 : f32 to vector<8x256xf32>
    %167 = vector.extract_strided_slice %83 {offsets = [0, 0], sizes = [63, 256], strides = [1, 1]} : vector<64x256xf32> to vector<63x256xf32>
    %168 = tpu.concatenate %165, %167 in 0 : vector<1x256xf32>, vector<63x256xf32> -> vector<64x256xf32>
    %169 = vector.broadcast %0 : vector<64x1xf32> to vector<64x256xf32>
    %170 = arith.mulf %169, %168 : vector<64x256xf32>
    %171 = vector.extract_strided_slice %83 {offsets = [1, 0], sizes = [63, 256], strides = [1, 1]} : vector<64x256xf32> to vector<63x256xf32>
    %172 = tpu.concatenate %171, %165 in 0 : vector<63x256xf32>, vector<1x256xf32> -> vector<64x256xf32>
    %173 = vector.broadcast %1 : vector<64x1xf32> to vector<64x256xf32>
    %174 = arith.mulf %173, %172 : vector<64x256xf32>
    %cst_36 = arith.constant 0.000000e+00 : f32
    %175 = vector.broadcast %cst_36 : f32 to vector<64x256xf32>
    %176 = vector.extract_strided_slice %170 {offsets = [0, 0], sizes = [56, 256], strides = [1, 1]} : vector<64x256xf32> to vector<56x256xf32>
    %177 = tpu.concatenate %166, %176 in 0 : vector<8x256xf32>, vector<56x256xf32> -> vector<64x256xf32>
    %178 = vector.extract_strided_slice %164 {offsets = [0, 0, 0], sizes = [1, 1, 256], strides = [1, 1, 1]} : vector<3x3x256xf32> to vector<1x1x256xf32>
    %179 = vector.shape_cast %178 : vector<1x1x256xf32> to vector<1x256xf32>
    %180 = vector.broadcast %179 : vector<1x256xf32> to vector<64x256xf32>
    %181 = arith.mulf %177, %180 : vector<64x256xf32>
    %182 = arith.addf %175, %181 : vector<64x256xf32>
    %183 = vector.extract_strided_slice %83 {offsets = [0, 0], sizes = [56, 256], strides = [1, 1]} : vector<64x256xf32> to vector<56x256xf32>
    %184 = tpu.concatenate %166, %183 in 0 : vector<8x256xf32>, vector<56x256xf32> -> vector<64x256xf32>
    %185 = vector.extract_strided_slice %164 {offsets = [0, 1, 0], sizes = [1, 1, 256], strides = [1, 1, 1]} : vector<3x3x256xf32> to vector<1x1x256xf32>
    %186 = vector.shape_cast %185 : vector<1x1x256xf32> to vector<1x256xf32>
    %187 = vector.broadcast %186 : vector<1x256xf32> to vector<64x256xf32>
    %188 = arith.mulf %184, %187 : vector<64x256xf32>
    %189 = arith.addf %182, %188 : vector<64x256xf32>
    %190 = vector.extract_strided_slice %174 {offsets = [0, 0], sizes = [56, 256], strides = [1, 1]} : vector<64x256xf32> to vector<56x256xf32>
    %191 = tpu.concatenate %166, %190 in 0 : vector<8x256xf32>, vector<56x256xf32> -> vector<64x256xf32>
    %192 = vector.extract_strided_slice %164 {offsets = [0, 2, 0], sizes = [1, 1, 256], strides = [1, 1, 1]} : vector<3x3x256xf32> to vector<1x1x256xf32>
    %193 = vector.shape_cast %192 : vector<1x1x256xf32> to vector<1x256xf32>
    %194 = vector.broadcast %193 : vector<1x256xf32> to vector<64x256xf32>
    %195 = arith.mulf %191, %194 : vector<64x256xf32>
    %196 = arith.addf %189, %195 : vector<64x256xf32>
    %197 = vector.extract_strided_slice %164 {offsets = [1, 0, 0], sizes = [1, 1, 256], strides = [1, 1, 1]} : vector<3x3x256xf32> to vector<1x1x256xf32>
    %198 = vector.shape_cast %197 : vector<1x1x256xf32> to vector<1x256xf32>
    %199 = vector.broadcast %198 : vector<1x256xf32> to vector<64x256xf32>
    %200 = arith.mulf %170, %199 : vector<64x256xf32>
    %201 = arith.addf %196, %200 : vector<64x256xf32>
    %202 = vector.extract_strided_slice %164 {offsets = [1, 1, 0], sizes = [1, 1, 256], strides = [1, 1, 1]} : vector<3x3x256xf32> to vector<1x1x256xf32>
    %203 = vector.shape_cast %202 : vector<1x1x256xf32> to vector<1x256xf32>
    %204 = vector.broadcast %203 : vector<1x256xf32> to vector<64x256xf32>
    %205 = arith.mulf %83, %204 : vector<64x256xf32>
    %206 = arith.addf %201, %205 : vector<64x256xf32>
    %207 = vector.extract_strided_slice %164 {offsets = [1, 2, 0], sizes = [1, 1, 256], strides = [1, 1, 1]} : vector<3x3x256xf32> to vector<1x1x256xf32>
    %208 = vector.shape_cast %207 : vector<1x1x256xf32> to vector<1x256xf32>
    %209 = vector.broadcast %208 : vector<1x256xf32> to vector<64x256xf32>
    %210 = arith.mulf %174, %209 : vector<64x256xf32>
    %211 = arith.addf %206, %210 : vector<64x256xf32>
    %212 = vector.extract_strided_slice %170 {offsets = [8, 0], sizes = [56, 256], strides = [1, 1]} : vector<64x256xf32> to vector<56x256xf32>
    %213 = tpu.concatenate %212, %166 in 0 : vector<56x256xf32>, vector<8x256xf32> -> vector<64x256xf32>
    %214 = vector.extract_strided_slice %164 {offsets = [2, 0, 0], sizes = [1, 1, 256], strides = [1, 1, 1]} : vector<3x3x256xf32> to vector<1x1x256xf32>
    %215 = vector.shape_cast %214 : vector<1x1x256xf32> to vector<1x256xf32>
    %216 = vector.broadcast %215 : vector<1x256xf32> to vector<64x256xf32>
    %217 = arith.mulf %213, %216 : vector<64x256xf32>
    %218 = arith.addf %211, %217 : vector<64x256xf32>
    %219 = vector.extract_strided_slice %83 {offsets = [8, 0], sizes = [56, 256], strides = [1, 1]} : vector<64x256xf32> to vector<56x256xf32>
    %220 = tpu.concatenate %219, %166 in 0 : vector<56x256xf32>, vector<8x256xf32> -> vector<64x256xf32>
    %221 = vector.extract_strided_slice %164 {offsets = [2, 1, 0], sizes = [1, 1, 256], strides = [1, 1, 1]} : vector<3x3x256xf32> to vector<1x1x256xf32>
    %222 = vector.shape_cast %221 : vector<1x1x256xf32> to vector<1x256xf32>
    %223 = vector.broadcast %222 : vector<1x256xf32> to vector<64x256xf32>
    %224 = arith.mulf %220, %223 : vector<64x256xf32>
    %225 = arith.addf %218, %224 : vector<64x256xf32>
    %226 = vector.extract_strided_slice %174 {offsets = [8, 0], sizes = [56, 256], strides = [1, 1]} : vector<64x256xf32> to vector<56x256xf32>
    %227 = tpu.concatenate %226, %166 in 0 : vector<56x256xf32>, vector<8x256xf32> -> vector<64x256xf32>
    %228 = vector.extract_strided_slice %164 {offsets = [2, 2, 0], sizes = [1, 1, 256], strides = [1, 1, 1]} : vector<3x3x256xf32> to vector<1x1x256xf32>
    %229 = vector.shape_cast %228 : vector<1x1x256xf32> to vector<1x256xf32>
    %230 = vector.broadcast %229 : vector<1x256xf32> to vector<64x256xf32>
    %231 = arith.mulf %227, %230 : vector<64x256xf32>
    %232 = arith.addf %225, %231 : vector<64x256xf32>
    %233 = arith.truncf %232 : vector<64x256xf32> to vector<64x256xbf16>
    %c0_37 = arith.constant 0 : index
    %c0_38 = arith.constant 0 : index
    %234 = vector.load %arg11[%c0_37, %c0_38] : memref<256x128xbf16, #tpu.memory_space<vmem>>, vector<256x128xbf16>
    %cst_39 = arith.constant dense<0.000000e+00> : vector<64x128xf32>
    %235 = tpu.matmul %233, %234, %cst_39 {dimension_numbers = #tpu.dot_dimension_numbers<[1], [0], [0], [1], [0, 0, 1, 1], [], []>} : vector<64x256xbf16>, vector<256x128xbf16>, vector<64x128xf32> -> vector<64x128xf32>
    %c0_40 = arith.constant 0 : index
    %c0_41 = arith.constant 0 : index
    %236 = vector.load %arg12[%c0_40, %c0_41] : memref<1x128xf32, #tpu.memory_space<vmem>>, vector<1x128xf32>
    %237 = vector.broadcast %236 : vector<1x128xf32> to vector<64x128xf32>
    %238 = arith.addf %235, %237 : vector<64x128xf32>
    %cst_42 = arith.constant 0.000000e+00 : f32
    %239 = vector.broadcast %cst_42 : f32 to vector<64x128xf32>
    %240 = arith.cmpf ogt, %238, %239 : vector<64x128xf32>
    %cst_43 = arith.constant 1.000000e-01 : f32
    %241 = vector.broadcast %cst_43 : f32 to vector<64x128xf32>
    %242 = arith.mulf %241, %238 : vector<64x128xf32>
    %243 = arith.select %240, %238, %242 : vector<64x128xi1>, vector<64x128xf32>
    %c0_44 = arith.constant 0 : index
    %c0_45 = arith.constant 0 : index
    %c0_46 = arith.constant 0 : index
    %244 = vector.load %arg13[%c0_44, %c0_45, %c0_46] : memref<3x3x256xf32, #tpu.memory_space<vmem>>, vector<3x3x256xf32>
    %cst_47 = arith.constant 0.000000e+00 : f32
    %245 = vector.broadcast %cst_47 : f32 to vector<1x256xf32>
    %cst_48 = arith.constant 0.000000e+00 : f32
    %246 = vector.broadcast %cst_48 : f32 to vector<8x256xf32>
    %247 = vector.extract_strided_slice %83 {offsets = [0, 0], sizes = [63, 256], strides = [1, 1]} : vector<64x256xf32> to vector<63x256xf32>
    %248 = tpu.concatenate %245, %247 in 0 : vector<1x256xf32>, vector<63x256xf32> -> vector<64x256xf32>
    %249 = vector.broadcast %0 : vector<64x1xf32> to vector<64x256xf32>
    %250 = arith.mulf %249, %248 : vector<64x256xf32>
    %251 = vector.extract_strided_slice %83 {offsets = [1, 0], sizes = [63, 256], strides = [1, 1]} : vector<64x256xf32> to vector<63x256xf32>
    %252 = tpu.concatenate %251, %245 in 0 : vector<63x256xf32>, vector<1x256xf32> -> vector<64x256xf32>
    %253 = vector.broadcast %1 : vector<64x1xf32> to vector<64x256xf32>
    %254 = arith.mulf %253, %252 : vector<64x256xf32>
    %cst_49 = arith.constant 0.000000e+00 : f32
    %255 = vector.broadcast %cst_49 : f32 to vector<64x256xf32>
    %256 = vector.extract_strided_slice %250 {offsets = [0, 0], sizes = [56, 256], strides = [1, 1]} : vector<64x256xf32> to vector<56x256xf32>
    %257 = tpu.concatenate %246, %256 in 0 : vector<8x256xf32>, vector<56x256xf32> -> vector<64x256xf32>
    %258 = vector.extract_strided_slice %244 {offsets = [0, 0, 0], sizes = [1, 1, 256], strides = [1, 1, 1]} : vector<3x3x256xf32> to vector<1x1x256xf32>
    %259 = vector.shape_cast %258 : vector<1x1x256xf32> to vector<1x256xf32>
    %260 = vector.broadcast %259 : vector<1x256xf32> to vector<64x256xf32>
    %261 = arith.mulf %257, %260 : vector<64x256xf32>
    %262 = arith.addf %255, %261 : vector<64x256xf32>
    %263 = vector.extract_strided_slice %83 {offsets = [0, 0], sizes = [56, 256], strides = [1, 1]} : vector<64x256xf32> to vector<56x256xf32>
    %264 = tpu.concatenate %246, %263 in 0 : vector<8x256xf32>, vector<56x256xf32> -> vector<64x256xf32>
    %265 = vector.extract_strided_slice %244 {offsets = [0, 1, 0], sizes = [1, 1, 256], strides = [1, 1, 1]} : vector<3x3x256xf32> to vector<1x1x256xf32>
    %266 = vector.shape_cast %265 : vector<1x1x256xf32> to vector<1x256xf32>
    %267 = vector.broadcast %266 : vector<1x256xf32> to vector<64x256xf32>
    %268 = arith.mulf %264, %267 : vector<64x256xf32>
    %269 = arith.addf %262, %268 : vector<64x256xf32>
    %270 = vector.extract_strided_slice %254 {offsets = [0, 0], sizes = [56, 256], strides = [1, 1]} : vector<64x256xf32> to vector<56x256xf32>
    %271 = tpu.concatenate %246, %270 in 0 : vector<8x256xf32>, vector<56x256xf32> -> vector<64x256xf32>
    %272 = vector.extract_strided_slice %244 {offsets = [0, 2, 0], sizes = [1, 1, 256], strides = [1, 1, 1]} : vector<3x3x256xf32> to vector<1x1x256xf32>
    %273 = vector.shape_cast %272 : vector<1x1x256xf32> to vector<1x256xf32>
    %274 = vector.broadcast %273 : vector<1x256xf32> to vector<64x256xf32>
    %275 = arith.mulf %271, %274 : vector<64x256xf32>
    %276 = arith.addf %269, %275 : vector<64x256xf32>
    %277 = vector.extract_strided_slice %244 {offsets = [1, 0, 0], sizes = [1, 1, 256], strides = [1, 1, 1]} : vector<3x3x256xf32> to vector<1x1x256xf32>
    %278 = vector.shape_cast %277 : vector<1x1x256xf32> to vector<1x256xf32>
    %279 = vector.broadcast %278 : vector<1x256xf32> to vector<64x256xf32>
    %280 = arith.mulf %250, %279 : vector<64x256xf32>
    %281 = arith.addf %276, %280 : vector<64x256xf32>
    %282 = vector.extract_strided_slice %244 {offsets = [1, 1, 0], sizes = [1, 1, 256], strides = [1, 1, 1]} : vector<3x3x256xf32> to vector<1x1x256xf32>
    %283 = vector.shape_cast %282 : vector<1x1x256xf32> to vector<1x256xf32>
    %284 = vector.broadcast %283 : vector<1x256xf32> to vector<64x256xf32>
    %285 = arith.mulf %83, %284 : vector<64x256xf32>
    %286 = arith.addf %281, %285 : vector<64x256xf32>
    %287 = vector.extract_strided_slice %244 {offsets = [1, 2, 0], sizes = [1, 1, 256], strides = [1, 1, 1]} : vector<3x3x256xf32> to vector<1x1x256xf32>
    %288 = vector.shape_cast %287 : vector<1x1x256xf32> to vector<1x256xf32>
    %289 = vector.broadcast %288 : vector<1x256xf32> to vector<64x256xf32>
    %290 = arith.mulf %254, %289 : vector<64x256xf32>
    %291 = arith.addf %286, %290 : vector<64x256xf32>
    %292 = vector.extract_strided_slice %250 {offsets = [8, 0], sizes = [56, 256], strides = [1, 1]} : vector<64x256xf32> to vector<56x256xf32>
    %293 = tpu.concatenate %292, %246 in 0 : vector<56x256xf32>, vector<8x256xf32> -> vector<64x256xf32>
    %294 = vector.extract_strided_slice %244 {offsets = [2, 0, 0], sizes = [1, 1, 256], strides = [1, 1, 1]} : vector<3x3x256xf32> to vector<1x1x256xf32>
    %295 = vector.shape_cast %294 : vector<1x1x256xf32> to vector<1x256xf32>
    %296 = vector.broadcast %295 : vector<1x256xf32> to vector<64x256xf32>
    %297 = arith.mulf %293, %296 : vector<64x256xf32>
    %298 = arith.addf %291, %297 : vector<64x256xf32>
    %299 = vector.extract_strided_slice %83 {offsets = [8, 0], sizes = [56, 256], strides = [1, 1]} : vector<64x256xf32> to vector<56x256xf32>
    %300 = tpu.concatenate %299, %246 in 0 : vector<56x256xf32>, vector<8x256xf32> -> vector<64x256xf32>
    %301 = vector.extract_strided_slice %244 {offsets = [2, 1, 0], sizes = [1, 1, 256], strides = [1, 1, 1]} : vector<3x3x256xf32> to vector<1x1x256xf32>
    %302 = vector.shape_cast %301 : vector<1x1x256xf32> to vector<1x256xf32>
    %303 = vector.broadcast %302 : vector<1x256xf32> to vector<64x256xf32>
    %304 = arith.mulf %300, %303 : vector<64x256xf32>
    %305 = arith.addf %298, %304 : vector<64x256xf32>
    %306 = vector.extract_strided_slice %254 {offsets = [8, 0], sizes = [56, 256], strides = [1, 1]} : vector<64x256xf32> to vector<56x256xf32>
    %307 = tpu.concatenate %306, %246 in 0 : vector<56x256xf32>, vector<8x256xf32> -> vector<64x256xf32>
    %308 = vector.extract_strided_slice %244 {offsets = [2, 2, 0], sizes = [1, 1, 256], strides = [1, 1, 1]} : vector<3x3x256xf32> to vector<1x1x256xf32>
    %309 = vector.shape_cast %308 : vector<1x1x256xf32> to vector<1x256xf32>
    %310 = vector.broadcast %309 : vector<1x256xf32> to vector<64x256xf32>
    %311 = arith.mulf %307, %310 : vector<64x256xf32>
    %312 = arith.addf %305, %311 : vector<64x256xf32>
    %313 = arith.truncf %312 : vector<64x256xf32> to vector<64x256xbf16>
    %c0_50 = arith.constant 0 : index
    %c0_51 = arith.constant 0 : index
    %314 = vector.load %arg14[%c0_50, %c0_51] : memref<256x64xbf16, #tpu.memory_space<vmem>>, vector<256x64xbf16>
    %cst_52 = arith.constant dense<0.000000e+00> : vector<64x64xf32>
    %315 = tpu.matmul %313, %314, %cst_52 {dimension_numbers = #tpu.dot_dimension_numbers<[1], [0], [0], [1], [0, 0, 1, 1], [], []>} : vector<64x256xbf16>, vector<256x64xbf16>, vector<64x64xf32> -> vector<64x64xf32>
    %c0_53 = arith.constant 0 : index
    %c0_54 = arith.constant 0 : index
    %316 = vector.load %arg15[%c0_53, %c0_54] : memref<1x64xf32, #tpu.memory_space<vmem>>, vector<1x64xf32>
    %317 = vector.broadcast %316 : vector<1x64xf32> to vector<64x64xf32>
    %318 = arith.addf %315, %317 : vector<64x64xf32>
    %cst_55 = arith.constant 0.000000e+00 : f32
    %319 = vector.broadcast %cst_55 : f32 to vector<64x64xf32>
    %320 = arith.cmpf ogt, %318, %319 : vector<64x64xf32>
    %cst_56 = arith.constant 1.000000e-01 : f32
    %321 = vector.broadcast %cst_56 : f32 to vector<64x64xf32>
    %322 = arith.mulf %321, %318 : vector<64x64xf32>
    %323 = arith.select %320, %318, %322 : vector<64x64xi1>, vector<64x64xf32>
    %324 = arith.truncf %163 : vector<64x128xf32> to vector<64x128xbf16>
    %c0_57 = arith.constant 0 : index
    %c0_58 = arith.constant 0 : index
    %325 = vector.load %arg16[%c0_57, %c0_58] : memref<128x128xbf16, #tpu.memory_space<vmem>>, vector<128x128xbf16>
    %cst_59 = arith.constant dense<0.000000e+00> : vector<64x128xf32>
    %326 = tpu.matmul %324, %325, %cst_59 {dimension_numbers = #tpu.dot_dimension_numbers<[1], [0], [0], [1], [0, 0, 1, 1], [], []>} : vector<64x128xbf16>, vector<128x128xbf16>, vector<64x128xf32> -> vector<64x128xf32>
    %327 = arith.truncf %243 : vector<64x128xf32> to vector<64x128xbf16>
    %c0_60 = arith.constant 0 : index
    %c0_61 = arith.constant 0 : index
    %328 = vector.load %arg17[%c0_60, %c0_61] : memref<128x128xbf16, #tpu.memory_space<vmem>>, vector<128x128xbf16>
    %cst_62 = arith.constant dense<0.000000e+00> : vector<64x128xf32>
    %329 = tpu.matmul %327, %328, %cst_62 {dimension_numbers = #tpu.dot_dimension_numbers<[1], [0], [0], [1], [0, 0, 1, 1], [], []>} : vector<64x128xbf16>, vector<128x128xbf16>, vector<64x128xf32> -> vector<64x128xf32>
    %330 = arith.addf %326, %329 : vector<64x128xf32>
    %331 = arith.truncf %323 : vector<64x64xf32> to vector<64x64xbf16>
    %c0_63 = arith.constant 0 : index
    %c0_64 = arith.constant 0 : index
    %332 = vector.load %arg18[%c0_63, %c0_64] : memref<64x128xbf16, #tpu.memory_space<vmem>>, vector<64x128xbf16>
    %cst_65 = arith.constant dense<0.000000e+00> : vector<64x128xf32>
    %333 = tpu.matmul %331, %332, %cst_65 {dimension_numbers = #tpu.dot_dimension_numbers<[1], [0], [0], [1], [0, 0, 1, 1], [], []>} : vector<64x64xbf16>, vector<64x128xbf16>, vector<64x128xf32> -> vector<64x128xf32>
    %334 = arith.addf %330, %333 : vector<64x128xf32>
    %c0_66 = arith.constant 0 : index
    %c0_67 = arith.constant 0 : index
    %335 = vector.load %arg19[%c0_66, %c0_67] : memref<1x128xf32, #tpu.memory_space<vmem>>, vector<1x128xf32>
    %336 = vector.broadcast %335 : vector<1x128xf32> to vector<64x128xf32>
    %337 = arith.addf %334, %336 : vector<64x128xf32>
    %c0_68 = arith.constant 0 : index
    %c0_69 = arith.constant 0 : index
    %338 = vector.load %arg20[%c0_68, %c0_69] : memref<1x128xf32, #tpu.memory_space<vmem>>, vector<1x128xf32>
    %cst_70 = arith.constant 0.000000e+00 : f32
    %339 = vector.broadcast %cst_70 : f32 to vector<1x128xf32>
    %340 = arith.cmpf ogt, %338, %339 : vector<1x128xf32>
    %341 = arith.negf %337 : vector<64x128xf32>
    %342 = math.exp %341 : vector<64x128xf32>
    %cst_71 = arith.constant 1.000000e+00 : f32
    %343 = vector.broadcast %cst_71 : f32 to vector<64x128xf32>
    %344 = arith.addf %343, %342 : vector<64x128xf32>
    %345 = arith.divf %343, %344 : vector<64x128xf32>
    %346 = vector.shape_cast %340 : vector<1x128xi1> to vector<1x128xi1>
    %347 = vector.broadcast %346 : vector<1x128xi1> to vector<64x128xi1>
    %348 = arith.select %347, %345, %337 : vector<64x128xi1>, vector<64x128xf32>
    %c0_72 = arith.constant 0 : index
    %c0_73 = arith.constant 0 : index
    %c0_74 = arith.constant 0 : index
    %349 = vector.load %arg21[%c0_72, %c0_73, %c0_74] : memref<1x64x128xf32, #tpu.memory_space<vmem>>, vector<1x64x128xf32>
    %350 = vector.shape_cast %349 : vector<1x64x128xf32> to vector<64x128xf32>
    %351 = vector.shape_cast %348 : vector<64x128xf32> to vector<1x64x128xf32>
    tpu.vector_store %arg21[%c0_72, %c0_73, %c0_74], %351 {strides = array<i32>} : memref<1x64x128xf32, #tpu.memory_space<vmem>>, vector<1x64x128xf32>,
    return
  }
  func.func @transform_0(%arg0: i32) -> (i32, i32, i32) {
    %c0_i32 = arith.constant 0 : i32
    %c0_i32_0 = arith.constant 0 : i32
    %c0_i32_1 = arith.constant 0 : i32
    return %arg0, %c0_i32, %c0_i32_0 : i32, i32, i32
  }
  func.func @transform_1(%arg0: i32) -> (i32, i32) {
    %c0_i32 = arith.constant 0 : i32
    %c0_i32_0 = arith.constant 0 : i32
    %c0_i32_1 = arith.constant 0 : i32
    return %c0_i32, %c0_i32_0 : i32, i32
  }
  func.func @transform_2(%arg0: i32) -> (i32, i32) {
    %c0_i32 = arith.constant 0 : i32
    %c0_i32_0 = arith.constant 0 : i32
    %c0_i32_1 = arith.constant 0 : i32
    return %c0_i32, %c0_i32_0 : i32, i32
  }
  func.func @transform_3(%arg0: i32) -> (i32, i32, i32) {
    %c0_i32 = arith.constant 0 : i32
    %c0_i32_0 = arith.constant 0 : i32
    %c0_i32_1 = arith.constant 0 : i32
    %c0_i32_2 = arith.constant 0 : i32
    return %c0_i32, %c0_i32_0, %c0_i32_1 : i32, i32, i32
  }
  func.func @transform_4(%arg0: i32) -> (i32, i32) {
    %c0_i32 = arith.constant 0 : i32
    %c0_i32_0 = arith.constant 0 : i32
    %c0_i32_1 = arith.constant 0 : i32
    return %c0_i32, %c0_i32_0 : i32, i32
  }
  func.func @transform_5(%arg0: i32) -> (i32, i32) {
    %c0_i32 = arith.constant 0 : i32
    %c0_i32_0 = arith.constant 0 : i32
    %c0_i32_1 = arith.constant 0 : i32
    return %c0_i32, %c0_i32_0 : i32, i32
  }
  func.func @transform_6(%arg0: i32) -> (i32, i32, i32) {
    %c0_i32 = arith.constant 0 : i32
    %c0_i32_0 = arith.constant 0 : i32
    %c0_i32_1 = arith.constant 0 : i32
    %c0_i32_2 = arith.constant 0 : i32
    return %c0_i32, %c0_i32_0, %c0_i32_1 : i32, i32, i32
  }
  func.func @transform_7(%arg0: i32) -> (i32, i32) {
    %c0_i32 = arith.constant 0 : i32
    %c0_i32_0 = arith.constant 0 : i32
    %c0_i32_1 = arith.constant 0 : i32
    return %c0_i32, %c0_i32_0 : i32, i32
  }
  func.func @transform_8(%arg0: i32) -> (i32, i32) {
    %c0_i32 = arith.constant 0 : i32
    %c0_i32_0 = arith.constant 0 : i32
    %c0_i32_1 = arith.constant 0 : i32
    return %c0_i32, %c0_i32_0 : i32, i32
  }
  func.func @transform_9(%arg0: i32) -> (i32, i32, i32) {
    %c0_i32 = arith.constant 0 : i32
    %c0_i32_0 = arith.constant 0 : i32
    %c0_i32_1 = arith.constant 0 : i32
    %c0_i32_2 = arith.constant 0 : i32
    return %c0_i32, %c0_i32_0, %c0_i32_1 : i32, i32, i32
  }
  func.func @transform_10(%arg0: i32) -> (i32, i32) {
    %c0_i32 = arith.constant 0 : i32
    %c0_i32_0 = arith.constant 0 : i32
    %c0_i32_1 = arith.constant 0 : i32
    return %c0_i32, %c0_i32_0 : i32, i32
  }
  func.func @transform_11(%arg0: i32) -> (i32, i32) {
    %c0_i32 = arith.constant 0 : i32
    %c0_i32_0 = arith.constant 0 : i32
    %c0_i32_1 = arith.constant 0 : i32
    return %c0_i32, %c0_i32_0 : i32, i32
  }
  func.func @transform_12(%arg0: i32) -> (i32, i32, i32) {
    %c0_i32 = arith.constant 0 : i32
    %c0_i32_0 = arith.constant 0 : i32
    %c0_i32_1 = arith.constant 0 : i32
    %c0_i32_2 = arith.constant 0 : i32
    return %c0_i32, %c0_i32_0, %c0_i32_1 : i32, i32, i32
  }
  func.func @transform_13(%arg0: i32) -> (i32, i32) {
    %c0_i32 = arith.constant 0 : i32
    %c0_i32_0 = arith.constant 0 : i32
    %c0_i32_1 = arith.constant 0 : i32
    return %c0_i32, %c0_i32_0 : i32, i32
  }
  func.func @transform_14(%arg0: i32) -> (i32, i32) {
    %c0_i32 = arith.constant 0 : i32
    %c0_i32_0 = arith.constant 0 : i32
    %c0_i32_1 = arith.constant 0 : i32
    return %c0_i32, %c0_i32_0 : i32, i32
  }
  func.func @transform_15(%arg0: i32) -> (i32, i32) {
    %c0_i32 = arith.constant 0 : i32
    %c0_i32_0 = arith.constant 0 : i32
    %c0_i32_1 = arith.constant 0 : i32
    return %c0_i32, %c0_i32_0 : i32, i32
  }
  func.func @transform_16(%arg0: i32) -> (i32, i32) {
    %c0_i32 = arith.constant 0 : i32
    %c0_i32_0 = arith.constant 0 : i32
    %c0_i32_1 = arith.constant 0 : i32
    return %c0_i32, %c0_i32_0 : i32, i32
  }
  func.func @transform_17(%arg0: i32) -> (i32, i32) {
    %c0_i32 = arith.constant 0 : i32
    %c0_i32_0 = arith.constant 0 : i32
    %c0_i32_1 = arith.constant 0 : i32
    return %c0_i32, %c0_i32_0 : i32, i32
  }
  func.func @transform_18(%arg0: i32) -> (i32, i32) {
    %c0_i32 = arith.constant 0 : i32
    %c0_i32_0 = arith.constant 0 : i32
    %c0_i32_1 = arith.constant 0 : i32
    return %c0_i32, %c0_i32_0 : i32, i32
  }
  func.func @transform_19(%arg0: i32) -> (i32, i32) {
    %c0_i32 = arith.constant 0 : i32
    %c0_i32_0 = arith.constant 0 : i32
    %c0_i32_1 = arith.constant 0 : i32
    return %c0_i32, %c0_i32_0 : i32, i32
  }
  func.func @transform_20(%arg0: i32) -> (i32, i32, i32) {
    %c0_i32 = arith.constant 0 : i32
    %c0_i32_0 = arith.constant 0 : i32
    %c0_i32_1 = arith.constant 0 : i32
    return %arg0, %c0_i32, %c0_i32_0 : i32, i32, i32
  }
}

</mosaic_0001>

<bundles_post_ra>
// kernel: detection_head_forward.1
= control target key start
LH: loop header
LB: loop body
LE: loop exit
PB: predicated region body
PF: predicated region fallthrough
CT: control target
= control target key end

     0   :  { %s8776_s0 = inlined_call_operand.hbm [shape: f32[2,64,256], index: 0, kind: input, shape index: {}]   ;;  %s8777_s1 = inlined_call_operand.hbm [shape: f32[64,1], index: 1, kind: input, shape index: {}]   ;;  %s8778_s2 = inlined_call_operand.hbm [shape: f32[64,1], index: 2, kind: input, shape index: {}]   ;;  %s8779_s3 = inlined_call_operand.hbm [shape: f32[3,3,256], index: 3, kind: input, shape index: {}]   ;;  %s8780_s4 = inlined_call_operand.hbm [shape: bf16[256,256], index: 4, kind: input, shape index: {}]   ;;  %s8781_s5 = inlined_call_operand.hbm [shape: f32[1,256], index: 5, kind: input, shape index: {}]   ;;  %s8782_s6 = inlined_call_operand.hbm [shape: f32[3,3,256], index: 6, kind: input, shape index: {}]   ;;  %s8783_s7 = inlined_call_operand.vmem [shape: bf16[256,128], index: 7, kind: input, shape index: {}]   ;;  %s8784_s8 = inlined_call_operand.vmem [shape: f32[1,128], index: 8, kind: input, shape index: {}]   ;;  %s8785_s9 = inlined_call_operand.hbm [shape: f32[3,3,256], index: 9, kind: input, shape index: {}]   ;;  %s8786_s10 = inlined_call_operand.hbm [shape: bf16[256,128], index: 10, kind: input, shape index: {}]   ;;  %s8787_s11 = inlined_call_operand.hbm [shape: f32[1,128], index: 11, kind: input, shape index: {}]   ;;  %s8788_s12 = inlined_call_operand.vmem [shape: f32[3,3,256], index: 12, kind: input, shape index: {}]   ;;  %s8789_s13 = inlined_call_operand.vmem [shape: bf16[256,64], index: 13, kind: input, shape index: {}]   ;;  %s8790_s14 = inlined_call_operand.vmem [shape: f32[1,64], index: 14, kind: input, shape index: {}]   ;;  %s8791_s15 = inlined_call_operand.vmem [shape: bf16[128,128], index: 15, kind: input, shape index: {}]   ;;  %s8792_s16 = inlined_call_operand.hbm [shape: bf16[128,128], index: 16, kind: input, shape index: {}]   ;;  %s8793_s17 = inlined_call_operand.hbm [shape: bf16[64,128], index: 17, kind: input, shape index: {}]   ;;  %s8794_s18 = inlined_call_operand.hbm [shape: f32[1,128], index: 18, kind: input, shape index: {}]   ;;  %s8795_s19 = inlined_call_operand.hbm [shape: f32[1,128], index: 19, kind: input, shape index: {}]   ;;  %s8796_s20 = inlined_call_operand.vmem [shape: f32[2,64,128], index: 20, kind: output, shape index: {}]  }
   0x1   :  { %9041 = sst [smem:[#allocation123_spill]] %s8776_s0 }
   0x2   :  { %9042 = sst [smem:[#allocation124_spill]] %s8777_s1 }
   0x3   :  { %9043 = sst [smem:[#allocation125_spill]] %s8778_s2 }
   0x4   :  { %9044 = sst [smem:[#allocation126_spill]] %s8779_s3 }
   0x5   :  { %9045 = sst [smem:[#allocation127_spill]] %s8780_s4 }
   0x6   :  { %9046 = sst [smem:[#allocation128_spill]] %s8781_s5 }
   0x7   :  { %9047 = sst [smem:[#allocation129_spill]] %s8782_s6 }
   0x8   :  { %9048 = sst [smem:[#allocation130_spill]] %s8784_s8 }
   0x9   :  { %9049 = sst [smem:[#allocation131_spill]] %s8785_s9 }
   0xa   :  { %9050 = sst [smem:[#allocation132_spill]] %s8790_s14 }
   0xb   :  { %9051 = sst [smem:[#allocation133_spill]] %s8796_s20 }
   0xc   :  { %25 = vsyncpa [#allocation3], 0 }
   0xd   :  { %27 = vsyncpa [#allocation3 + $0x1], 0 }
   0xe   :  { %28 = vsyncpa [#allocation5], 0 }
   0xf   :  { %29 = vsyncpa [#allocation8], 0 }
  0x10   :  { %30 = vsyncpa [#allocation11], 0 }
  0x11   :  { %31 = vsyncpa [#allocation14], 0 }
  0x12   :  { %32 = vsyncpa [#allocation17], 0 }
  0x13   :  { %33 = vsyncpa [#allocation20], 0 }
  0x14   :  { %34 = vsyncpa [#allocation23], 0  ;;  %s6010_s1 = smov 0   ;;  %s6012_s22 = smov 0  }
  0x15   :  { %s6014_s23 = smov 0   ;;  %s6016_s24 = smov 0  }
  0x16 LB: > { %s5884_s2 = smov [#allocation4]   ;;  %s6031_s3 = sadd.s32 4294967295, %s5882_s24   ;;  %s5882_s24 = sphi %s6016_s24, %s9524_s24   ;;  %s5878_s23 = sphi %s6014_s23, %s9523_s23   ;;  %s5874_s22 = sphi %s6012_s22, %s9522_s22   ;;  %s5870_s1 = sphi %s6010_s1, %s9521_s1  }
  0x17   : > { %s508_s25 = sshll.u32 %s5884_s2, 4  ;;  %p4754_p0 = scmp.ge.s32.totalorder %s5882_s24, 1  ;;  %s509_s25 = int_to_ptr.vmem [resolvable:$true] %s508_s25 }
  0x18   : > { %p8806_p1 = scmp.eq.s32.totalorder %s6031_s3, 0  ;;  %p496_p2 = scmp.lt.s32.totalorder %s5882_s24, 3 }
  0x19   : > { %s5885_s27 = smov [#allocation7]   ;;  %s5886_s29 = smov [#allocation10]  }
  0x1a   : > { %p6036_p3 = pnand %p4754_p0, %p496_p2  ;;  %s534_s28 = sshll.u32 %s5885_s27, 4  ;;  %s6048_s28 = int_to_ptr.vmem [resolvable:$true] %s534_s28 }
  0x1b   : > { %s561_s30 = sshll.u32 %s5886_s29, 4  ;;  %s5465_s21 = scalar_lea.vmem %s509_s25, 1024  ;;  %s6050_s30 = int_to_ptr.vmem [resolvable:$true] %s561_s30 }
  0x1c   : > { %s9052_s26 = scalar_select %p6036_p3, 1, 0 }
  0x1d   : > { %p5179_p4 = pneg %p6036_p3  ;;  %p5466_p7 = scmp.ne.s32.totalorder %s509_s25, %s5465_s21 }
  0x1e   : > { %p5473_p10 = scmp.lt.s32.totalorder %s509_s25, %s509_s25  ;;  %p5474_p11 = scmp.lt.s32.totalorder %s5465_s21, %s5465_s21 }
  0x1f   : > { %p6044_p5 = pnand %p5179_p4, %p8806_p1 }
  0x20   : > { %p5475_p12 = por %p5474_p11, %p5473_p10 }
  0x21   : > { %p6054_p6 = pneg %p6044_p5 }
  0x23   : > { %p5468_p8 = pnand %p5466_p7, %p6054_p6 }
  0x25   : > { %p5469_p9 = pneg %p5468_p8 }
  0x27   : > { %p5476_p13 = pnand %p5475_p12, %p5469_p9 }
  0x29   : > { %5479 = shalt.err (!%p5476_p13)
}
  0x2a   : > { %s8798_s2 = smov 128   ;;  %s8800_s27 = smov 8  }
  0x2b   : > { %s9055_s14 = sld [smem:[#allocation124_spill]]  ;;  %s5491_s8 = scalar_lea.vmem %s6048_s28, 384 }
  0x2c   : > { %p5492_p0 = scmp.ne.s32.totalorder %s6048_s28, %s5491_s8  ;;  %p5499_p7 = scmp.lt.s32.totalorder %s6048_s28, %s6048_s28 }
  0x2d   : > { %p5500_p8 = scmp.lt.s32.totalorder %s5491_s8, %s5491_s8 }
  0x2e   : > { %p5494_p2 = pnand %p5492_p0, %p6054_p6 }
  0x2f   : > { %p5501_p9 = por %p5500_p8, %p5499_p7 }
  0x30   : > { %p5495_p4 = pneg %p5494_p2 }
  0x31   : > { %5182 = dma.hbm_to_vmem [thread:$0]  (!%p6044_p5), %s9055_s14, 1024, %s509_s25, [#allocation5], %s8798_s2, %s8798_s2, %s8800_s27  }
  0x32   : > { %p5502_p10 = pnand %p5501_p9, %p5495_p4 }
  0x34   : > { %5505 = shalt.err (!%p5502_p10)
}
  0x35   : > { %s9056_s14 = sld [smem:[#allocation126_spill]]  ;;  %s5517_s25 = scalar_lea.vmem %s6050_s30, 32 }
  0x36   : > { %p5518_p11 = scmp.ne.s32.totalorder %s6050_s30, %s5517_s25  ;;  %p5525_p0 = scmp.lt.s32.totalorder %s6050_s30, %s6050_s30 }
  0x37   : > { %p5526_p2 = scmp.lt.s32.totalorder %s5517_s25, %s5517_s25 }
  0x38   : > { %p5520_p12 = pnand %p5518_p11, %p6054_p6 }
  0x39   : > { %p5527_p4 = por %p5526_p2, %p5525_p0 }
  0x3a   : > { %p5521_p13 = pneg %p5520_p12 }
  0x3b   : > { %5188 = dma.hbm_to_vmem [thread:$0]  (!%p6044_p5), %s9056_s14, 384, %s6048_s28, [#allocation8], %s8798_s2, %s8798_s2, %s8800_s27  }
  0x3c   : > { %p5528_p7 = pnand %p5527_p4, %p5521_p13 }
  0x3e   : > { %5531 = shalt.err (!%p5528_p7)
}
  0x3f   : > { %s9057_s5 = sld [smem:[#allocation128_spill]]  ;;  %s5889_s28 = smov [#allocation13]  }
  0x40   : > { %s590_s21 = sshll.u32 %s5889_s28, 4  ;;  %s5890_s20 = smov [#allocation16]   ;;  %s591_s21 = int_to_ptr.vmem [resolvable:$true] %s590_s21 }
  0x41   : > { %s617_s14 = sshll.u32 %s5890_s20, 4  ;;  %s5543_s2 = scalar_lea.vmem %s591_s21, 384  ;;  %s618_s14 = int_to_ptr.vmem [resolvable:$true] %s617_s14 }
  0x42   : > { %p5544_p8 = scmp.ne.s32.totalorder %s591_s21, %s5543_s2  ;;  %p5551_p11 = scmp.lt.s32.totalorder %s591_s21, %s591_s21 }
  0x43   : > { %p5552_p12 = scmp.lt.s32.totalorder %s5543_s2, %s5543_s2 }
  0x44   : > { %p5546_p9 = pnand %p5544_p8, %p6054_p6 }
  0x45   : > { %5194 = dma.hbm_to_vmem [thread:$0]  (!%p6044_p5), %s9057_s5, 32, %s6050_s30, [#allocation11]  }
  0x46   : > { %p5547_p10 = pneg %p5546_p9  ;;  %p5553_p13 = por %p5552_p12, %p5551_p11 }
  0x48   : > { %p5554_p0 = pnand %p5553_p13, %p5547_p10 }
  0x4a   : > { %5557 = shalt.err (!%p5554_p0)
}
  0x4b   : > { %s9058_s25 = smov 128   ;;  %s9059_s9 = sld [smem:[#allocation131_spill]] }
  0x4c   : > { %s5569_s29 = scalar_lea.vmem %s618_s14, 16  ;;  %s5576_s2 = scalar_lea.vmem %s618_s14, 32 }
  0x4d   : > { %p5570_p2 = scmp.ne.s32.totalorder %s618_s14, %s5569_s29  ;;  %p5577_p8 = scmp.lt.s32.totalorder %s618_s14, %s618_s14 }
  0x4e   : > { %p5578_p9 = scmp.lt.s32.totalorder %s5576_s2, %s5569_s29 }
  0x4f   : > { %p5572_p4 = pnand %p5570_p2, %p6054_p6 }
  0x50   : > { %p5579_p10 = por %p5578_p9, %p5577_p8 }
  0x51   : > { %5200 = dma.hbm_to_vmem [thread:$0]  (!%p6044_p5), %s9059_s9, 384, %s591_s21, [#allocation14], %s9058_s25, %s9058_s25, %s8800_s27  }
  0x52   : > { %p5573_p7 = pneg %p5572_p4 }
  0x54   : > { %p5580_p11 = pnand %p5579_p10, %p5573_p7 }
  0x56   : > { %5583 = shalt.err (!%p5580_p11)
}
  0x57   : > { %5206 = dma.hbm_to_vmem [thread:$0]  (!%p6044_p5), %s8787_s11, 16, %s618_s14, [#allocation17]  }
  0x58   : > { %s5891_s21 = smov [#allocation19]   ;;  %s5892_s8 = smov [#allocation6]  }
  0x59   : > { %s652_s30 = sshll.u32 %s5891_s21, 4  ;;  %s521_s27 = sshll.u32 %s5892_s8, 4  ;;  %s653_s30 = int_to_ptr.vmem [resolvable:$true] %s652_s30  ;;  %s522_s27 = int_to_ptr.vmem [resolvable:$true] %s521_s27 }
  0x5a   : > { %s5595_s5 = scalar_lea.vmem %s653_s30, 512  ;;  %p5603_p2 = scmp.lt.s32.totalorder %s653_s30, %s653_s30 }
  0x5b   : > { %p5596_p12 = scmp.ne.s32.totalorder %s653_s30, %s5595_s5  ;;  %p5604_p4 = scmp.lt.s32.totalorder %s5595_s5, %s5595_s5 }
  0x5d   : > { %p5598_p13 = pnand %p5596_p12, %p6054_p6  ;;  %p5605_p7 = por %p5604_p4, %p5603_p2 }
  0x5f   : > { %p5599_p0 = pneg %p5598_p13 }
  0x61   : > { %p5606_p8 = pnand %p5605_p7, %p5599_p0 }
  0x63   : > { %5609 = shalt.err (!%p5606_p8)
}
  0x64   : > { %s8802_s29 = smov 64   ;;  %s8804_s2 = smov 4  }
  0x65   : > { %5212 = dma.hbm_to_vmem [thread:$0]  (!%p6044_p5), %s8793_s17, 512, %s653_s30, [#allocation20], %s8802_s29, %s8802_s29, %s8804_s2  }
  0x66   : > { %s5621_s20 = scalar_lea.vmem %s522_s27, 1024  ;;  %p5629_p12 = scmp.lt.s32.totalorder %s522_s27, %s522_s27 }
  0x67   : > { %p5622_p9 = scmp.ne.s32.totalorder %s522_s27, %s5621_s20  ;;  %p5630_p13 = scmp.lt.s32.totalorder %s5621_s20, %s5621_s20 }
  0x69   : > { %p5624_p10 = pnand %p5622_p9, %p6054_p6  ;;  %p5631_p0 = por %p5630_p13, %p5629_p12 }
  0x6b   : > { %p5625_p11 = pneg %p5624_p10 }
  0x6d   : > { %p5632_p2 = pnand %p5631_p0, %p5625_p11 }
  0x6f   : > { %5635 = shalt.err (!%p5632_p2)
}
  0x70   : > { %s9060_s5 = smov 8   ;;  %s9061_s14 = sld [smem:[#allocation125_spill]] }
  0x71   : > { %s5895_s30 = smov [#allocation9]   ;;  %s5896_s29 = smov [#allocation12]  }
  0x72   : > { %s547_s28 = sshll.u32 %s5895_s30, 4  ;;  %s571_s2 = sshll.u32 %s5896_s29, 4  ;;  %s548_s28 = int_to_ptr.vmem [resolvable:$true] %s547_s28  ;;  %s572_s2 = int_to_ptr.vmem [resolvable:$true] %s571_s2 }
  0x73   : > { %s5647_s9 = scalar_lea.vmem %s548_s28, 4096  ;;  %p5655_p9 = scmp.lt.s32.totalorder %s548_s28, %s548_s28 }
  0x74   : > { %p5648_p4 = scmp.ne.s32.totalorder %s548_s28, %s5647_s9  ;;  %p5656_p10 = scmp.lt.s32.totalorder %s5647_s9, %s5647_s9 }
  0x76   : > { %5185 = dma.hbm_to_vmem [thread:$0]  (!%p6044_p5), %s9061_s14, 1024, %s522_s27, [#allocation5], %s9058_s25, %s9058_s25, %s9060_s5  }
  0x77   : > { %p5650_p7 = pnand %p5648_p4, %p6054_p6  ;;  %p5657_p11 = por %p5656_p10, %p5655_p9 }
  0x79   : > { %p5651_p8 = pneg %p5650_p7 }
  0x7b   : > { %p5658_p12 = pnand %p5657_p11, %p5651_p8 }
  0x7d   : > { %5661 = shalt.err (!%p5658_p12)
}
  0x7e   : > { %s9062_s21 = sld [smem:[#allocation127_spill]]  ;;  %s5673_s29 = scalar_lea.vmem %s572_s2, 384 }
  0x7f   : > { %p5674_p13 = scmp.ne.s32.totalorder %s572_s2, %s5673_s29  ;;  %p5681_p4 = scmp.lt.s32.totalorder %s572_s2, %s572_s2 }
  0x80   : > { %p5682_p7 = scmp.lt.s32.totalorder %s5673_s29, %s5673_s29 }
  0x81   : > { %p5676_p0 = pnand %p5674_p13, %p6054_p6 }
  0x82   : > { %p5683_p8 = por %p5682_p7, %p5681_p4 }
  0x83   : > { %p5677_p2 = pneg %p5676_p0 }
  0x84   : > { %5191 = dma.hbm_to_vmem [thread:$0]  (!%p6044_p5), %s9062_s21, 4096, %s548_s28, [#allocation8], %s9058_s25, %s9058_s25, %s9060_s5  }
  0x85   : > { %p5684_p9 = pnand %p5683_p8, %p5677_p2 }
  0x87   : > { %5687 = shalt.err (!%p5684_p9)
}
  0x88   : > { %s9063_s6 = sld [smem:[#allocation129_spill]]  ;;  %s5897_s14 = smov [#allocation15]  }
  0x89   : > { %s603_s30 = sshll.u32 %s5897_s14, 4  ;;  %s5898_s28 = smov [#allocation18]   ;;  %s604_s30 = int_to_ptr.vmem [resolvable:$true] %s603_s30 }
  0x8a   : > { %s639_s27 = sshll.u32 %s5898_s28, 4  ;;  %s5699_s20 = scalar_lea.vmem %s604_s30, 2048  ;;  %s640_s27 = int_to_ptr.vmem [resolvable:$true] %s639_s27 }
  0x8b   : > { %p5700_p10 = scmp.ne.s32.totalorder %s604_s30, %s5699_s20  ;;  %p5707_p13 = scmp.lt.s32.totalorder %s604_s30, %s604_s30 }
  0x8c   : > { %p5708_p0 = scmp.lt.s32.totalorder %s5699_s20, %s5699_s20 }
  0x8d   : > { %p5702_p11 = pnand %p5700_p10, %p6054_p6 }
  0x8e   : > { %5197 = dma.hbm_to_vmem [thread:$0]  (!%p6044_p5), %s9063_s6, 384, %s572_s2, [#allocation11], %s9058_s25, %s9058_s25, %s9060_s5  }
  0x8f   : > { %p5703_p12 = pneg %p5702_p11  ;;  %p5709_p2 = por %p5708_p0, %p5707_p13 }
  0x91   : > { %p5710_p4 = pnand %p5709_p2, %p5703_p12 }
  0x93   : > { %5713 = shalt.err (!%p5710_p4)
}
  0x94   : > { %s9064_s21 = smov 4   ;;  %s9065_s29 = smov 64  }
  0x95   : > { %5203 = dma.hbm_to_vmem [thread:$0]  (!%p6044_p5), %s8786_s10, 2048, %s604_s30, [#allocation14], %s9065_s29, %s9065_s29, %s9064_s21  }
  0x96   : > { %s5725_s5 = scalar_lea.vmem %s640_s27, 1024  ;;  %p5733_p10 = scmp.lt.s32.totalorder %s640_s27, %s640_s27 }
  0x97   : > { %p5726_p7 = scmp.ne.s32.totalorder %s640_s27, %s5725_s5  ;;  %p5734_p11 = scmp.lt.s32.totalorder %s5725_s5, %s5725_s5 }
  0x99   : > { %p5728_p8 = pnand %p5726_p7, %p6054_p6  ;;  %p5735_p12 = por %p5734_p11, %p5733_p10 }
  0x9b   : > { %p5729_p9 = pneg %p5728_p8 }
  0x9d   : > { %p5736_p13 = pnand %p5735_p12, %p5729_p9 }
  0x9f   : > { %5739 = shalt.err (!%p5736_p13)
}
  0xa0   : > { %5209 = dma.hbm_to_vmem [thread:$0]  (!%p6044_p5), %s8792_s16, 1024, %s640_s27, [#allocation17], %s9065_s29, %s9065_s29, %s9064_s21  }
  0xa1   : > { %s5899_s14 = smov [#allocation21]   ;;  %s5900_s28 = smov [#allocation22]  }
  0xa2   : > { %s666_s30 = sshll.u32 %s5899_s14, 4  ;;  %s677_s20 = sshll.u32 %s5900_s28, 4  ;;  %s667_s30 = int_to_ptr.vmem [resolvable:$true] %s666_s30  ;;  %s678_s20 = int_to_ptr.vmem [resolvable:$true] %s677_s20 }
  0xa3   : > { %s5751_s25 = scalar_lea.vmem %s667_s30, 16  ;;  %s5758_s2 = scalar_lea.vmem %s667_s30, 32 }
  0xa4   : > { %p5752_p0 = scmp.ne.s32.totalorder %s667_s30, %s5751_s25  ;;  %p5759_p7 = scmp.lt.s32.totalorder %s667_s30, %s667_s30 }
  0xa5   : > { %p5760_p8 = scmp.lt.s32.totalorder %s5758_s2, %s5751_s25 }
  0xa6   : > { %p5754_p2 = pnand %p5752_p0, %p6054_p6 }
  0xa7   : > { %p5761_p9 = por %p5760_p8, %p5759_p7 }
  0xa8   : > { %p5755_p4 = pneg %p5754_p2 }
  0xaa   : > { %p5762_p10 = pnand %p5761_p9, %p5755_p4 }
  0xac   : > { %5765 = shalt.err (!%p5762_p10)
}
  0xad   : > { %5215 = dma.hbm_to_vmem [thread:$0]  (!%p6044_p5), %s8794_s18, 16, %s667_s30, [#allocation20]  }
  0xae   : > { %s5777_s21 = scalar_lea.vmem %s678_s20, 16  ;;  %s5784_s29 = scalar_lea.vmem %s678_s20, 32 }
  0xaf   : > { %p5778_p11 = scmp.ne.s32.totalorder %s678_s20, %s5777_s21  ;;  %p5785_p0 = scmp.lt.s32.totalorder %s678_s20, %s678_s20 }
  0xb0   : > { %p5786_p2 = scmp.lt.s32.totalorder %s5784_s29, %s5777_s21 }
  0xb1   : > { %p5780_p12 = pnand %p5778_p11, %p6054_p6 }
  0xb2   : > { %p5787_p1 = por %p5786_p2, %p5785_p0 }
  0xb3   : > { %p5781_p13 = pneg %p5780_p12 }
  0xb5   : > { %p5788_p7 = pnand %p5787_p1, %p5781_p13 }
  0xb7   : > { %5791 = shalt.err (!%p5788_p7)
}
  0xb8   : > { %5218 = dma.hbm_to_vmem [thread:$0]  (!%p6044_p5), %s8795_s19, 16, %s678_s20, [#allocation23]  }
  0xb9   : > { %s6187_s0 = sadd.s32 1, %s5882_s24   ;;  %s47_s14 = sadd.s32 1, %s5878_s23 }
  0xba   : > { %s44_s4 = ssub.s32 %s5882_s24, %s6187_s0  ;;  %p54_p6 = scmp.ne.s32.totalorder %s5878_s23, %s5874_s22 }
  0xbb   : > { %p45_p1 = scmp.eq.s32.totalorder %s44_s4, 0  ;;  %p55_p4 = scmp.eq.s32.totalorder %s5882_s24, 0 }
  0xbc   : > { %p60_p8 = scmp.ne.s32.totalorder %s5874_s22, %s5870_s1  ;;  %p9066_p10 = scmp.eq.s32.totalorder %s6031_s3, 0 }
  0xbd   : > { %s6198_s30 = scalar_select %p45_p1, %s5878_s23, %s47_s14  }
  0xbe   : > { %p56_p9 = por %p55_p4, %p54_p6  ;;  %p6202_p11 = por %p9066_p10, %p60_p8 }
  0xbf   : > { %p5236_p12 = scmp.lt.s32.totalorder %s5882_s24, 2  ;;  %s688_s25 = sand.u32 1, %s5878_s23  }
  0xc0   : > { %s9067_s28 = scalar_select %p6202_p11, 1, 0 }
  0xc1   : > { %s4769_s20 = sshll.u32 %s688_s25, 7  ;;  %s4907_s2 = sshll.u32 %s5882_s24, 11 }
  0xc2   : > { %s9068_s21 = sld [smem:[#allocation123_spill]]  ;;  %s692_s1 = scalar_lea.vmem [#allocation2], %s4769_s20 }
  0xc3   : > { %s699_s9 = sshll.u32 %s692_s1, 4  ;;  %p6216_p5 = pnand %p5236_p12, %p56_p9  ;;  %s6214_s9 = int_to_ptr.vmem [resolvable:$true] %s699_s9 }
  0xc4   : > { %s6220_s4 = scalar_lea.sflag [#allocation3], %s688_s25 }
  0xc5   : > { %p5794_p0 = pneg %p6216_p5 }
  0xc8   : > { %s6212_s29 = scalar_lea.hbm %s9068_s21, %s4907_s2  ;;  %s5797_s20 = scalar_lea.hbm %s9068_s21, 4096 }
  0xc9   : > { %s5792_s24 = scalar_lea.hbm %s6212_s29, 2048  ;;  %p5798_p1 = scmp.lt.s32.totalorder %s6212_s29, %s9068_s21 }
  0xca   : > { %p5793_p13 = scmp.ne.s32.totalorder %s6212_s29, %s5792_s24  ;;  %p5799_p6 = scmp.lt.s32.totalorder %s5797_s20, %s5792_s24 }
  0xcc   : > { %p5795_p2 = pnand %p5794_p0, %p5793_p13  ;;  %p5800_p4 = por %p5799_p6, %p5798_p1 }
  0xce   : > { %p5796_p7 = pneg %p5795_p2 }
  0xd0   : > { %p5801_p8 = pnand %p5800_p4, %p5796_p7 }
  0xd2   : > { %5804 = shalt.err (!%p5801_p8)
}
  0xd3   : > { %s5805_s25 = scalar_lea.vmem %s6214_s9, 2048  ;;  %s5901_s1 = smov [#allocation2]  }
  0xd4   : > { %p5806_p9 = scmp.ne.s32.totalorder %s6214_s9, %s5805_s25  ;;  %s5810_s6 = sshll.u32 %s5901_s1, 4  ;;  %s5811_s6 = int_to_ptr.vmem [resolvable:$false] %s5810_s6 }
  0xd5   : > { %s5812_s14 = scalar_lea.vmem %s5811_s6, 4096  ;;  %p5813_p13 = scmp.lt.s32.totalorder %s6214_s9, %s5811_s6 }
  0xd6   : > { %p5808_p10 = pnand %p5806_p9, %p5794_p0  ;;  %p5814_p2 = scmp.lt.s32.totalorder %s5812_s14, %s5805_s25 }
  0xd8   : > { %p5809_p12 = pneg %p5808_p10  ;;  %p5815_p11 = por %p5814_p2, %p5813_p13 }
  0xda   : > { %p5816_p3 = pnand %p5815_p11, %p5809_p12 }
  0xdc   : > { %5819 = shalt.err (!%p5816_p3)
}
  0xdd   : > { %s5902_s24 = smov 256   ;;  %s5903_s2 = smov 16  }
  0xde   : > { %5222 = dma.hbm_to_vmem [thread:$0]  (!%p6216_p5), %s6212_s29, 2048, %s6214_s9, %s6220_s4, %s5902_s24, %s5902_s24, %s5903_s2  }
  0xdf   : > { %p9070_p0 = scmp.ne.s32.totalorder %s9052_s26, 0 }
  0xe1   : > { %711 = sbr.rel (%p9070_p0) target bundleno = 1350 (0x546), region = 100 }
  0xe6   : > { %s713_s20 = sand.u32 1, %s5874_s22   ;;  %p9071_p11 = scmp.ne.s32.totalorder %s9067_s28, 0 }
  0xe7   : > { %s4773_s5 = sshll.u32 %s713_s20, 7  ;;  %s714_s6 = scalar_lea.sflag [#allocation3], %s713_s20 }
  0xe8   : > { %s6244_s27 = scalar_lea.vmem [#allocation2], %s4773_s5 }
  0xe9   : > { %5837 = dma.done.wait (%p9071_p11), %s714_s6, 2048  }
  0xea   : > { %5839 = vsyncadd (%p9071_p11), %s714_s6, 4294965248  ;;  %p9072_p3 = scmp.eq.s32.totalorder %s6031_s3, 0 }
  0xec   : > { %5841 = dma.done.wait (%p9072_p3), [#allocation5], 2048   ;;  %p9073_p5 = pmov %p9072_p3 }
  0xed   : > { %p9074_p7 = pmov %p9072_p3 }
  0xee   : > { %5843 = vsyncadd (%p9073_p5), [#allocation5], 4294965248 }
  0xef   : > { %5845 = dma.done.wait (%p9074_p7), [#allocation8], 4480   ;;  %p9075_p1 = pmov %p9072_p3 }
  0xf1   : > { %5847 = vsyncadd (%p9075_p1), [#allocation8], 4294962816  ;;  %p9076_p6 = pmov %p9075_p1 }
  0xf2   : > { %p9077_p4 = pmov %p9075_p1 }
  0xf3   : > { %5849 = dma.done.wait (%p9076_p6), [#allocation11], 416  }
  0xf4   : > { %5851 = vsyncadd (%p9077_p4), [#allocation11], 4294966880  ;;  %p9078_p8 = pmov %p9075_p1 }
  0xf5   : > { %p9079_p9 = pmov %p9075_p1 }
  0xf6   : > { %5853 = dma.done.wait (%p9078_p8), [#allocation14], 2432  }
  0xf7   : > { %5855 = vsyncadd (%p9079_p9), [#allocation14], 4294964864  ;;  %p9080_p10 = pmov %p9075_p1 }
  0xf8   : > { %p9081_p12 = pmov %p9075_p1 }
  0xf9   : > { %5857 = dma.done.wait (%p9080_p10), [#allocation17], 1040  }
  0xfa   : > { %5859 = vsyncadd (%p9081_p12), [#allocation17], 4294966256  ;;  %p9082_p13 = pmov %p9075_p1 }
  0xfb   : > { %p9083_p2 = pmov %p9075_p1 }
  0xfc   : > { %5861 = dma.done.wait (%p9082_p13), [#allocation20], 528  }
  0xfd   : > { %5863 = vsyncadd (%p9083_p2), [#allocation20], 4294966768  ;;  %p9084_p0 = pmov %p9075_p1 }
  0xff   : > { %5865 = dma.done.wait (%p9084_p0), [#allocation23], 16   ;;  %p9085_p11 = pmov %p9084_p0 }
 0x100   : > { %v8809_v0 = vmov 0   ;;  %v833_v1 = vld [vmem:[#allocation4 + $0x8] sm:$0xff]  ;;  %v832_v2 = vld [vmem:[#allocation4] sm:$0xff]  ;;  %v834_v3 = vld [vmem:[#allocation4 + $0x10] sm:$0xff]  ;;  %v1094_v36 = vlaneseq  ;;  %vm883_vm0 = vcmask 1040384   ;;  %vm988_vm1 = vcmask 1046528  }
 0x101   : > { %5867 = vsyncadd (%p9085_p11), [#allocation23], 4294967280  ;;  %5303 = vset.pattern.permute.xlu1 %v8809_v0  ;;  %5302 = vset.pattern.permute.xlu0 %v8809_v0  ;;  %v840_v4 = vld [vmem:[#allocation6] sm:$0xff]  ;;  %v842_v5 = vld [vmem:[#allocation6 + $0x10] sm:$0xff]  ;;  %s9514_s6 = sld [smem:[#allocation130_spill]]  ;;  %p826_p3 = scmp.lt.s32.totalorder %s6031_s3, 1 }
 0x102   : > { %939 = vperm.xlu1 %5303, %v833_v1   ;;  %934 = vperm.xlu0 %5302, %v832_v2   ;;  %v841_v6 = vld [vmem:[#allocation6 + $0x8] sm:$0xff]  ;;  %v5307_v9 = vld [vmem:[#allocation9 + $0x64] ss:$8 sps:$4 sm:$0xff]   ;;  %v5309_v12 = vld [vmem:[#allocation9 + $0x60] ss:$8 sps:$4 sm:$0xff]   ;;  %v1095_v39 = vshrl.u32 %v1094_v36, 7 }
 0x103   : > { %v5304_v7 = vld [vmem:[#allocation9 + $0x74] ss:$8 sps:$4 sm:$0xff]   ;;  %v5306_v8 = vld [vmem:[#allocation9 + $0x70] ss:$8 sps:$4 sm:$0xff]   ;;  %v836_v10 = vld [vmem:[#allocation4 + $0x20] sm:$0xff]  ;;  %s9515_s28 = sld [smem:[#allocation132_spill]] }
 0x104   : > { %1758 = vmatprep.subr.bf16.mxu0 %v5304_v7  ;;  %v835_v11 = vld [vmem:[#allocation4 + $0x18] sm:$0xff]  ;;  %v5310_v13 = vld [vmem:[#allocation9 + $0x54] ss:$8 sps:$4 sm:$0xff]   ;;  %v844_v14 = vld [vmem:[#allocation6 + $0x20] sm:$0xff]  ;;  %v6280_v51 = vsub.s32 0, %v1095_v39  ;;  %v6282_v52 = vsub.s32 4, %v1095_v39 }
 0x105   : > { %1759 = vmatpush1.bf16.msra.mxu0 %v5306_v8  ;;  %v843_v15 = vld [vmem:[#allocation6 + $0x18] sm:$0xff]  ;;  %v5312_v16 = vld [vmem:[#allocation9 + $0x50] ss:$8 sps:$4 sm:$0xff]   ;;  %v5316_v21 = vld [vmem:[#allocation9 + $0x34] ss:$8 sps:$4 sm:$0xff]   ;;  %v6284_v53 = vsub.s32 1, %v1095_v39 }
 0x106   : > { %944 = vperm.xlu1 %5303, %v834_v3   ;;  %1039 = vperm.xlu0 %5302, %v840_v4   ;;  %v5313_v17 = vld [vmem:[#allocation9 + $0x44] ss:$8 sps:$4 sm:$0xff]   ;;  %v838_v18 = vld [vmem:[#allocation4 + $0x30] sm:$0xff]  ;;  %v837_v19 = vld [vmem:[#allocation4 + $0x28] sm:$0xff]  ;;  %9086 = vst [vmem:[#allocation32_spill] sm:$0xff] %v6280_v51  ;;  %v6286_v54 = vsub.s32 5, %v1095_v39 }
 0x107   : > { %1760 = vmatprep.subr.bf16.mxu0 %v5307_v9  ;;  %v5315_v20 = vld [vmem:[#allocation9 + $0x40] ss:$8 sps:$4 sm:$0xff]   ;;  %v846_v22 = vld [vmem:[#allocation6 + $0x30] sm:$0xff]  ;;  %v845_v23 = vld [vmem:[#allocation6 + $0x28] sm:$0xff]  ;;  %9087 = vst [vmem:[#allocation33_spill] sm:$0xff] %v6282_v52  ;;  %v6303_v1 = vsub.s32 2, %v1095_v39 }
 0x108   : > { %v5318_v24 = vld [vmem:[#allocation9 + $0x30] ss:$8 sps:$4 sm:$0xff]   ;;  %v5319_v25 = vld [vmem:[#allocation9 + $0x24] ss:$8 sps:$4 sm:$0xff]   ;;  %v5321_v28 = vld [vmem:[#allocation9 + $0x20] ss:$8 sps:$4 sm:$0xff]  }
 0x109   : > { %1761 = vmatpush1.bf16.msra.mxu0 %v5309_v12  ;;  %v847_v26 = vld [vmem:[#allocation6 + $0x38] sm:$0xff]  ;;  %v5322_v29 = vld [vmem:[#allocation9 + $0x14] ss:$8 sps:$4 sm:$0xff]   ;;  %v5324_v30 = vld [vmem:[#allocation9 + $0x10] ss:$8 sps:$4 sm:$0xff]   ;;  %9088 = vst [vmem:[#allocation34_spill] sm:$0xff] %v6284_v53 }
 0x10a   : > { %1049 = vperm.xlu1 %5303, %v842_v5   ;;  %1044 = vperm.xlu0 %5302, %v841_v6   ;;  %v839_v27 = vld [vmem:[#allocation4 + $0x38] sm:$0xff]  ;;  %v5328_v33 = vld [vmem:[#allocation9 + $0xf4] ss:$8 sps:$4 sm:$0xff]   ;;  %v5330_v34 = vld [vmem:[#allocation9 + $0xf0] ss:$8 sps:$4 sm:$0xff]   ;;  %9089 = vst [vmem:[#allocation35_spill] sm:$0xff] %v6286_v54 }
 0x10b   : > { %1762 = vmatprep.subr.bf16.mxu0 %v5310_v13  ;;  %v5325_v31 = vld [vmem:[#allocation9 + $0x4] ss:$8 sps:$4 sm:$0xff]   ;;  %v5327_v32 = vld [vmem:[#allocation9] ss:$8 sps:$4 sm:$0xff]   ;;  %v5334_v38 = vld [vmem:[#allocation9 + $0xd4] ss:$8 sps:$4 sm:$0xff]  }
 0x10c   : > { %v5331_v35 = vld [vmem:[#allocation9 + $0xe4] ss:$8 sps:$4 sm:$0xff]   ;;  %v5333_v37 = vld [vmem:[#allocation9 + $0xe0] ss:$8 sps:$4 sm:$0xff]   ;;  %v5336_v40 = vld [vmem:[#allocation9 + $0xd0] ss:$8 sps:$4 sm:$0xff]  }
 0x10d   : > { %1763 = vmatpush1.bf16.msra.mxu0 %v5312_v16  ;;  %v5337_v41 = vld [vmem:[#allocation9 + $0xc4] ss:$8 sps:$4 sm:$0xff]   ;;  %v5339_v42 = vld [vmem:[#allocation9 + $0xc0] ss:$8 sps:$4 sm:$0xff]   ;;  %v5340_v43 = vld [vmem:[#allocation9 + $0xb4] ss:$8 sps:$4 sm:$0xff]  }
 0x10e   : > { %954 = vperm.xlu1 %5303, %v836_v10   ;;  %949 = vperm.xlu0 %5302, %v835_v11   ;;  %v5342_v44 = vld [vmem:[#allocation9 + $0xb0] ss:$8 sps:$4 sm:$0xff]   ;;  %v5343_v45 = vld [vmem:[#allocation9 + $0xa4] ss:$8 sps:$4 sm:$0xff]   ;;  %v5345_v46 = vld [vmem:[#allocation9 + $0xa0] ss:$8 sps:$4 sm:$0xff]  }
 0x10f   : > { %1764 = vmatprep.subr.bf16.mxu0 %v5313_v17  ;;  %v5346_v47 = vld [vmem:[#allocation9 + $0x94] ss:$8 sps:$4 sm:$0xff]   ;;  %v5348_v48 = vld [vmem:[#allocation9 + $0x90] ss:$8 sps:$4 sm:$0xff]   ;;  %v5349_v49 = vld [vmem:[#allocation9 + $0x84] ss:$8 sps:$4 sm:$0xff]  }
 0x110   : > { %v5351_v50 = vld [vmem:[#allocation9 + $0x80] ss:$8 sps:$4 sm:$0xff]   ;;  %v6292_v57 = vld [vmem:[%s6244_s27 + $0x10] sm:$0xff]  ;;  %v6297_v59 = vld [vmem:[#allocation7 + $0x8] sm:$0x77]  ;;  %9090 = vst [vmem:[#allocation36_spill] sm:$0xff] %v6303_v1 }
 0x111   : > { %1765 = vmatpush1.bf16.msra.mxu0 %v5315_v20  ;;  %v864_v55 = vld [vmem:[#allocation7] sm:$0x77]  ;;  %v6295_v58 = vld [vmem:[%s6244_s27 + $0x18] sm:$0xff]  ;;  %v6305_v2 = vsub.s32 6, %v1095_v39  ;;  %v6308_v3 = vld [vmem:[%s6244_s27 + $0x8] sm:$0xff]  ;;  %v886_v6 = vrot.slane %v6292_v57, 7  ;;  %v1248_v8 = vrot.slane %v6297_v59, %v6280_v51 }
 0x112   : > { %1059 = vperm.xlu1 %5303, %v844_v14   ;;  %1054 = vperm.xlu0 %5302, %v843_v15   ;;  %v6289_v56 = vld [vmem:[%s6244_s27] sm:$0xff]  ;;  %v1097_v60 = vrot.slane %v864_v55, %v6280_v51  ;;  %v1101_v61 = vrot.slane %v864_v55, %v6282_v52  ;;  %v1147_v62 = vrot.slane %v864_v55, %v6284_v53  ;;  %v6310_v4 = vld [vmem:[#allocation7 + $0x10] sm:$0x77]  ;;  %v888_v7 = vrot.slane %v6295_v58, 7  ;;  %s9526_s3 = smov (!%p826_p3, %s6031_s3), 1  ;;  %s9520_s4 = sld [smem:[#allocation133_spill]] }
 0x113   : > { %1766 = vmatprep.subr.bf16.mxu0 %v5316_v21  ;;  %v1151_v63 = vrot.slane %v864_v55, %v6286_v54  ;;  %9091 = vst [vmem:[#allocation37_spill] sm:$0xff] %v6305_v2  ;;  %v884_v5 = vrot.slane %v6289_v56, 7  ;;  %v885_v13 = vrot.slane %v6308_v3, 7  ;;  %v1252_v14 = vrot.slane %v6297_v59, %v6282_v52  ;;  %s4908_s29 = sshll.u32 %s9526_s3, 6 }
 0x114   : > { %v6318_v9 = vrot.slane %v1097_v60, %v6280_v51  ;;  %v6321_v10 = vrot.slane %v1101_v61, %v6280_v51  ;;  %v6324_v11 = vrot.slane %v1147_v62, %v6284_v53  ;;  %v1197_v15 = vrot.slane %v864_v55, %v6303_v1 }
 0x115   : > { %1767 = vmatpush1.bf16.msra.mxu0 %v5318_v24  ;;  %v6327_v12 = vrot.slane %v1151_v63, %v6284_v53  ;;  %v1201_v16 = vrot.slane %v864_v55, %v6305_v2  ;;  %v1399_v17 = vrot.slane %v6310_v4, %v6280_v51  ;;  %v6343_v20 = vrot.slane %v1248_v8, %v6280_v51 }
 0x116   : > { %964 = vperm.xlu1 %5303, %v838_v18   ;;  %959 = vperm.xlu0 %5302, %v837_v19   ;;  %v6337_v18 = vsel %vm883_vm0, %v884_v5, %v886_v6  ;;  %v6340_v19 = vsel %vm883_vm0, %v885_v13, %v888_v7  ;;  %v1112_v21 = vmul.f32 0.0, %v6318_v9  ;;  %v1348_v55 = vrot.slane %v6297_v59, %v6303_v1 }
 0x117   : > { %1768 = vmatprep.subr.bf16.mxu0 %v5319_v25  ;;  %v1163_v24 = vmul.f32 0.0, %v6327_v12  ;;  %v6350_v25 = vld [vmem:[%s6244_s27 + $0x20] sm:$0xff]  ;;  %v6391_v39 = vmul.f32 %v6327_v12, %v6308_v3  ;;  %v1352_v60 = vrot.slane %v6297_v59, %v6305_v2 }
 0x118   : > { %v890_v36 = vrot.slane %v6350_v25, 7  ;;  %v995_v8 = vrot.slane %v6350_v25, 1  ;;  %s830_s25 = scalar_lea.vmem %s9520_s4, %s4908_s29 }
 0x119   : > { %1769 = vmatpush1.bf16.msra.mxu0 %v5321_v28  ;;  %v6359_v28 = vsel %vm883_vm0, 0.0, %v884_v5  ;;  %9095 = vst [vmem:[#allocation41_spill] sm:$0xff] %v6391_v39 }
 0x11a   : > { %1069 = vperm.xlu1 %5303, %v846_v22   ;;  %1064 = vperm.xlu0 %5302, %v845_v23   ;;  %v1113_v22 = vmul.f32 0.0, %v6321_v10  ;;  %v1162_v23 = vmul.f32 0.0, %v6324_v11  ;;  %v6414_v61 = vsel %vm883_vm0, %v886_v6, %v890_v36 }
 0x11b   : > { %1770 = vmatprep.subr.bf16.mxu0 %v5322_v29  ;;  %v6362_v29 = vrot.slane %v1197_v15, %v6303_v1  ;;  %v6431_v15 = vld [vmem:[%s6244_s27 + $0x40] sm:$0xff] }
 0x11d   : > { %1771 = vmatpush1.bf16.msra.mxu0 %v5324_v30  ;;  %9092 = vst [vmem:[#allocation38_spill] sm:$0xff] %v6362_v29  ;;  %v6365_v30 = vrot.slane %v1201_v16, %v6303_v1 }
 0x11e   : > { %1074 = vperm.xlu1 %5303, %v847_v26   ;;  %969 = vperm.xlu0 %5302, %v839_v27   ;;  %v6353_v26 = vld [vmem:[%s6244_s27 + $0x28] sm:$0xff]  ;;  %v6356_v27 = vrot.slane %v1252_v14, %v6280_v51 }
 0x11f   : > { %1772 = vmatprep.subr.bf16.mxu0 %v5325_v31  ;;  %9093 = vst [vmem:[#allocation39_spill] sm:$0xff] %v6365_v30  ;;  %v6369_v31 = vmul.f32 %v6324_v11, %v6292_v57  ;;  %v6421_v63 = vmul.f32 %v6327_v12, %v6353_v26 }
 0x121   : > { %1773 = vmatpush1.bf16.msra.mxu0 %v5327_v32  ;;  %v6373_v32 = vmul.f32 %v6327_v12, %v6295_v58  ;;  %9097 = vst [vmem:[#allocation43_spill] sm:$0xff] %v6421_v63  ;;  %v1403_v63 = vrot.slane %v6310_v4, %v6282_v52 }
 0x122   : > { %1774 = vmatprep.subr.bf16.mxu0 %v5328_v33  ;;  %v6376_v33 = vrot.slane %v1399_v17, %v6280_v51 }
 0x124   : > { %9094 = vst [vmem:[#allocation40_spill] sm:$0xff] %v6376_v33 }
 0x125   : > { %1775 = vmatpush2.bf16.msra.mxu0 %v5330_v34  ;;  %v6379_v34 = vsel %vm883_vm0, 0.0, %v885_v13  ;;  %v997_v13 = vrot.slane %v6353_v26, 1 }
 0x126   : > { %1776 = vmatprep.subr.bf16.mxu0 %v5331_v35  ;;  %v6383_v35 = vmul.f32 %v6324_v11, %v6289_v56 }
 0x129   : > { %1777 = vmatpush2.bf16.msra.mxu0 %v5333_v37  ;;  %v892_v37 = vrot.slane %v6353_v26, 7 }
 0x12a   : > { %1778 = vmatprep.subr.bf16.mxu0 %v5334_v38  ;;  %v1298_v38 = vrot.slane %v6297_v59, %v6284_v53 }
 0x12b   : > { %v6417_v62 = vsel %vm883_vm0, %v888_v7, %v892_v37  ;;  %v6434_v7 = vld [vmem:[%s6244_s27 + $0x48] sm:$0xff] }
 0x12c   : > { %v6424_v5 = vrot.slane %v1298_v38, %v6284_v53  ;;  %v6451_v38 = vrot.slane %v1352_v60, %v6303_v1 }
 0x12d   : > { %1779 = vmatpush2.bf16.msra.mxu0 %v5336_v40  ;;  %v1178_v40 = vadd.f32 %v1162_v23, %v1112_v21 }
 0x12e   : > { %1780 = vmatprep.subr.bf16.mxu0 %v5337_v41  ;;  %v1179_v41 = vadd.f32 %v1163_v24, %v1113_v22  ;;  %v6448_v24 = vrot.slane %v1348_v55, %v6303_v1  ;;  %9100 = vst [vmem:[#allocation46_spill] sm:$0xff] %v6451_v38  ;;  %v6485_v38 = vmul.f32 %v6327_v12, %v6434_v7 }
 0x130   : > { %9099 = vst [vmem:[#allocation45_spill] sm:$0xff] %v6448_v24  ;;  %9107 = vst [vmem:[#allocation53_spill] sm:$0xff] %v6485_v38 }
 0x131   : > { %1781 = vmatpush2.bf16.msra.mxu0 %v5339_v42  ;;  %v6395_v42 = vmul.f32 %v6324_v11, %v6350_v25 }
 0x132   : > { %1782 = vmatprep.subr.bf16.mxu0 %v5340_v43  ;;  %v1212_v43 = vmul.f32 0.0, %v6362_v29 }
 0x133   : > { %9096 = vst [vmem:[#allocation42_spill] sm:$0xff] %v6395_v42 }
 0x134   : > { %v6436_v16 = vadd.f32 %v1212_v43, %v1178_v40  ;;  %v6460_v43 = vmul.f32 %v6424_v5, %v6292_v57 }
 0x135   : > { %1783 = vmatpush2.bf16.msra.mxu0 %v5342_v44  ;;  %v1213_v44 = vmul.f32 0.0, %v6365_v30  ;;  %v6525_v30 = vld [vmem:[%s6244_s27 + $0x70] sm:$0xff] }
 0x136   : > { %1784 = vmatprep.subr.bf16.mxu0 %v5343_v45  ;;  %v989_v45 = vrot.slane %v6289_v56, 1  ;;  %9102 = vst [vmem:[#allocation48_spill] sm:$0xff] %v6460_v43  ;;  %v6481_v43 = vmul.f32 %v6324_v11, %v6431_v15  ;;  %9114 = vst [vmem:[#allocation60_spill] sm:$0xff] %v6525_v30 }
 0x137   : > { %v6438_v17 = vadd.f32 %v1213_v44, %v1179_v41  ;;  %v6456_v41 = vmul.f32 %v6424_v5, %v6289_v56  ;;  %v898_v44 = vrot.slane %v6431_v15, 7 }
 0x138   : > { %9106 = vst [vmem:[#allocation52_spill] sm:$0xff] %v6481_v43  ;;  %v1005_v43 = vrot.slane %v6434_v7, 1 }
 0x139   : > { %1785 = vmatpush2.bf16.msra.mxu0 %v5345_v46  ;;  %v990_v46 = vrot.slane %v6292_v57, 1  ;;  %9098 = vst [vmem:[#allocation44_spill] sm:$0xff] %v6438_v17  ;;  %9101 = vst [vmem:[#allocation47_spill] sm:$0xff] %v6456_v41 }
 0x13a   : > { %1786 = vmatprep.subr.bf16.mxu0 %v5346_v47  ;;  %v6402_v47 = vld [vmem:[%s6244_s27 + $0x30] sm:$0xff] }
 0x13b   : > { %v999_v14 = vrot.slane %v6402_v47, 1  ;;  %v6441_v21 = vsel %vm988_vm1, %v989_v45, %v990_v46  ;;  %v894_v22 = vrot.slane %v6402_v47, 7  ;;  %v900_v45 = vrot.slane %v6434_v7, 7 }
 0x13c   : > { %v6474_v56 = vsel %vm988_vm1, %v990_v46, %v995_v8  ;;  %v6493_v46 = vld [vmem:[%s6244_s27 + $0x58] sm:$0xff] }
 0x13d   : > { %1787 = vmatpush2.bf16.msra.mxu0 %v5348_v48  ;;  %v6405_v48 = vld [vmem:[%s6244_s27 + $0x38] sm:$0xff]  ;;  %v6468_v55 = vsel %vm988_vm1, %v995_v8, %v999_v14  ;;  %9104 = vst [vmem:[#allocation50_spill] sm:$0xff] %v6474_v56  ;;  %v6490_v42 = vsel %vm883_vm0, %v890_v36, %v894_v22  ;;  %v6508_v52 = vsel %vm883_vm0, %v894_v22, %v898_v44 }
 0x13e   : > { %1788 = vmatprep.subr.bf16.mxu0 %v5349_v49  ;;  %v992_v49 = vrot.slane %v6308_v3, 1  ;;  %v1001_v6 = vrot.slane %v6405_v48, 1  ;;  %v896_v40 = vrot.slane %v6405_v48, 7  ;;  %9108 = vst [vmem:[#allocation54_spill] sm:$0xff] %v6490_v42  ;;  %9110 = vst [vmem:[#allocation56_spill] sm:$0xff] %v6508_v52  ;;  %v6515_v42 = vmul.f32 %v6324_v11, %v6402_v47  ;;  %v6528_v22 = vld [vmem:[%s6244_s27 + $0x78] sm:$0xff] }
 0x13f   : > { %v1453_v52 = vrot.slane %v6310_v4, %v6286_v54 }
 0x140   : > { %v6471_v60 = vsel %vm988_vm1, %v997_v13, %v1001_v6  ;;  %v6499_v8 = vsel %vm883_vm0, %v892_v37, %v896_v40  ;;  %v6511_v36 = vsel %vm883_vm0, %v896_v40, %v900_v45  ;;  %9112 = vst [vmem:[#allocation58_spill] sm:$0xff] %v6515_v42  ;;  %v6519_v37 = vmul.f32 %v6327_v12, %v6405_v48 }
 0x141   : > { %1789 = vmatpush2.bf16.msra.mxu0 %v5351_v50  ;;  %v993_v50 = vrot.slane %v6295_v58, 1  ;;  %9103 = vst [vmem:[#allocation49_spill] sm:$0xff] %v6471_v60  ;;  %9109 = vst [vmem:[#allocation55_spill] sm:$0xff] %v6499_v8  ;;  %v1009_v8 = vrot.slane %v6493_v46, 1  ;;  %v1302_v40 = vrot.slane %v6297_v59, %v6286_v54  ;;  %v904_v42 = vrot.slane %v6493_v46, 7 }
 0x142   : > { %9111 = vst [vmem:[#allocation57_spill] sm:$0xff] %v6511_v36  ;;  %9113 = vst [vmem:[#allocation59_spill] sm:$0xff] %v6519_v37  ;;  %v6533_v36 = vrot.slane %v1403_v63, %v6280_v51  ;;  %v6546_v56 = vsel %vm988_vm1, %v1001_v6, %v1005_v43  ;;  %v1449_v59 = vrot.slane %v6310_v4, %v6284_v53  ;;  %v1015_v60 = vrot.slane %v6525_v30, 1 }
 0x143   : > { %v6445_v23 = vsel %vm988_vm1, %v992_v49, %v993_v50  ;;  %v6465_v49 = vld [vmem:[%s6244_s27 + $0x50] sm:$0xff]  ;;  %v6477_v0 = vsel %vm988_vm1, %v993_v50, %v997_v13  ;;  %v6496_v50 = vld [vmem:[%s6244_s27 + $0x60] sm:$0xff]  ;;  %v1003_v13 = vrot.slane %v6431_v15, 1  ;;  %9117 = vst [vmem:[#allocation63_spill] sm:$0xff] %v6546_v56  ;;  %v1017_v54 = vrot.slane %v6528_v22, 1 }
 0x144   : > { %9105 = vst [vmem:[#allocation51_spill] sm:$0xff] %v6477_v0  ;;  %v1007_v38 = vrot.slane %v6465_v49, 1  ;;  %v6505_v0 = vld [vmem:[%s6244_s27 + $0x68] sm:$0xff]  ;;  %v902_v24 = vrot.slane %v6465_v49, 7  ;;  %v906_v41 = vrot.slane %v6496_v50, 7  ;;  %v1011_v63 = vrot.slane %v6496_v50, 1 }
 0x145   : > { %v908_v37 = vrot.slane %v6505_v0, 7  ;;  %v6543_v39 = vsel %vm988_vm1, %v999_v14, %v1003_v13  ;;  %v1013_v51 = vrot.slane %v6505_v0, 1  ;;  %v6555_v29 = vsel %vm988_vm1, %v1005_v43, %v1009_v8 }
 0x146   : > { %v6540_v17 = vsel %vm988_vm1, %v1003_v13, %v1007_v38  ;;  %9116 = vst [vmem:[#allocation62_spill] sm:$0xff] %v6543_v39  ;;  %9118 = vst [vmem:[#allocation64_spill] sm:$0xff] %v6555_v29  ;;  %v6558_v14 = vsel %vm883_vm0, %v902_v24, %v906_v41  ;;  %v1312_v6 = vrot.slane %v1302_v40, %v6284_v53 }
 0x147   : > { %9115 = vst [vmem:[#allocation61_spill] sm:$0xff] %v6540_v17  ;;  %v1503_v13 = vrot.slane %v6310_v4, %v6305_v2  ;;  %v6564_v56 = vsel %vm883_vm0, %v904_v42, %v908_v37  ;;  %v6567_v39 = vsel %vm883_vm0, %v898_v44, %v902_v24  ;;  %v6570_v17 = vsel %vm883_vm0, %v900_v45, %v904_v42 }
 0x148   : > { %v1463_v43 = vrot.slane %v1453_v52, %v6284_v53  ;;  %v6575_v29 = vmul.f32 %v6324_v11, %v6465_v49  ;;  %v6579_v40 = vmul.f32 %v6327_v12, %v6493_v46  ;;  %v6582_v2 = vrot.slane %v1449_v59, %v6284_v53 }
 0x149   : > { %v1499_v24 = vrot.slane %v6310_v4, %v6303_v1  ;;  %v6587_v44 = vsel %vm988_vm1, %v1011_v63, %v1015_v60  ;;  %v6590_v42 = vsel %vm988_vm1, %v1013_v51, %v1017_v54  ;;  %v6593_v52 = vsel %vm988_vm1, %v1007_v38, %v1011_v63 }
 0x14a   : > { %9119 = vst [vmem:[#allocation65_spill] sm:$0xff] %v6575_v29  ;;  %9120 = vst [vmem:[#allocation66_spill] sm:$0xff] %v6579_v40  ;;  %v6596_v45 = vsel %vm988_vm1, %v1009_v8, %v1013_v51  ;;  %v6599_v40 = vmul.f32 %v1312_v6, %v6308_v3  ;;  %v6602_v59 = vrot.slane %v1503_v13, %v6303_v1  ;;  %v910_v4 = vrot.slane %v6525_v30, 7 }
 0x14b   : > { %9121 = vst [vmem:[#allocation67_spill] sm:$0xff] %v6582_v2  ;;  %9122 = vst [vmem:[#allocation68_spill] sm:$0xff] %v6590_v42  ;;  %v912_v53 = vrot.slane %v6528_v22, 7  ;;  %v6607_v29 = vmul.f32 %v1312_v6, %v6295_v58  ;;  %v6610_v42 = vmul.f32 %v1463_v43, %v6295_v58  ;;  %v6613_v38 = vsel %vm988_vm1, %v1015_v60, 0.0 }
 0x14c   : > { %9124 = vst [vmem:[#allocation70_spill] sm:$0xff] %v6613_v38  ;;  %v6616_v51 = vsel %vm988_vm1, %v1017_v54, 0.0  ;;  %v6619_v3 = vmul.f32 %v1463_v43, %v6353_v26  ;;  %v6623_v8 = vmul.f32 %v6582_v2, %v6292_v57  ;;  %v6627_v63 = vmul.f32 %v6582_v2, %v6350_v25  ;;  %v9181_v38 = vld [vmem:[#allocation54_spill] sm:$0xff] }
 0x14d   : > { %9123 = vst [vmem:[#allocation69_spill] sm:$0xff] %v6610_v42  ;;  %9125 = vst [vmem:[#allocation71_spill] sm:$0xff] %v6616_v51  ;;  %v6630_v58 = vrot.slane %v1499_v24, %v6303_v1  ;;  %v6634_v60 = vmul.f32 %v6324_v11, %v6496_v50  ;;  %v6638_v54 = vmul.f32 %v6327_v12, %v6505_v0 }
 0x14e   : > { %9126 = vst [vmem:[#allocation72_spill] sm:$0xff] %v6619_v3  ;;  %9127 = vst [vmem:[#allocation73_spill] sm:$0xff] %v6627_v63  ;;  %v6642_v13 = vmul.f32 %v6424_v5, %v6496_v50  ;;  %v6645_v57 = vmul.f32 %v1312_v6, %v6505_v0  ;;  %v6648_v51 = vsel %vm883_vm0, %v906_v41, %v910_v4 }
 0x14f   : > { %9128 = vst [vmem:[#allocation74_spill] sm:$0xff] %v6630_v58  ;;  %9129 = vst [vmem:[#allocation75_spill] sm:$0xff] %v6634_v60  ;;  %v6651_v24 = vsel %vm883_vm0, %v908_v37, %v912_v53  ;;  %v6655_v11 = vmul.f32 %v6424_v5, %v6525_v30  ;;  %v6658_v12 = vmul.f32 %v1312_v6, %v6528_v22 }
 0x150   : > { %9130 = vst [vmem:[#allocation76_spill] sm:$0xff] %v6638_v54  ;;  %9131 = vst [vmem:[#allocation77_spill] sm:$0xff] %v6642_v13  ;;  %v6661_v1 = vmul.f32 %v1312_v6, %v6353_v26  ;;  %v6664_v13 = vmul.f32 %v1312_v6, %v6405_v48  ;;  %v6670_v41 = vmul.f32 %v1463_v43, %v6434_v7  ;;  %v9179_v54 = vld [vmem:[#allocation57_spill] sm:$0xff] }
 0x151   : > { %9132 = vst [vmem:[#allocation78_spill] sm:$0xff] %v6645_v57  ;;  %9133 = vst [vmem:[#allocation79_spill] sm:$0xff] %v6648_v51  ;;  %v6667_v57 = vmul.f32 %v1463_v43, %v6405_v48  ;;  %v6678_v4 = vmul.f32 %v6424_v5, %v6350_v25  ;;  %v6682_v26 = vmul.f32 %v6424_v5, %v6402_v47 }
 0x152   : > { %9134 = vst [vmem:[#allocation80_spill] sm:$0xff] %v6651_v24  ;;  %9135 = vst [vmem:[#allocation81_spill] sm:$0xff] %v6655_v11  ;;  %v6686_v30 = vmul.f32 %v6582_v2, %v6402_v47  ;;  %v6690_v48 = vmul.f32 %v6582_v2, %v6431_v15  ;;  %v6704_v47 = vmul.f32 %v1312_v6, %v6493_v46 }
 0x153   : > { %9136 = vst [vmem:[#allocation82_spill] sm:$0xff] %v6658_v12  ;;  %9137 = vst [vmem:[#allocation83_spill] sm:$0xff] %v6661_v1  ;;  %v9176_v1 = vld [vmem:[#allocation51_spill] sm:$0xff] }
 0x154   : > { %9138 = vst [vmem:[#allocation84_spill] sm:$0xff] %v6664_v13  ;;  %9139 = vst [vmem:[#allocation85_spill] sm:$0xff] %v6667_v57  ;;  %v6701_v57 = vmul.f32 %v1312_v6, %v6434_v7  ;;  %v6724_v7 = vmul.f32 %v6582_v2, %v6465_v49 }
 0x155   : > { %9140 = vst [vmem:[#allocation86_spill] sm:$0xff] %v6670_v41  ;;  %9143 = vst [vmem:[#allocation89_spill] sm:$0xff] %v6678_v4 }
 0x156   : > { %9144 = vst [vmem:[#allocation90_spill] sm:$0xff] %v6682_v26  ;;  %9145 = vst [vmem:[#allocation91_spill] sm:$0xff] %v6686_v30  ;;  %v6707_v30 = vmul.f32 %v1463_v43, %v6493_v46  ;;  %v6728_v46 = vmul.f32 %v6582_v2, %v6496_v50  ;;  %v6747_v2 = vmul.f32 0.0, %v1463_v43  ;;  %v9171_v26 = vld [vmem:[#allocation47_spill] sm:$0xff] }
 0x157   : > { %9146 = vst [vmem:[#allocation92_spill] sm:$0xff] %v6690_v48  ;;  %9147 = vst [vmem:[#allocation93_spill] sm:$0xff] %v6701_v57  ;;  %v6711_v48 = vmul.f32 %v6424_v5, %v6431_v15 }
 0x158   : > { %9148 = vst [vmem:[#allocation94_spill] sm:$0xff] %v6704_v47  ;;  %9149 = vst [vmem:[#allocation95_spill] sm:$0xff] %v6707_v30  ;;  %v6758_v30 = vmul.f32 0.0, %v6376_v33 }
 0x159   : > { %9150 = vst [vmem:[#allocation96_spill] sm:$0xff] %v6711_v48  ;;  %9153 = vst [vmem:[#allocation99_spill] sm:$0xff] %v6724_v7  ;;  %v9170_v48 = vld [vmem:[#allocation39_spill] sm:$0xff] }
 0x15a   : > { %9154 = vst [vmem:[#allocation100_spill] sm:$0xff] %v6728_v46  ;;  %9159 = vst [vmem:[#allocation105_spill] sm:$0xff] %v6747_v2 }
 0x15b   : > { %9161 = vst [vmem:[#allocation107_spill] sm:$0xff] %v6758_v30 }
 0x17d   : > { %v6672_v53 = vpop.permute.xlu1 %939  ;;  %v6674_v37 = vpop.permute.xlu0 %934 }
 0x17e   : > { %9141 = vst [vmem:[#allocation87_spill] sm:$0xff] %v6672_v53  ;;  %9142 = vst [vmem:[#allocation88_spill] sm:$0xff] %v6674_v37  ;;  %v974_v11 = vmul.f32 %v6672_v53, %v6337_v18  ;;  %v6696_v41 = vmul.f32 %v6672_v53, %v6340_v19  ;;  %v972_v25 = vmul.f32 %v6674_v37, %v6359_v28 }
 0x17f   : > { %v6715_v18 = vmul.f32 %v6424_v5, %v6465_v49  ;;  %v973_v19 = vmul.f32 %v6674_v37, %v6379_v34  ;;  %v6720_v28 = vmul.f32 %v1463_v43, %v6505_v0  ;;  %v6739_v0 = vmul.f32 0.0, %v6533_v36 }
 0x180   : > { %v1116_v15 = vmul.f32 %v6318_v9, %v974_v11  ;;  %v1117_v5 = vmul.f32 %v6321_v10, %v6696_v41  ;;  %v1263_v6 = vmul.f32 %v6343_v20, %v972_v25  ;;  %v1114_v49 = vmul.f32 %v6318_v9, %v972_v25 }
 0x181   : > { %9151 = vst [vmem:[#allocation97_spill] sm:$0xff] %v6715_v18  ;;  %9152 = vst [vmem:[#allocation98_spill] sm:$0xff] %v6720_v28  ;;  %v6734_v53 = vpop.permute.xlu1 %944  ;;  %v6736_v34 = vpop.permute.xlu0 %1039  ;;  %v6745_v37 = vmul.f32 %v1463_v43, %v6528_v22  ;;  %v1265_v46 = vmul.f32 %v6343_v20, %v974_v11  ;;  %v6755_v28 = vmul.f32 0.0, %v6602_v59  ;;  %v6763_v22 = vmul.f32 %v6376_v33, %v974_v11 }
 0x182   : > { %9155 = vst [vmem:[#allocation101_spill] sm:$0xff] %v6734_v53  ;;  %9156 = vst [vmem:[#allocation102_spill] sm:$0xff] %v6736_v34  ;;  %v976_v50 = vmul.f32 %v6734_v53, %v6414_v61  ;;  %v6752_v7 = vmul.f32 %v6734_v53, %v6417_v62  ;;  %v1266_v61 = vmul.f32 %v6356_v27, %v6696_v41 }
 0x183   : > { %9157 = vst [vmem:[#allocation103_spill] sm:$0xff] %v6739_v0  ;;  %9158 = vst [vmem:[#allocation104_spill] sm:$0xff] %v6745_v37  ;;  %v1115_v43 = vmul.f32 %v6321_v10, %v973_v19  ;;  %v1264_v25 = vmul.f32 %v6356_v27, %v973_v19  ;;  %v1182_v37 = vadd.f32 %v6369_v31, %v1116_v15  ;;  %v9166_v15 = vld [vmem:[#allocation49_spill] sm:$0xff] }
 0x184   : > { %9160 = vst [vmem:[#allocation106_spill] sm:$0xff] %v6755_v28  ;;  %v1183_v62 = vadd.f32 %v6373_v32, %v1117_v5  ;;  %v1279_v53 = vadd.f32 %v1263_v6, %v6436_v16  ;;  %v1077_v28 = vmul.f32 %v6736_v34, %v6441_v21  ;;  %v1180_v11 = vadd.f32 %v6383_v35, %v1114_v49  ;;  %v9165_v16 = vld [vmem:[#allocation38_spill] sm:$0xff]  ;;  %v9168_v49 = vld [vmem:[#allocation41_spill] sm:$0xff] }
 0x185   : > { %v6772_v30 = vpop.permute.xlu1 %1049  ;;  %v6774_v2 = vpop.permute.xlu0 %1044  ;;  %v1118_v0 = vmul.f32 %v6318_v9, %v976_v50  ;;  %v1078_v19 = vmul.f32 %v6736_v34, %v6445_v23  ;;  %v1119_v32 = vmul.f32 %v6321_v10, %v6752_v7  ;;  %v9167_v6 = vld [vmem:[#allocation50_spill] sm:$0xff]  ;;  %v1181_v18 = vadd.f32 %v9168_v49, %v1115_v43  ;;  %v9169_v23 = vld [vmem:[#allocation44_spill] sm:$0xff] }
 0x186   : > { %9162 = vst [vmem:[#allocation108_spill] sm:$0xff] %v6772_v30  ;;  %9163 = vst [vmem:[#allocation109_spill] sm:$0xff] %v6774_v2  ;;  %v6782_v31 = vmul.f32 %v6772_v30, %v6468_v55  ;;  %v1214_v21 = vmul.f32 %v9165_v16, %v1077_v28  ;;  %v6789_v5 = vmul.f32 %v6772_v30, %v9166_v15  ;;  %v9172_v30 = vld [vmem:[#allocation45_spill] sm:$0xff]  ;;  %v9175_v43 = vld [vmem:[#allocation42_spill] sm:$0xff] }
 0x187   : > { %v6793_v35 = vmul.f32 %v6774_v2, %v9167_v6  ;;  %v6797_v34 = vadd.f32 %v1264_v25, %v9169_v23  ;;  %v1267_v55 = vmul.f32 %v6343_v20, %v976_v50  ;;  %v1215_v47 = vmul.f32 %v9170_v48, %v1078_v19 }
 0x188   : > { %9164 = vst [vmem:[#allocation110_spill] sm:$0xff] %v6782_v31  ;;  %v6802_v57 = vmul.f32 %v6376_v33, %v976_v50  ;;  %v1329_v4 = vadd.f32 %v9171_v26, %v1279_v53  ;;  %v1230_v15 = vadd.f32 %v1214_v21, %v1180_v11  ;;  %v1363_v12 = vmul.f32 %v9172_v30, %v1077_v28  ;;  %v9177_v53 = vld [vmem:[#allocation43_spill] sm:$0xff]  ;;  %v9178_v21 = vld [vmem:[#allocation56_spill] sm:$0xff] }
 0x189   : > { %v6806_v13 = vpop.permute.xlu1 %954  ;;  %v6808_v6 = vpop.permute.xlu0 %949  ;;  %v1184_v49 = vadd.f32 %v9175_v43, %v1118_v0  ;;  %v1268_v25 = vmul.f32 %v6356_v27, %v6752_v7  ;;  %v1218_v23 = vmul.f32 %v9165_v16, %v6782_v31  ;;  %v6817_v50 = vmul.f32 %v6774_v2, %v9176_v1  ;;  %v9180_v2 = vld [vmem:[#allocation46_spill] sm:$0xff] }
 0x18a   : > { %9173 = vst [vmem:[#allocation38_spill] sm:$0xff] %v6806_v13  ;;  %9174 = vst [vmem:[#allocation49_spill] sm:$0xff] %v6808_v6  ;;  %v1185_v26 = vadd.f32 %v9177_v53, %v1119_v32  ;;  %v1219_v28 = vmul.f32 %v9170_v48, %v6789_v5  ;;  %v1216_v11 = vmul.f32 %v9165_v16, %v6793_v35 }
 0x18b   : > { %v980_v0 = vmul.f32 %v6806_v13, %v9178_v21  ;;  %v1231_v43 = vadd.f32 %v1215_v47, %v1181_v18  ;;  %v1281_v24 = vadd.f32 %v1265_v46, %v1230_v15  ;;  %v1217_v51 = vmul.f32 %v9170_v48, %v6817_v50 }
 0x18c   : > { %v981_v1 = vmul.f32 %v6806_v13, %v9179_v54  ;;  %v6831_v60 = vmul.f32 %v9180_v2, %v1078_v19  ;;  %v6833_v32 = vadd.f32 %v1363_v12, %v1329_v4  ;;  %v1232_v53 = vadd.f32 %v1216_v11, %v1182_v37  ;;  %v9186_v4 = vld [vmem:[#allocation55_spill] sm:$0xff] }
 0x18d   : > { %v978_v63 = vmul.f32 %v6808_v6, %v9181_v38  ;;  %v6837_v3 = vpop.permute.xlu1 %1059  ;;  %v1234_v21 = vadd.f32 %v1218_v23, %v1184_v49  ;;  %v6841_v47 = vmul.f32 %v9172_v30, %v6782_v31  ;;  %v6845_v18 = vmul.f32 %v9180_v2, %v6789_v5  ;;  %v6848_v46 = vpop.permute.xlu0 %1054  ;;  %v9187_v49 = vld [vmem:[#allocation48_spill] sm:$0xff] }
 0x18e   : > { %9182 = vst [vmem:[#allocation50_spill] sm:$0xff] %v6837_v3  ;;  %v1122_v54 = vmul.f32 %v6318_v9, %v980_v0  ;;  %9185 = vst [vmem:[#allocation39_spill] sm:$0xff] %v6848_v46  ;;  %v1235_v12 = vadd.f32 %v1219_v28, %v1185_v26  ;;  %v1233_v37 = vadd.f32 %v1217_v51, %v1183_v62  ;;  %v9190_v28 = vld [vmem:[#allocation52_spill] sm:$0xff] }
 0x18f   : > { %9183 = vst [vmem:[#allocation41_spill] sm:$0xff] %v6841_v47  ;;  %9184 = vst [vmem:[#allocation44_spill] sm:$0xff] %v6845_v18  ;;  %v6852_v38 = vmul.f32 %v9172_v30, %v6793_v35  ;;  %v979_v19 = vmul.f32 %v6808_v6, %v9186_v4  ;;  %v6856_v15 = vadd.f32 %v1266_v61, %v1231_v43  ;;  %v9191_v43 = vld [vmem:[#allocation61_spill] sm:$0xff] }
 0x190   : > { %v6859_v23 = vadd.f32 %v9187_v49, %v1281_v24  ;;  %v1123_v11 = vmul.f32 %v6321_v10, %v981_v1  ;;  %v1271_v13 = vmul.f32 %v6343_v20, %v980_v0  ;;  %v6863_v47 = vadd.f32 %v1267_v55, %v1232_v53  ;;  %v9192_v49 = vld [vmem:[#allocation64_spill] sm:$0xff] }
 0x191   : > { %v1272_v51 = vmul.f32 %v6356_v27, %v981_v1  ;;  %v6867_v62 = vmul.f32 %v6376_v33, %v980_v0  ;;  %v1120_v26 = vmul.f32 %v6318_v9, %v978_v63  ;;  %v1188_v4 = vadd.f32 %v9190_v28, %v1122_v54  ;;  %v9195_v0 = vld [vmem:[#allocation62_spill] sm:$0xff]  ;;  %v9196_v54 = vld [vmem:[#allocation63_spill] sm:$0xff] }
 0x192   : > { %9188 = vst [vmem:[#allocation47_spill] sm:$0xff] %v6863_v47  ;;  %v1121_v61 = vmul.f32 %v6321_v10, %v979_v19  ;;  %v6874_v24 = vmul.f32 %v6837_v3, %v9191_v43  ;;  %v6878_v6 = vmul.f32 %v6837_v3, %v9192_v49  ;;  %v6880_v55 = vadd.f32 %v1268_v25, %v1233_v37  ;;  %v6893_v47 = vpop.permute.xlu1 %964  ;;  %v9198_v43 = vld [vmem:[#allocation53_spill] sm:$0xff]  ;;  %v9201_v3 = vld [vmem:[#allocation58_spill] sm:$0xff] }
 0x193   : > { %9189 = vst [vmem:[#allocation45_spill] sm:$0xff] %v6867_v62  ;;  %v6883_v53 = vmul.f32 %v6533_v36, %v981_v1  ;;  %v6887_v62 = vmul.f32 %v6848_v46, %v9195_v0  ;;  %v6891_v28 = vmul.f32 %v6848_v46, %v9196_v54  ;;  %9197 = vst [vmem:[#allocation43_spill] sm:$0xff] %v6893_v47  ;;  %v6901_v1 = vpop.permute.xlu0 %959 }
 0x194   : > { %9193 = vst [vmem:[#allocation42_spill] sm:$0xff] %v6880_v55  ;;  %v1189_v18 = vadd.f32 %v9198_v43, %v1123_v11  ;;  %v1269_v49 = vmul.f32 %v6343_v20, %v978_v63  ;;  %v1270_v25 = vmul.f32 %v6356_v27, %v979_v19  ;;  %v6899_v37 = vmul.f32 %v6376_v33, %v978_v63  ;;  %v9202_v43 = vld [vmem:[#allocation59_spill] sm:$0xff] }
 0x195   : > { %9194 = vst [vmem:[#allocation51_spill] sm:$0xff] %v6883_v53  ;;  %9200 = vst [vmem:[#allocation57_spill] sm:$0xff] %v6901_v1  ;;  %v1186_v0 = vadd.f32 %v9201_v3, %v1120_v26  ;;  %v1222_v53 = vmul.f32 %v9165_v16, %v6874_v24  ;;  %v1220_v54 = vmul.f32 %v9165_v16, %v6887_v62 }
 0x196   : > { %9199 = vst [vmem:[#allocation56_spill] sm:$0xff] %v6899_v37  ;;  %v1221_v11 = vmul.f32 %v9170_v48, %v6891_v28  ;;  %v1187_v46 = vadd.f32 %v9202_v43, %v1121_v61  ;;  %v1223_v55 = vmul.f32 %v9170_v48, %v6878_v6  ;;  %v984_v63 = vmul.f32 %v6893_v47, %v6558_v14 }
 0x197   : > { %v985_v3 = vmul.f32 %v6893_v47, %v6564_v56  ;;  %v6918_v26 = vmul.f32 %v6533_v36, %v979_v19  ;;  %v1236_v37 = vadd.f32 %v1220_v54, %v1186_v0  ;;  %v982_v31 = vmul.f32 %v6901_v1, %v6567_v39 }
 0x198   : > { %v983_v42 = vmul.f32 %v6901_v1, %v6570_v17  ;;  %v6924_v61 = vadd.f32 %v1269_v49, %v1234_v21  ;;  %v6926_v43 = vadd.f32 %v1270_v25, %v1235_v12  ;;  %v6930_v14 = vmul.f32 %v9172_v30, %v6874_v24 }
 0x199   : > { %v1237_v58 = vadd.f32 %v1221_v11, %v1187_v46  ;;  %v1238_v56 = vadd.f32 %v1222_v53, %v1188_v4  ;;  %v6934_v19 = vmul.f32 %v9180_v2, %v6878_v6  ;;  %v6938_v39 = vmul.f32 %v9172_v30, %v6887_v62  ;;  %v6949_v4 = vpop.permute.xlu1 %1069  ;;  %v6956_v11 = vpop.permute.xlu0 %1064 }
 0x19a   : > { %v6942_v17 = vmul.f32 %v9180_v2, %v6891_v28  ;;  %v1239_v21 = vadd.f32 %v1223_v55, %v1189_v18  ;;  %v1126_v12 = vmul.f32 %v6318_v9, %v984_v63  ;;  %v1127_v49 = vmul.f32 %v6321_v10, %v985_v3  ;;  %9203 = vst [vmem:[#allocation46_spill] sm:$0xff] %v6949_v4 }
 0x19b   : > { %v6947_v46 = vmul.f32 %v6343_v20, %v984_v63  ;;  %v6951_v53 = vadd.f32 %v1271_v13, %v1236_v37  ;;  %v1276_v25 = vmul.f32 %v6356_v27, %v985_v3  ;;  %v1124_v0 = vmul.f32 %v6318_v9, %v982_v31  ;;  %9204 = vst [vmem:[#allocation54_spill] sm:$0xff] %v6956_v11 }
 0x19c   : > { %v1125_v54 = vmul.f32 %v6321_v10, %v983_v42  ;;  %v6958_v18 = vadd.f32 %v1272_v51, %v1237_v58  ;;  %v6961_v55 = vmul.f32 %v6376_v33, %v984_v63  ;;  %v1273_v47 = vmul.f32 %v6343_v20, %v982_v31  ;;  %v9208_v10 = vld [vmem:[#allocation68_spill] sm:$0xff] }
 0x19d   : > { %v1274_v1 = vmul.f32 %v6356_v27, %v983_v42  ;;  %v6966_v13 = vmul.f32 %v6533_v36, %v985_v3  ;;  %v6969_v37 = vmul.f32 %v6376_v33, %v982_v31  ;;  %v6973_v9 = vmul.f32 %v6949_v4, %v6587_v44  ;;  %v9209_v44 = vld [vmem:[#allocation65_spill] sm:$0xff] }
 0x19e   : > { %9205 = vst [vmem:[#allocation55_spill] sm:$0xff] %v6961_v55  ;;  %v6977_v58 = vmul.f32 %v6949_v4, %v9208_v10  ;;  %v6981_v51 = vmul.f32 %v6956_v11, %v6593_v52  ;;  %v6985_v63 = vmul.f32 %v6956_v11, %v6596_v45  ;;  %v1330_v31 = vadd.f32 %v6599_v40, %v6797_v34  ;;  %v9210_v55 = vld [vmem:[#allocation66_spill] sm:$0xff]  ;;  %v9220_v11 = vld [vmem:[#allocation79_spill] sm:$0xff] }
 0x19f   : > { %9206 = vst [vmem:[#allocation48_spill] sm:$0xff] %v6969_v37  ;;  %9207 = vst [vmem:[#allocation52_spill] sm:$0xff] %v6973_v9  ;;  %v1332_v3 = vadd.f32 %v6607_v29, %v6856_v15  ;;  %v1190_v33 = vadd.f32 %v9209_v44, %v1124_v0  ;;  %v1191_v37 = vadd.f32 %v9210_v55, %v1125_v54 }
 0x1a0   : > { %v6994_v10 = vmul.f32 %v6533_v36, %v983_v42  ;;  %v1366_v52 = vmul.f32 %v9180_v2, %v6817_v50  ;;  %v6998_v4 = vadd.f32 %v1273_v47, %v1238_v56  ;;  %v7000_v45 = vadd.f32 %v1274_v1, %v1239_v21 }
 0x1a1   : > { %v1225_v40 = vmul.f32 %v9170_v48, %v6985_v63  ;;  %v1415_v29 = vmul.f32 %v6533_v36, %v6696_v41  ;;  %v1380_v34 = vadd.f32 %v6831_v60, %v1330_v31  ;;  %v1417_v42 = vmul.f32 %v6533_v36, %v6752_v7 }
 0x1a2   : > { %v1382_v15 = vadd.f32 %v1366_v52, %v1332_v3  ;;  %v1381_v0 = vadd.f32 %v6852_v38, %v6859_v23  ;;  %v1226_v47 = vmul.f32 %v9165_v16, %v6973_v9  ;;  %v1227_v1 = vmul.f32 %v9170_v48, %v6977_v58  ;;  %v7022_v38 = vpop.permute.xlu1 %1074  ;;  %v9212_v3 = vld [vmem:[#allocation69_spill] sm:$0xff] }
 0x1a3   : > { %v1224_v56 = vmul.f32 %v9165_v16, %v6981_v51  ;;  %v1430_v41 = vadd.f32 %v6763_v22, %v6833_v32  ;;  %v1431_v60 = vadd.f32 %v1415_v29, %v1380_v34  ;;  %v1515_v7 = vmul.f32 %v6602_v59, %v6817_v50  ;;  %v9211_v16 = vld [vmem:[#allocation74_spill] sm:$0xff]  ;;  %v9213_v32 = vld [vmem:[#allocation72_spill] sm:$0xff]  ;;  %v9214_v52 = vld [vmem:[#allocation73_spill] sm:$0xff]  ;;  %v7044_v34 = vpop.permute.xlu0 %969 }
 0x1a4   : > { %v1433_v21 = vadd.f32 %v1417_v42, %v1382_v15  ;;  %v1432_v54 = vadd.f32 %v6802_v57, %v1381_v0  ;;  %v1241_v23 = vadd.f32 %v1225_v40, %v1191_v37  ;;  %v1517_v55 = vmul.f32 %v6602_v59, %v6789_v5  ;;  %v9215_v50 = vld [vmem:[#allocation110_spill] sm:$0xff] }
 0x1a5   : > { %v1480_v48 = vadd.f32 %v6623_v8, %v1430_v41  ;;  %v1514_v31 = vmul.f32 %v9211_v16, %v6793_v35  ;;  %v1481_v22 = vadd.f32 %v9212_v3, %v1431_v60  ;;  %v1516_v57 = vmul.f32 %v9211_v16, %v9215_v50  ;;  %v9216_v40 = vld [vmem:[#allocation70_spill] sm:$0xff]  ;;  %v9217_v60 = vld [vmem:[#allocation71_spill] sm:$0xff] }
 0x1a6   : > { %v1483_v44 = vadd.f32 %v9213_v32, %v1433_v21  ;;  %v1482_v29 = vadd.f32 %v9214_v52, %v1432_v54  ;;  %v7036_v37 = vmul.f32 %v9172_v30, %v6973_v9  ;;  %v1376_v5 = vmul.f32 %v9180_v2, %v6977_v58  ;;  %v9218_v54 = vld [vmem:[#allocation75_spill] sm:$0xff]  ;;  %v9219_v32 = vld [vmem:[#allocation76_spill] sm:$0xff] }
 0x1a7   : > { %v1240_v8 = vadd.f32 %v1224_v56, %v1190_v33  ;;  %v7042_v35 = vmul.f32 %v7022_v38, %v9216_v40  ;;  %v1531_v15 = vadd.f32 %v1515_v7, %v1481_v22  ;;  %v1530_v0 = vadd.f32 %v1514_v31, %v1480_v48  ;;  %v9221_v9 = vld [vmem:[#allocation80_spill] sm:$0xff]  ;;  %v9222_v48 = vld [vmem:[#allocation78_spill] sm:$0xff] }
 0x1a8   : > { %v1533_v42 = vadd.f32 %v1517_v55, %v1483_v44  ;;  %v1532_v41 = vadd.f32 %v1516_v57, %v1482_v29  ;;  %v7048_v21 = vmul.f32 %v7022_v38, %v9217_v60  ;;  %v1192_v3 = vadd.f32 %v9218_v54, %v1126_v12  ;;  %v9223_v22 = vld [vmem:[#allocation42_spill] sm:$0xff]  ;;  %v9224_v44 = vld [vmem:[#allocation83_spill] sm:$0xff]  ;;  %v9225_v12 = vld [vmem:[#allocation84_spill] sm:$0xff] }
 0x1a9   : > { %v1193_v52 = vadd.f32 %v9219_v32, %v1127_v49  ;;  %v1292_v50 = vadd.f32 %v1276_v25, %v1241_v23  ;;  %v7054_v40 = vmul.f32 %v7044_v34, %v9220_v11  ;;  %v987_v7 = vmul.f32 %v7044_v34, %v9221_v9  ;;  %v9228_v54 = vld [vmem:[#allocation51_spill] sm:$0xff]  ;;  %v9229_v32 = vld [vmem:[#allocation82_spill] sm:$0xff] }
 0x1aa   : > { %v1547_v33 = vpack.c.bf16 %v1533_v42, %v1531_v15  ;;  %v1546_v56 = vpack.c.bf16 %v1532_v41, %v1530_v0  ;;  %v1291_v55 = vadd.f32 %v6947_v46, %v1240_v8  ;;  %v1334_v29 = vadd.f32 %v9224_v44, %v9223_v22  ;;  %v9226_v8 = vld [vmem:[#allocation44_spill] sm:$0xff]  ;;  %v9234_v22 = vld [vmem:[#allocation86_spill] sm:$0xff]  ;;  %v9235_v44 = vld [vmem:[#allocation81_spill] sm:$0xff] }
 0x1ab   : > { %v1342_v31 = vadd.f32 %v9222_v48, %v1292_v50  ;;  %v1336_v49 = vadd.f32 %v9225_v12, %v6926_v43  ;;  %v1242_v25 = vadd.f32 %v1226_v47, %v1192_v3  ;;  %v1243_v23 = vadd.f32 %v1227_v1, %v1193_v52  ;;  %v9233_v48 = vld [vmem:[#allocation85_spill] sm:$0xff] }
 0x1ac   : > { %1790 = vmatprep.mubr.bf16.mxu0 %v1547_v33  ;;  %v1277_v11 = vmul.f32 %v6343_v20, %v7054_v40  ;;  %v1278_v57 = vmul.f32 %v6356_v27, %v987_v7  ;;  %v1373_v9 = vmul.f32 %v9172_v30, %v6981_v51  ;;  %v1374_v46 = vmul.f32 %v9180_v2, %v6985_v63  ;;  %v9227_v27 = vld [vmem:[#allocation77_spill] sm:$0xff] }
 0x1ad   : > { %1791 = vmatmul.mubr.bf16.vlgmr.msra.gmra.mxu0 %v1546_v56  ;;  %v1384_v15 = vadd.f32 %v9226_v8, %v1334_v29  ;;  %v1386_v42 = vadd.f32 %v6942_v17, %v1336_v49  ;;  %v1377_v43 = vmul.f32 %v9172_v30, %v7042_v35  ;;  %v1392_v47 = vadd.f32 %v1376_v5, %v1342_v31  ;;  %v9230_v17 = vld [vmem:[#allocation47_spill] sm:$0xff]  ;;  %v9231_v33 = vld [vmem:[#allocation89_spill] sm:$0xff]  ;;  %v9232_v30 = vld [vmem:[#allocation90_spill] sm:$0xff] }
 0x1ae   : > { %v1293_v1 = vadd.f32 %v1277_v11, %v1242_v25  ;;  %v1294_v0 = vadd.f32 %v1278_v57, %v1243_v23  ;;  %v1378_v20 = vmul.f32 %v9180_v2, %v7048_v21  ;;  %v1341_v41 = vadd.f32 %v9227_v27, %v1291_v55  ;;  %v9238_v57 = vld [vmem:[#allocation94_spill] sm:$0xff] }
 0x1af   : > { %v1435_v60 = vadd.f32 %v6918_v26, %v1384_v15  ;;  %v1437_v3 = vadd.f32 %v9228_v54, %v1386_v42  ;;  %v1427_v50 = vmul.f32 %v6533_v36, %v987_v7  ;;  %v1333_v56 = vadd.f32 %v9231_v33, %v9230_v17  ;;  %v9236_v36 = vld [vmem:[#allocation41_spill] sm:$0xff] }
 0x1b0   : > { %v1344_v52 = vadd.f32 %v9229_v32, %v1294_v0  ;;  %v1335_v5 = vadd.f32 %v9232_v30, %v6924_v61  ;;  %v1519_v55 = vmul.f32 %v6602_v59, %v6891_v28  ;;  %v1521_v26 = vmul.f32 %v6602_v59, %v6878_v6  ;;  %v9237_v61 = vld [vmem:[#allocation93_spill] sm:$0xff]  ;;  %v9239_v28 = vld [vmem:[#allocation56_spill] sm:$0xff]  ;;  %v9245_v30 = vld [vmem:[#allocation103_spill] sm:$0xff] }
 0x1b1   : > { %v1485_v31 = vadd.f32 %v9233_v48, %v1435_v60  ;;  %v1487_v2 = vadd.f32 %v9234_v22, %v1437_v3  ;;  %v1343_v29 = vadd.f32 %v9235_v44, %v1293_v1  ;;  %v1443_v12 = vadd.f32 %v1427_v50, %v1392_v47  ;;  %v9240_v0 = vld [vmem:[#allocation45_spill] sm:$0xff]  ;;  %v9241_v60 = vld [vmem:[#allocation96_spill] sm:$0xff]  ;;  %v9242_v3 = vld [vmem:[#allocation91_spill] sm:$0xff] }
 0x1b2   : > { %v1383_v7 = vadd.f32 %v9236_v36, %v1333_v56  ;;  %v1385_v49 = vadd.f32 %v6938_v39, %v1335_v5  ;;  %v1338_v11 = vadd.f32 %v9237_v61, %v6958_v18  ;;  %v1340_v8 = vadd.f32 %v9238_v57, %v7000_v45  ;;  %v9243_v32 = vld [vmem:[#allocation92_spill] sm:$0xff]  ;;  %v9246_v48 = vld [vmem:[#allocation95_spill] sm:$0xff]  ;;  %v9250_v44 = vld [vmem:[#allocation105_spill] sm:$0xff] }
 0x1b3   : > { %v1535_v25 = vadd.f32 %v1519_v55, %v1485_v31  ;;  %v1537_v23 = vadd.f32 %v1521_v26, %v1487_v2  ;;  %v1394_v15 = vadd.f32 %v1378_v20, %v1344_v52  ;;  %v1518_v47 = vmul.f32 %v9211_v16, %v6887_v62  ;;  %v9244_v20 = vld [vmem:[#allocation97_spill] sm:$0xff]  ;;  %v9247_v31 = vld [vmem:[#allocation98_spill] sm:$0xff]  ;;  %v9249_v26 = vld [vmem:[#allocation55_spill] sm:$0xff] }
 0x1b4   : > { %v1434_v42 = vadd.f32 %v9239_v28, %v1383_v7  ;;  %v1436_v6 = vadd.f32 %v9240_v0, %v1385_v49  ;;  %v1388_v27 = vadd.f32 %v6934_v19, %v1338_v11  ;;  %v1390_v39 = vadd.f32 %v1374_v46, %v1340_v8  ;;  %v9253_v11 = vld [vmem:[#allocation100_spill] sm:$0xff] }
 0x1b5   : > { %v1549_v1 = vpack.c.bf16 %v1537_v23, %v1535_v25  ;;  %v1337_v54 = vadd.f32 %v9241_v60, %v6951_v53  ;;  %v1520_v45 = vmul.f32 %v9211_v16, %v6874_v24  ;;  %v1339_v52 = vadd.f32 %v9244_v20, %v6998_v4  ;;  %v9252_v23 = vld [vmem:[#allocation99_spill] sm:$0xff] }
 0x1b6   : > { %v1484_v18 = vadd.f32 %v9242_v3, %v1434_v42  ;;  %v1486_v50 = vadd.f32 %v9243_v32, %v1436_v6  ;;  %v1439_v62 = vadd.f32 %v6994_v10, %v1388_v27  ;;  %v1441_v17 = vadd.f32 %v6966_v13, %v1390_v39  ;;  %v9248_v10 = vld [vmem:[#allocation48_spill] sm:$0xff]  ;;  %v9256_v42 = vld [vmem:[#allocation67_spill] sm:$0xff] }
 0x1b7   : > { %1800 = vmatprep.mubr.bf16.mxu0 %v1549_v1  ;;  %v1523_v19 = vmul.f32 %v6602_v59, %v6985_v63  ;;  %v1387_v53 = vadd.f32 %v6930_v14, %v1337_v54  ;;  %v1389_v56 = vadd.f32 %v1373_v9, %v1339_v52  ;;  %v1445_v5 = vadd.f32 %v9245_v30, %v1394_v15  ;;  %v9251_v9 = vld [vmem:[#allocation104_spill] sm:$0xff]  ;;  %v9255_v15 = vld [vmem:[#allocation106_spill] sm:$0xff]  ;;  %v5352_v52 = vld [vmem:[%s8783_s7 + $0x78] sm:$0xff]  }
 0x1b8   : > { %v1534_v46 = vadd.f32 %v1518_v47, %v1484_v18  ;;  %v1536_v33 = vadd.f32 %v1520_v45, %v1486_v50  ;;  %v1489_v24 = vadd.f32 %v9246_v48, %v1439_v62  ;;  %v1491_v22 = vadd.f32 %v9247_v31, %v1441_v17  ;;  %v9258_v47 = vld [vmem:[#allocation107_spill] sm:$0xff]  ;;  %v9259_v54 = vld [vmem:[#allocation60_spill] sm:$0xff]  ;;  %v5354_v62 = vld [vmem:[%s8789_s13 + $0x78] sm:$0xff]   ;;  %4909 = vmatprep.subr.bf16.mxu1 %v5352_v52 }
 0x1b9   : > { %v1525_v4 = vmul.f32 %v6602_v59, %v6977_v58  ;;  %v1438_v2 = vadd.f32 %v9248_v10, %v1387_v53  ;;  %v1393_v13 = vadd.f32 %v1377_v43, %v1343_v29  ;;  %v1440_v63 = vadd.f32 %v9249_v26, %v1389_v56  ;;  %v9254_v58 = vld [vmem:[#allocation52_spill] sm:$0xff]  ;;  %v5353_v17 = vld [vmem:[%s8783_s7 + $0x38] sm:$0xff]   ;;  %4989 = vmatprep.subr.bf16.mxu0 %v5354_v62  ;;  %v5362_v56 = vld [vmem:[%s8789_s13 + $0x68] sm:$0xff]  }
 0x1ba   : > { %v1548_v55 = vpack.c.bf16 %v1536_v33, %v1534_v46  ;;  %v1495_v14 = vadd.f32 %v9250_v44, %v1445_v5  ;;  %v1539_v36 = vadd.f32 %v1523_v19, %v1489_v24  ;;  %v1493_v49 = vadd.f32 %v9251_v9, %v1443_v12  ;;  %v9257_v12 = vld [vmem:[#allocation40_spill] sm:$0xff]  ;;  %4910 = vmatpush3.bf16.msra.mxu1 %v5353_v17  ;;  %v5360_v33 = vld [vmem:[%s8783_s7 + $0x68] sm:$0xff]   ;;  %v5364_v48 = vld [vmem:[%s8783_s7 + $0x60] sm:$0xff]  }
 0x1bb   : > { %v1541_v7 = vadd.f32 %v1525_v4, %v1491_v22  ;;  %v1391_v25 = vadd.f32 %v7036_v37, %v1341_v41  ;;  %v1488_v61 = vadd.f32 %v9252_v23, %v1438_v2  ;;  %v1490_v57 = vadd.f32 %v9253_v11, %v1440_v63  ;;  %v5358_v19 = vld [vmem:[%s8789_s13 + $0x70] sm:$0xff]   ;;  %v5361_v30 = vld [vmem:[%s8783_s7 + $0x28] sm:$0xff]   ;;  %v5366_v24 = vld [vmem:[%s8789_s13 + $0x60] sm:$0xff]  }
 0x1bc   : > { %1801 = vmatmul.mubr.bf16.gmra.mxu0 %v1548_v55  ;;  %v1524_v8 = vmul.f32 %v9211_v16, %v9254_v58  ;;  %v1527_v43 = vmul.f32 %v6602_v59, %v7048_v21  ;;  %v1545_v28 = vadd.f32 %v9255_v15, %v1495_v14  ;;  %v1478_v0 = vmul.f32 0.0, %v9256_v42  ;;  %v5357_v53 = vld [vmem:[%s8783_s7 + $0x30] sm:$0xff]   ;;  %v5363_v5 = vld [vmem:[%s8789_s13 + $0x28] sm:$0xff]   ;;  %v5365_v31 = vld [vmem:[%s8783_s7 + $0x20] sm:$0xff]  }
 0x1bd   : > { %v1551_v29 = vpack.c.bf16 %v1541_v7, %v1539_v36  ;;  %v1426_v6 = vmul.f32 %v9257_v12, %v7054_v40  ;;  %v1522_v37 = vmul.f32 %v9211_v16, %v6981_v51  ;;  %v1444_v1 = vadd.f32 %v9258_v47, %v1393_v13  ;;  %v5359_v46 = vld [vmem:[%s8789_s13 + $0x30] sm:$0xff]   ;;  %v5367_v22 = vld [vmem:[%s8789_s13 + $0x20] sm:$0xff]   ;;  %v5368_v4 = vld [vmem:[%s8783_s7 + $0x58] sm:$0xff]  }
 0x1be   : > { %v1540_v41 = vadd.f32 %v1524_v8, %v1490_v57  ;;  %v1543_v27 = vadd.f32 %v1527_v43, %v1493_v49  ;;  %v1476_v59 = vmul.f32 %v9256_v42, %v9259_v54  ;;  %v1528_v32 = vmul.f32 0.0, %v9211_v16  ;;  %v5370_v10 = vld [vmem:[%s8789_s13 + $0x58] sm:$0xff]   ;;  %v5372_v55 = vld [vmem:[%s8783_s7 + $0x50] sm:$0xff]   ;;  %v5376_v14 = vld [vmem:[%s8783_s7 + $0x48] sm:$0xff]  }
 0x1bf   : > { %1810 = vmatprep.mubr.bf16.mxu0 %v1551_v29  ;;  %v1442_v39 = vadd.f32 %v1426_v6, %v1391_v25  ;;  %v1538_v60 = vadd.f32 %v1522_v37, %v1488_v61  ;;  %v1494_v18 = vadd.f32 %v1478_v0, %v1444_v1  ;;  %v1526_v51 = vmul.f32 %v9211_v16, %v7042_v35  ;;  %v5355_v16 = vld [vmem:[%s8789_s13 + $0x38] sm:$0xff]   ;;  %v5356_v35 = vld [vmem:[%s8783_s7 + $0x70] sm:$0xff]   ;;  %v5378_v36 = vld [vmem:[%s8789_s13 + $0x48] sm:$0xff]  }
 0x1c0   : > { %v1553_v21 = vpack.c.bf16 %v1545_v28, %v1543_v27  ;;  %4990 = vmatpush3.bf16.msra.mxu0 %v5355_v16  ;;  %4911 = vmatprep.subr.bf16.mxu1 %v5356_v35  ;;  %v5369_v2 = vld [vmem:[%s8783_s7 + $0x18] sm:$0xff]   ;;  %v5374_v26 = vld [vmem:[%s8789_s13 + $0x50] sm:$0xff]   ;;  %v5377_v7 = vld [vmem:[%s8783_s7 + $0x8] sm:$0xff]  }
 0x1c1   : > { %v1550_v3 = vpack.c.bf16 %v1540_v41, %v1538_v60  ;;  %v1492_v40 = vadd.f32 %v1476_v59, %v1442_v39  ;;  %v1544_v50 = vadd.f32 %v1528_v32, %v1494_v18  ;;  %4991 = vmatprep.subr.bf16.mxu0 %v5358_v19  ;;  %4912 = vmatpush3.bf16.msra.mxu1 %v5357_v53  ;;  %v5371_v13 = vld [vmem:[%s8789_s13 + $0x18] sm:$0xff]   ;;  %v5373_v63 = vld [vmem:[%s8783_s7 + $0x10] sm:$0xff]   ;;  %v5379_v9 = vld [vmem:[%s8789_s13 + $0x8] sm:$0xff]  }
 0x1c2   : > { %4913 = vmatprep.subr.bf16.mxu1 %v5360_v33  ;;  %v5375_v44 = vld [vmem:[%s8789_s13 + $0x10] sm:$0xff]   ;;  %v5380_v49 = vld [vmem:[%s8783_s7 + $0x40] sm:$0xff]   ;;  %v9260_v58 = vld [vmem:[#allocation33_spill] sm:$0xff] }
 0x1c3   : > { %v1542_v45 = vadd.f32 %v1526_v51, %v1492_v40  ;;  %v5382_v25 = vld [vmem:[%s8789_s13 + $0x40] sm:$0xff]   ;;  %v9261_v43 = vld [vmem:[#allocation35_spill] sm:$0xff]  ;;  %v2711_v15 = vld [vmem:[#allocation13] sm:$0x77] }
 0x1c4   : > { %1811 = vmatmul.mubr.bf16.gmra.mxu0 %v1550_v3  ;;  %v5381_v23 = vld [vmem:[%s8783_s7] sm:$0xff]   ;;  %v1586_v28 = vld [vmem:[#allocation10] sm:$0x3]  ;;  %v9263_v6 = vld [vmem:[#allocation32_spill] sm:$0xff]  ;;  %v2772_v17 = vrot.slane %v2711_v15, %v9261_v43 }
 0x1c5   : > { %1820 = vmatprep.mubr.bf16.mxu0 %v1553_v21  ;;  %v1552_v20 = vpack.c.bf16 %v1544_v50, %v1542_v45  ;;  %4992 = vmatpush3.bf16.msra.mxu0 %v5359_v46  ;;  %v5383_v61 = vld [vmem:[%s8789_s13] sm:$0xff]   ;;  %v9266_v47 = vld [vmem:[#allocation37_spill] sm:$0xff]  ;;  %v2718_v27 = vrot.slane %v2711_v15, %v9263_v6  ;;  %v7269_v21 = vrot.slane %v1586_v28, %v9263_v6  ;;  %v7278_v32 = vld [vmem:[%s8788_s12 + $0x8] sm:$0x77] }
 0x1c6   : > { %4993 = vmatprep.subr.bf16.mxu0 %v5362_v56  ;;  %4914 = vmatpush3.bf16.msra.mxu1 %v5361_v30  ;;  %v5384_v11 = vld [vmem:[#allocation15 + $0x78] sm:$0xff]   ;;  %v7241_v57 = vld [vmem:[#allocation12] sm:$0x77]  ;;  %v9268_v50 = vld [vmem:[#allocation36_spill] sm:$0xff] }
 0x1c7   : > { %4915 = vmatprep.subr.bf16.mxu1 %v5364_v48  ;;  %v2034_v8 = vrot.slane %v7241_v57, %v9260_v58  ;;  %v2084_v29 = vrot.slane %v7241_v57, %v9261_v43  ;;  %v9262_v42 = vld [vmem:[#allocation34_spill] sm:$0xff]  ;;  %v2134_v1 = vrot.slane %v7241_v57, %v9266_v47 }
 0x1c8   : > { %v2080_v0 = vrot.slane %v7241_v57, %v9262_v42  ;;  %v2712_v12 = vld [vmem:[#allocation13 + $0x8] sm:$0x77]  ;;  %v2768_v39 = vrot.slane %v2711_v15, %v9262_v42  ;;  %v3607_v33 = vrot.slane %v7278_v32, %v9262_v42  ;;  %v7310_v56 = vrot.slane %v1586_v28, %v9262_v42  ;;  %v7312_v30 = vld [vmem:[#allocation12 + $0x8] sm:$0x77] }
 0x1c9   : > { %4994 = vmatpush3.bf16.msra.mxu0 %v5363_v5  ;;  %v7250_v37 = vrot.slane %v2034_v8, %v9263_v6  ;;  %v7253_v41 = vrot.slane %v2084_v29, %v9262_v42  ;;  %v7262_v60 = vld [vmem:[%s8788_s12] sm:$0x77]  ;;  %v2919_v3 = vrot.slane %v2712_v12, %v9262_v42  ;;  %v7283_v45 = vrot.slane %v2134_v1, %v9268_v50  ;;  %v7367_v29 = vld [vmem:[%s8788_s12 + $0x10] sm:$0x77] }
 0x1ca   : > { %4995 = vmatprep.subr.bf16.mxu0 %v5366_v24  ;;  %4916 = vmatpush3.bf16.msra.mxu1 %v5365_v31  ;;  %v3460_v54 = vrot.slane %v7262_v60, %v9261_v43  ;;  %v3410_v59 = vrot.slane %v7262_v60, %v9260_v58  ;;  %v7273_v18 = vrot.slane %v2080_v0, %v9262_v42 }
 0x1cb   : > { %4917 = vmatprep.subr.bf16.mxu1 %v5368_v4  ;;  %9264 = vst [vmem:[#allocation61_spill] sm:$0xff] %v7250_v37  ;;  %9265 = vst [vmem:[#allocation64_spill] sm:$0xff] %v7253_v41  ;;  %v2046_v40 = vmul.f32 0.0, %v7250_v37  ;;  %v2096_v51 = vmul.f32 0.0, %v7253_v41  ;;  %v7289_v52 = vrot.slane %v2768_v39, %v9262_v42  ;;  %v3406_v62 = vrot.slane %v7262_v60, %v9263_v6 }
 0x1cc   : > { %1821 = vmatmul.mubr.bf16.gmra.mxu0 %v1552_v20  ;;  %9267 = vst [vmem:[#allocation62_spill] sm:$0xff] %v7273_v18  ;;  %9269 = vst [vmem:[#allocation63_spill] sm:$0xff] %v7283_v45  ;;  %v7286_v20 = vrot.slane %v2718_v27, %v9263_v6  ;;  %v3456_v16 = vrot.slane %v7262_v60, %v9262_v42  ;;  %v7297_v35 = vrot.slane %v3460_v54, %v9262_v42 }
 0x1cd   : > { %4996 = vmatpush3.bf16.msra.mxu0 %v5367_v22  ;;  %9271 = vst [vmem:[#allocation58_spill] sm:$0xff] %v7289_v52  ;;  %v7300_v19 = vrot.slane %v3410_v59, %v9263_v6  ;;  %v3510_v53 = vrot.slane %v7262_v60, %v9266_v47  ;;  %v7305_v46 = vrot.slane %v2919_v3, %v9262_v42  ;;  %v2146_v24 = vmul.f32 0.0, %v7283_v45 }
 0x1ce   : > { %4997 = vmatprep.subr.bf16.mxu0 %v5370_v10  ;;  %4918 = vmatpush3.bf16.msra.mxu1 %v5369_v2  ;;  %9270 = vst [vmem:[#allocation53_spill] sm:$0xff] %v7286_v20  ;;  %9272 = vst [vmem:[#allocation59_spill] sm:$0xff] %v7297_v35  ;;  %v2030_v5 = vrot.slane %v7241_v57, %v9263_v6  ;;  %v2112_v48 = vadd.f32 %v2096_v51, %v2046_v40  ;;  %v2095_v59 = vmul.f32 0.0, %v7273_v18 }
 0x1cf   : > { %4919 = vmatprep.subr.bf16.mxu1 %v5372_v55  ;;  %9273 = vst [vmem:[#allocation68_spill] sm:$0xff] %v7300_v19  ;;  %9274 = vst [vmem:[#allocation65_spill] sm:$0xff] %v7305_v46  ;;  %v2185_v31 = vrot.slane %v7312_v30, %v9260_v58  ;;  %v2235_v22 = vrot.slane %v7312_v30, %v9261_v43  ;;  %v7322_v4 = vrot.slane %v3406_v62, %v9263_v6 }
 0x1d0   : > { %v7325_v10 = vrot.slane %v2772_v17, %v9262_v42  ;;  %v2285_v2 = vrot.slane %v7312_v30, %v9266_v47  ;;  %v7332_v55 = vrot.slane %v3456_v16, %v9262_v42  ;;  %v3506_v28 = vrot.slane %v7262_v60, %v9268_v50 }
 0x1d1   : > { %4998 = vmatpush3.bf16.msra.mxu0 %v5371_v13  ;;  %9275 = vst [vmem:[#allocation66_spill] sm:$0xff] %v7322_v4  ;;  %v3611_v13 = vrot.slane %v7278_v32, %v9261_v43  ;;  %v3661_v1 = vrot.slane %v7278_v32, %v9266_v47  ;;  %v3762_v27 = vrot.slane %v7367_v29, %v9261_v43  ;;  %v3421_v16 = vmul.f32 0.0, %v7322_v4 }
 0x1d2   : > { %4999 = vmatprep.subr.bf16.mxu0 %v5374_v26  ;;  %4920 = vmatpush3.bf16.msra.mxu1 %v5373_v63  ;;  %9276 = vst [vmem:[#allocation74_spill] sm:$0xff] %v7325_v10  ;;  %9277 = vst [vmem:[#allocation69_spill] sm:$0xff] %v7332_v55  ;;  %v7334_v26 = vld [vmem:[#allocation12 + $0x10] sm:$0x77]  ;;  %v3422_v63 = vmul.f32 0.0, %v7300_v19  ;;  %v7362_v8 = vrot.slane %v2285_v2, %v9268_v50  ;;  %v3712_v51 = vrot.slane %v7367_v29, %v9260_v58 }
 0x1d3   : > { %4921 = vmatprep.subr.bf16.mxu1 %v5376_v14  ;;  %v7339_v14 = vrot.slane %v3510_v53, %v9268_v50  ;;  %v7372_v15 = vrot.slane %v3611_v13, %v9262_v42  ;;  %v2436_v40 = vrot.slane %v7334_v26, %v9266_v47  ;;  %v2231_v62 = vrot.slane %v7312_v30, %v9262_v42 }
 0x1d4   : > { %9281 = vst [vmem:[#allocation70_spill] sm:$0xff] %v7362_v8  ;;  %v2181_v17 = vrot.slane %v7312_v30, %v9263_v6  ;;  %v3471_v53 = vmul.f32 0.0, %v7332_v55 }
 0x1d5   : > { %5000 = vmatpush3.bf16.msra.mxu0 %v5375_v44  ;;  %v3472_v44 = vmul.f32 0.0, %v7297_v35  ;;  %9282 = vst [vmem:[#allocation71_spill] sm:$0xff] %v7372_v15  ;;  %v3522_v12 = vmul.f32 0.0, %v7339_v14 }
 0x1d6   : > { %5001 = vmatprep.subr.bf16.mxu0 %v5378_v36  ;;  %4922 = vmatpush3.bf16.msra.mxu1 %v5377_v7  ;;  %v7342_v36 = vrot.slane %v3607_v33, %v9262_v42  ;;  %v2386_v7 = vrot.slane %v7334_v26, %v9261_v43  ;;  %v7403_v33 = vrot.slane %v3506_v28, %v9268_v50 }
 0x1d7   : > { %4923 = vmatprep.subr.bf16.mxu1 %v5380_v49  ;;  %v2130_v49 = vrot.slane %v7241_v57, %v9268_v50  ;;  %v3561_v57 = vrot.slane %v7278_v32, %v9260_v58  ;;  %v3488_v0 = vadd.f32 %v3472_v44, %v3422_v63  ;;  %v2382_v63 = vrot.slane %v7334_v26, %v9262_v42 }
 0x1d8   : > { %9278 = vst [vmem:[#allocation72_spill] sm:$0xff] %v7342_v36  ;;  %v7382_v39 = vrot.slane %v2386_v7, %v9262_v42  ;;  %9284 = vst [vmem:[#allocation76_spill] sm:$0xff] %v7403_v33  ;;  %v7422_v44 = vrot.slane %v3712_v51, %v9263_v6  ;;  %v7425_v7 = vrot.slane %v2231_v62, %v9262_v42 }
 0x1d9   : > { %5002 = vmatpush3.bf16.msra.mxu0 %v5379_v9  ;;  %v7347_v9 = vrot.slane %v2030_v5, %v9263_v6  ;;  %v7387_v3 = vrot.slane %v2130_v49, %v9268_v50  ;;  %v7405_v5 = vadd.f32 %v3522_v12, %v3488_v0  ;;  %v3557_v49 = vrot.slane %v7278_v32, %v9263_v6 }
 0x1da   : > { %5003 = vmatprep.subr.bf16.mxu0 %v5382_v25  ;;  %4924 = vmatpush3.bf16.msra.mxu1 %v5381_v23  ;;  %v7351_v25 = vadd.f32 %v2146_v24, %v2112_v48  ;;  %v7354_v23 = vrot.slane %v2185_v31, %v9263_v6  ;;  %v7408_v48 = vrot.slane %v3561_v57, %v9263_v6  ;;  %v3521_v12 = vmul.f32 0.0, %v7403_v33 }
 0x1db   : > { %4949 = vmatprep.subr.bf16.mxu1 %v5384_v11  ;;  %v2336_v11 = vrot.slane %v7334_v26, %v9260_v58  ;;  %v2045_v54 = vmul.f32 0.0, %v7347_v9  ;;  %9283 = vst [vmem:[#allocation75_spill] sm:$0xff] %v7387_v3  ;;  %v7411_v24 = vrot.slane %v3661_v1, %v9268_v50  ;;  %v7414_v31 = vrot.slane %v3762_v27, %v9262_v42 }
 0x1dc   : > { %9279 = vst [vmem:[#allocation73_spill] sm:$0xff] %v7354_v23  ;;  %v2145_v13 = vmul.f32 0.0, %v7387_v3  ;;  %9285 = vst [vmem:[#allocation79_spill] sm:$0xff] %v7425_v7  ;;  %v7432_v57 = vrot.slane %v2436_v40, %v9268_v50  ;;  %v7435_v28 = vrot.slane %v2181_v17, %v9263_v6  ;;  %v3487_v0 = vadd.f32 %v3471_v53, %v3421_v16 }
 0x1dd   : > { %5004 = vmatpush3.bf16.msra.mxu0 %v5383_v61  ;;  %v7357_v61 = vrot.slane %v2235_v22, %v9262_v42  ;;  %v7390_v60 = vrot.slane %v2336_v11, %v9263_v6  ;;  %v3812_v22 = vrot.slane %v7367_v29, %v9266_v47  ;;  %v2111_v2 = vadd.f32 %v2095_v59, %v2045_v54 }
 0x1de   : > { %v3758_v11 = vrot.slane %v7367_v29, %v9262_v42  ;;  %9286 = vst [vmem:[#allocation80_spill] sm:$0xff] %v7435_v28  ;;  %v2281_v27 = vrot.slane %v7312_v30, %v9268_v50  ;;  %v2332_v54 = vrot.slane %v7334_v26, %v9263_v6  ;;  %v3657_v59 = vrot.slane %v7278_v32, %v9268_v50 }
 0x1df   : > { %9280 = vst [vmem:[#allocation110_spill] sm:$0xff] %v7357_v61  ;;  %v3708_v40 = vrot.slane %v7367_v29, %v9263_v6  ;;  %v7448_v62 = vrot.slane %v3812_v22, %v9268_v50  ;;  %v7450_v17 = vadd.f32 %v2145_v13, %v2111_v2  ;;  %v7453_v16 = vrot.slane %v2382_v63, %v9262_v42 }
 0x1e0   : > { %v2432_v53 = vrot.slane %v7334_v26, %v9268_v50  ;;  %v7458_v46 = vrot.slane %v3557_v49, %v9263_v6  ;;  %v7461_v32 = vrot.slane %v3758_v11, %v9262_v42  ;;  %v7466_v13 = vadd.f32 %v3521_v12, %v3487_v0 }
 0x1e1   : > { %9287 = vst [vmem:[#allocation78_spill] sm:$0xff] %v7450_v17  ;;  %9288 = vst [vmem:[#allocation42_spill] sm:$0xff] %v7453_v16  ;;  %v7469_v43 = vrot.slane %v2281_v27, %v9268_v50  ;;  %v7472_v26 = vrot.slane %v2332_v54, %v9263_v6  ;;  %v7475_v49 = vrot.slane %v3657_v59, %v9268_v50 }
 0x1e2   : > { %9289 = vst [vmem:[#allocation83_spill] sm:$0xff] %v7458_v46  ;;  %9290 = vst [vmem:[#allocation84_spill] sm:$0xff] %v7461_v32  ;;  %v7478_v11 = vrot.slane %v3708_v40, %v9263_v6  ;;  %v9302_v6 = vld [vmem:[#allocation88_spill] sm:$0xff]  ;;  %v9318_v46 = vld [vmem:[#allocation101_spill] sm:$0xff] }
 0x1e3   : > { %9291 = vst [vmem:[#allocation44_spill] sm:$0xff] %v7466_v13  ;;  %9292 = vst [vmem:[#allocation77_spill] sm:$0xff] %v7469_v43 }
 0x1e4   : > { %9293 = vst [vmem:[#allocation51_spill] sm:$0xff] %v7472_v26  ;;  %9294 = vst [vmem:[#allocation82_spill] sm:$0xff] %v7475_v49 }
 0x1e5   : > { %9295 = vst [vmem:[#allocation47_spill] sm:$0xff] %v7478_v11 }
 0x26d   : > { %v1792_v1 = vpop.f32.mrf.mxu0 }
 0x26e   : > { %v1793_v51 = vadd.f32 %v1792_v1, %v7269_v21  ;;  %v3808_v1 = vrot.slane %v7367_v29, %v9268_v50 }
 0x26f   : > { %v1794_v30 = vpop.f32.mrf.mxu0 }
 0x270   : > { %vm1831_vm2 = vcmp.gt.f32.partialorder %v1793_v51, 0.0  ;;  %v1847_v22 = vmul.f32 0.1, %v1793_v51  ;;  %v1795_v2 = vadd.f32 %v1794_v30, %v7310_v56  ;;  %v7486_v30 = vrot.slane %v2432_v53, %v9268_v50 }
 0x271   : > { %v1796_v63 = vpop.f32.mrf.mxu0  ;;  %v7489_v54 = vrot.slane %v3808_v1, %v9268_v50 }
 0x272   : > { %v7480_v29 = vsel %vm1831_vm2, %v1793_v51, %v1847_v22  ;;  %vm1832_vm3 = vcmp.gt.f32.partialorder %v1795_v2, 0.0  ;;  %v1848_v42 = vmul.f32 0.1, %v1795_v2  ;;  %v1797_v0 = vadd.f32 %v1796_v63, %v7269_v21  ;;  %9297 = vst [vmem:[#allocation90_spill] sm:$0xff] %v7486_v30 }
 0x273   : > { %9296 = vst [vmem:[#allocation89_spill] sm:$0xff] %v7480_v29  ;;  %v1898_v12 = vrot.slane %v7480_v29, 7  ;;  %9298 = vst [vmem:[#allocation85_spill] sm:$0xff] %v7489_v54  ;;  %v7493_v59 = vmul.f32 %v7273_v18, %v7480_v29  ;;  %v7497_v40 = vmul.f32 %v7289_v52, %v7480_v29  ;;  %v3473_v51 = vmul.f32 %v7332_v55, %v7480_v29  ;;  %v1798_v63 = vpop.f32.mrf.mxu0 }
 0x274   : > { %v7501_v22 = vsel %vm1832_vm3, %v1795_v2, %v1848_v42  ;;  %v7506_v1 = vmul.f32 %v7342_v36, %v7480_v29  ;;  %vm1833_vm4 = vcmp.gt.f32.partialorder %v1797_v0, 0.0  ;;  %v1849_v42 = vmul.f32 0.1, %v1797_v0 }
 0x275   : > { %9299 = vst [vmem:[#allocation86_spill] sm:$0xff] %v7497_v40  ;;  %9300 = vst [vmem:[#allocation81_spill] sm:$0xff] %v7501_v22  ;;  %v1944_v53 = vsel %vm883_vm0, 0.0, %v1898_v12  ;;  %v1899_v27 = vrot.slane %v7501_v22, 7  ;;  %v1965_v50 = vrot.slane %v7501_v22, 1  ;;  %v7515_v52 = vmul.f32 %v7325_v10, %v7501_v22 }
 0x276   : > { %9301 = vst [vmem:[#allocation41_spill] sm:$0xff] %v7506_v1  ;;  %v7511_v47 = vmul.f32 %v1944_v53, %v9302_v6  ;;  %v3474_v40 = vmul.f32 %v7297_v35, %v7501_v22  ;;  %v1799_v58 = vadd.f32 %v1798_v63, %v7310_v56  ;;  %v2098_v55 = vmul.f32 %v7253_v41, %v7501_v22 }
 0x277   : > { %9304 = vst [vmem:[#allocation94_spill] sm:$0xff] %v7515_v52  ;;  %v1945_v2 = vsel %vm883_vm0, 0.0, %v1899_v27  ;;  %v7528_v10 = vsel %vm1833_vm4, %v1797_v0, %v1849_v42  ;;  %v2247_v52 = vmul.f32 %v7357_v61, %v7501_v22 }
 0x278   : > { %9303 = vst [vmem:[#allocation93_spill] sm:$0xff] %v7511_v47  ;;  %v3423_v53 = vmul.f32 %v7322_v4, %v7511_v47  ;;  %v7526_v18 = vmul.f32 %v1945_v2, %v9302_v6  ;;  %9306 = vst [vmem:[#allocation45_spill] sm:$0xff] %v7528_v10  ;;  %v7534_v54 = vmul.f32 %v7286_v20, %v7511_v47  ;;  %v1900_v63 = vrot.slane %v7528_v10, 7 }
 0x279   : > { %vm1834_vm5 = vcmp.gt.f32.partialorder %v1799_v58, 0.0  ;;  %v1850_v35 = vmul.f32 0.1, %v1799_v58 }
 0x27a   : > { %9305 = vst [vmem:[#allocation56_spill] sm:$0xff] %v7526_v18  ;;  %9307 = vst [vmem:[#allocation96_spill] sm:$0xff] %v7534_v54  ;;  %v7537_v41 = vadd.f32 %v3473_v51, %v3423_v53  ;;  %v2048_v6 = vmul.f32 %v7250_v37, %v7526_v18  ;;  %v2197_v0 = vmul.f32 %v7354_v23, %v7526_v18  ;;  %v9310_v51 = vld [vmem:[#allocation87_spill] sm:$0xff] }
 0x27b   : > { %v1901_v42 = vsel %vm883_vm0, %v1898_v12, %v1900_v63  ;;  %v7545_v2 = vsel %vm1834_vm5, %v1799_v58, %v1850_v35  ;;  %v3424_v20 = vmul.f32 %v7300_v19, %v7526_v18  ;;  %v3573_v54 = vmul.f32 %v7408_v48, %v7526_v18 }
 0x27c   : > { %9308 = vst [vmem:[#allocation91_spill] sm:$0xff] %v7537_v41  ;;  %9309 = vst [vmem:[#allocation92_spill] sm:$0xff] %v7545_v2  ;;  %v7552_v53 = vmul.f32 %v1901_v42, %v9310_v51  ;;  %v1902_v4 = vrot.slane %v7545_v2, 7  ;;  %v1802_v32 = vpop.f32.mrf.mxu0  ;;  %v1966_v37 = vrot.slane %v7545_v2, 1  ;;  %v7556_v1 = vadd.f32 %v2098_v55, %v2048_v6 }
 0x27d   : > { %v1803_v12 = vadd.f32 %v1802_v32, %v7269_v21  ;;  %v2213_v58 = vadd.f32 %v2197_v0, %v7351_v25  ;;  %v7562_v35 = vmul.f32 %v7357_v61, %v7545_v2  ;;  %v7566_v18 = vmul.f32 %v7382_v39, %v7545_v2  ;;  %v9313_v61 = vld [vmem:[#allocation102_spill] sm:$0xff] }
 0x27e   : > { %9311 = vst [vmem:[#allocation97_spill] sm:$0xff] %v7552_v53  ;;  %v1903_v42 = vsel %vm883_vm0, %v1899_v27, %v1902_v4  ;;  %v1804_v19 = vpop.f32.mrf.mxu0  ;;  %v1967_v11 = vsel %vm988_vm1, %v1965_v50, %v1966_v37  ;;  %v7570_v13 = vadd.f32 %v3474_v40, %v3424_v20  ;;  %v7573_v55 = vadd.f32 %v3573_v54, %v7405_v5 }
 0x27f   : > { %v7576_v25 = vmul.f32 %v1903_v42, %v9310_v51  ;;  %vm1835_vm6 = vcmp.gt.f32.partialorder %v1803_v12, 0.0  ;;  %v1851_v32 = vmul.f32 0.1, %v1803_v12  ;;  %v1805_v6 = vadd.f32 %v1804_v19, %v7310_v56 }
 0x280   : > { %v1806_v0 = vpop.f32.mrf.mxu0  ;;  %v7580_v41 = vmul.f32 %v1967_v11, %v9313_v61  ;;  %v7582_v27 = vadd.f32 %v2247_v52, %v2213_v58  ;;  %v7586_v50 = vmul.f32 %v7372_v15, %v7501_v22  ;;  %v7590_v20 = vmul.f32 %v7372_v15, %v7545_v2 }
 0x281   : > { %9312 = vst [vmem:[#allocation103_spill] sm:$0xff] %v7576_v25  ;;  %v7592_v5 = vsel %vm1835_vm6, %v1803_v12, %v1851_v32  ;;  %vm1836_vm7 = vcmp.gt.f32.partialorder %v1805_v6, 0.0  ;;  %v1852_v54 = vmul.f32 0.1, %v1805_v6  ;;  %v1807_v19 = vadd.f32 %v1806_v0, %v7269_v21 }
 0x282   : > { %9314 = vst [vmem:[#allocation95_spill] sm:$0xff] %v7580_v41  ;;  %9315 = vst [vmem:[#allocation98_spill] sm:$0xff] %v7592_v5  ;;  %v1904_v40 = vrot.slane %v7592_v5, 7  ;;  %v1968_v11 = vrot.slane %v7592_v5, 1  ;;  %v1808_v52 = vpop.f32.mrf.mxu0  ;;  %v7599_v51 = vmul.f32 %v7283_v45, %v7580_v41  ;;  %v7603_v58 = vmul.f32 %v7354_v23, %v7576_v25 }
 0x283   : > { %v7605_v42 = vsel %vm1836_vm7, %v1805_v6, %v1852_v54  ;;  %vm1837_vm8 = vcmp.gt.f32.partialorder %v1807_v19, 0.0  ;;  %v1853_v12 = vmul.f32 0.1, %v1807_v19  ;;  %v1809_v32 = vadd.f32 %v1808_v52, %v7310_v56  ;;  %v9320_v6 = vld [vmem:[#allocation109_spill] sm:$0xff] }
 0x284   : > { %9316 = vst [vmem:[#allocation48_spill] sm:$0xff] %v7605_v42  ;;  %v1905_v0 = vsel %vm883_vm0, %v1900_v63, %v1904_v40  ;;  %v9317_v22 = vrot.slane %v7528_v10, 1  ;;  %v1906_v49 = vrot.slane %v7605_v42, 7  ;;  %v1970_v45 = vrot.slane %v7605_v42, 1  ;;  %v1812_v36 = vpop.f32.mrf.mxu0 }
 0x285   : > { %v7615_v23 = vmul.f32 %v1905_v0, %v9318_v46  ;;  %v7620_v33 = vsel %vm1837_vm8, %v1807_v19, %v1853_v12  ;;  %vm1838_vm9 = vcmp.gt.f32.partialorder %v1809_v32, 0.0  ;;  %v1854_v30 = vmul.f32 0.1, %v1809_v32 }
 0x286   : > { %v1969_v15 = vsel %vm988_vm1, %v9317_v22, %v1968_v11  ;;  %9322 = vst [vmem:[#allocation104_spill] sm:$0xff] %v7620_v33  ;;  %v1907_v63 = vsel %vm883_vm0, %v1902_v4, %v1906_v49  ;;  %v1908_v52 = vrot.slane %v7620_v33, 7  ;;  %v1972_v22 = vrot.slane %v7620_v33, 1  ;;  %v1814_v5 = vpop.f32.mrf.mxu0 }
 0x287   : > { %9319 = vst [vmem:[#allocation55_spill] sm:$0xff] %v7615_v23  ;;  %v7618_v54 = vmul.f32 %v1969_v15, %v9320_v6  ;;  %v7626_v16 = vmul.f32 %v1907_v63, %v9318_v46  ;;  %v1813_v0 = vadd.f32 %v1812_v36, %v7269_v21  ;;  %v1815_v23 = vadd.f32 %v1814_v5, %v7310_v56  ;;  %v9328_v46 = vld [vmem:[#allocation108_spill] sm:$0xff] }
 0x288   : > { %v1971_v15 = vsel %vm988_vm1, %v1966_v37, %v1970_v45  ;;  %v1909_v19 = vsel %vm883_vm0, %v1904_v40, %v1908_v52  ;;  %v1973_v12 = vsel %vm988_vm1, %v1968_v11, %v1972_v22  ;;  %v7633_v4 = vsel %vm1838_vm9, %v1809_v32, %v1854_v30  ;;  %v1816_v26 = vpop.f32.mrf.mxu0 }
 0x289   : > { %9321 = vst [vmem:[#allocation105_spill] sm:$0xff] %v7618_v54  ;;  %9323 = vst [vmem:[#allocation99_spill] sm:$0xff] %v7626_v16  ;;  %v7636_v33 = vmul.f32 %v1971_v15, %v9320_v6  ;;  %v9326_v54 = vld [vmem:[#allocation49_spill] sm:$0xff]  ;;  %v7642_v63 = vmul.f32 %v1973_v12, %v9328_v46  ;;  %v1910_v36 = vrot.slane %v7633_v4, 7  ;;  %v1974_v37 = vrot.slane %v7633_v4, 1 }
 0x28a   : > { %9324 = vst [vmem:[#allocation100_spill] sm:$0xff] %v7633_v4  ;;  %v7639_v43 = vmul.f32 %v1909_v19, %v9326_v54  ;;  %vm1839_vm10 = vcmp.gt.f32.partialorder %v1813_v0, 0.0  ;;  %v1855_v5 = vmul.f32 0.1, %v1813_v0  ;;  %vm1840_vm11 = vcmp.gt.f32.partialorder %v1815_v23, 0.0  ;;  %v1818_v30 = vpop.f32.mrf.mxu0 }
 0x28b   : > { %9325 = vst [vmem:[#allocation52_spill] sm:$0xff] %v7636_v33  ;;  %9329 = vst [vmem:[#allocation67_spill] sm:$0xff] %v7642_v63  ;;  %v1856_v40 = vmul.f32 0.1, %v1815_v23  ;;  %v1911_v11 = vsel %vm883_vm0, %v1906_v49, %v1910_v36  ;;  %v1975_v32 = vsel %vm988_vm1, %v1970_v45, %v1974_v37  ;;  %v1817_v6 = vadd.f32 %v1816_v26, %v7269_v21 }
 0x28c   : > { %9327 = vst [vmem:[#allocation106_spill] sm:$0xff] %v7639_v43  ;;  %v1819_v15 = vadd.f32 %v1818_v30, %v7310_v56  ;;  %v7651_v19 = vmul.f32 %v1911_v11, %v9326_v54  ;;  %v7654_v12 = vmul.f32 %v1975_v32, %v9328_v46  ;;  %v7656_v43 = vsel %vm1839_vm10, %v1813_v0, %v1855_v5  ;;  %v1822_v63 = vpop.f32.mrf.mxu0 }
 0x28d   : > { %9332 = vst [vmem:[#allocation60_spill] sm:$0xff] %v7656_v43  ;;  %v7658_v4 = vsel %vm1840_vm11, %v1815_v23, %v1856_v40  ;;  %v1912_v17 = vrot.slane %v7656_v43, 7  ;;  %v1976_v49 = vrot.slane %v7656_v43, 1  ;;  %vm1841_vm12 = vcmp.gt.f32.partialorder %v1817_v6, 0.0  ;;  %v9334_v40 = vld [vmem:[#allocation38_spill] sm:$0xff]  ;;  %v9336_v43 = vld [vmem:[#allocation39_spill] sm:$0xff] }
 0x28e   : > { %9330 = vst [vmem:[#allocation40_spill] sm:$0xff] %v7651_v19  ;;  %9331 = vst [vmem:[#allocation107_spill] sm:$0xff] %v7654_v12  ;;  %v1914_v45 = vrot.slane %v7658_v4, 7  ;;  %v1978_v26 = vrot.slane %v7658_v4, 1  ;;  %v1857_v30 = vmul.f32 0.1, %v1817_v6  ;;  %v1824_v11 = vpop.f32.mrf.mxu0 }
 0x28f   : > { %9333 = vst [vmem:[#allocation88_spill] sm:$0xff] %v7658_v4  ;;  %vm1842_vm13 = vcmp.gt.f32.partialorder %v1819_v15, 0.0  ;;  %v1858_v54 = vmul.f32 0.1, %v1819_v15  ;;  %v1913_v46 = vsel %vm883_vm0, %v1908_v52, %v1912_v17  ;;  %v1977_v0 = vsel %vm988_vm1, %v1972_v22, %v1976_v49 }
 0x290   : > { %v1915_v23 = vsel %vm883_vm0, %v1910_v36, %v1914_v45  ;;  %v1979_v5 = vsel %vm988_vm1, %v1974_v37, %v1978_v26  ;;  %v7669_v32 = vmul.f32 %v1913_v46, %v9334_v40  ;;  %v7672_v19 = vmul.f32 %v1977_v0, %v9336_v43  ;;  %v1826_v7 = vpop.f32.mrf.mxu0 }
 0x291   : > { %v7675_v4 = vmul.f32 %v1915_v23, %v9334_v40  ;;  %v7678_v3 = vmul.f32 %v1979_v5, %v9336_v43  ;;  %v7680_v52 = vsel %vm1841_vm12, %v1817_v6, %v1857_v30  ;;  %v7682_v22 = vsel %vm1842_vm13, %v1819_v15, %v1858_v54 }
 0x292   : > { %9335 = vst [vmem:[#allocation87_spill] sm:$0xff] %v7669_v32  ;;  %9337 = vst [vmem:[#allocation102_spill] sm:$0xff] %v7672_v19  ;;  %v1823_v36 = vadd.f32 %v1822_v63, %v7269_v21  ;;  %v1825_v37 = vadd.f32 %v1824_v11, %v7310_v56  ;;  %v1916_v46 = vrot.slane %v7680_v52, 7  ;;  %v1980_v0 = vrot.slane %v7680_v52, 1  ;;  %v1828_v6 = vpop.f32.mrf.mxu0  ;;  %v9342_v11 = vld [vmem:[#allocation57_spill] sm:$0xff] }
 0x293   : > { %9338 = vst [vmem:[#allocation101_spill] sm:$0xff] %v7675_v4  ;;  %9339 = vst [vmem:[#allocation109_spill] sm:$0xff] %v7678_v3  ;;  %v1918_v32 = vrot.slane %v7682_v22, 7  ;;  %v1982_v23 = vrot.slane %v7682_v22, 1 }
 0x294   : > { %9340 = vst [vmem:[#allocation49_spill] sm:$0xff] %v7680_v52  ;;  %9341 = vst [vmem:[#allocation108_spill] sm:$0xff] %v7682_v22  ;;  %vm1843_vm14 = vcmp.gt.f32.partialorder %v1823_v36, 0.0  ;;  %v1859_v43 = vmul.f32 0.1, %v1823_v36  ;;  %vm1844_vm15 = vcmp.gt.f32.partialorder %v1825_v37, 0.0  ;;  %v1917_v15 = vsel %vm883_vm0, %v1912_v17, %v1916_v46 }
 0x295   : > { %v1860_v5 = vmul.f32 0.1, %v1825_v37  ;;  %v1981_v30 = vsel %vm988_vm1, %v1976_v49, %v1980_v0  ;;  %v1919_v63 = vsel %vm883_vm0, %v1914_v45, %v1918_v32  ;;  %v1983_v54 = vsel %vm988_vm1, %v1978_v26, %v1982_v23  ;;  %v9344_v52 = vld [vmem:[#allocation50_spill] sm:$0xff] }
 0x296   : > { %v7695_v40 = vmul.f32 %v1917_v15, %v9342_v11  ;;  %v7698_v19 = vmul.f32 %v1981_v30, %v9344_v52  ;;  %v7701_v22 = vmul.f32 %v1919_v63, %v9342_v11  ;;  %v7704_v4 = vmul.f32 %v1983_v54, %v9344_v52 }
 0x297   : > { %v7706_v3 = vsel %vm1843_vm14, %v1823_v36, %v1859_v43  ;;  %v7708_v17 = vsel %vm1844_vm15, %v1825_v37, %v1860_v5  ;;  %v1827_v49 = vadd.f32 %v1826_v7, %v7269_v21  ;;  %v1829_v45 = vadd.f32 %v1828_v6, %v7310_v56  ;;  %v9351_v43 = vld [vmem:[#allocation43_spill] sm:$0xff]  ;;  %v9353_v6 = vld [vmem:[#allocation54_spill] sm:$0xff] }
 0x298   : > { %9343 = vst [vmem:[#allocation38_spill] sm:$0xff] %v7695_v40  ;;  %9345 = vst [vmem:[#allocation39_spill] sm:$0xff] %v7698_v19  ;;  %v1920_v26 = vrot.slane %v7706_v3, 7  ;;  %v1984_v15 = vrot.slane %v7706_v3, 1  ;;  %v1922_v30 = vrot.slane %v7708_v17, 7  ;;  %v1986_v63 = vrot.slane %v7708_v17, 1 }
 0x299   : > { %9346 = vst [vmem:[#allocation57_spill] sm:$0xff] %v7701_v22  ;;  %9347 = vst [vmem:[#allocation50_spill] sm:$0xff] %v7704_v4  ;;  %vm1845_vm2 = vcmp.gt.f32.partialorder %v1827_v49, 0.0  ;;  %v1861_v11 = vmul.f32 0.1, %v1827_v49  ;;  %vm1846_vm3 = vcmp.gt.f32.partialorder %v1829_v45, 0.0 }
 0x29a   : > { %9348 = vst [vmem:[#allocation111_spill] sm:$0xff] %v7706_v3  ;;  %9349 = vst [vmem:[#allocation112_spill] sm:$0xff] %v7708_v17  ;;  %v1862_v52 = vmul.f32 0.1, %v1829_v45  ;;  %v1921_v36 = vsel %vm883_vm0, %v1916_v46, %v1920_v26  ;;  %v1985_v37 = vsel %vm988_vm1, %v1980_v0, %v1984_v15  ;;  %v1923_v21 = vsel %vm883_vm0, %v1918_v32, %v1922_v30 }
 0x29b   : > { %v1987_v56 = vsel %vm988_vm1, %v1982_v23, %v1986_v63  ;;  %v7720_v7 = vsel %vm1845_vm2, %v1827_v49, %v1861_v11  ;;  %v7723_v5 = vmul.f32 %v1921_v36, %v9351_v43  ;;  %v7726_v54 = vmul.f32 %v1985_v37, %v9353_v6 }
 0x29c   : > { %9350 = vst [vmem:[#allocation113_spill] sm:$0xff] %v7720_v7  ;;  %v7728_v3 = vsel %vm1846_vm3, %v1829_v45, %v1862_v52  ;;  %v1924_v40 = vrot.slane %v7720_v7, 7  ;;  %v1988_v46 = vrot.slane %v7720_v7, 1  ;;  %v7734_v32 = vmul.f32 %v1923_v21, %v9351_v43  ;;  %v9359_v7 = vld [vmem:[#allocation46_spill] sm:$0xff] }
 0x29d   : > { %9352 = vst [vmem:[#allocation43_spill] sm:$0xff] %v7723_v5  ;;  %9354 = vst [vmem:[#allocation54_spill] sm:$0xff] %v7726_v54  ;;  %v1926_v0 = vrot.slane %v7728_v3, 7  ;;  %v1990_v23 = vrot.slane %v7728_v3, 1  ;;  %v7738_v49 = vmul.f32 %v1987_v56, %v9353_v6  ;;  %v2164_v11 = vadd.f32 %v7599_v51, %v7556_v1  ;;  %v9381_v54 = vld [vmem:[#allocation72_spill] sm:$0xff] }
 0x29e   : > { %9355 = vst [vmem:[#allocation114_spill] sm:$0xff] %v7728_v3  ;;  %9356 = vst [vmem:[#allocation115_spill] sm:$0xff] %v7734_v32  ;;  %v2297_v45 = vmul.f32 %v7362_v8, %v7580_v41  ;;  %v1925_v52 = vsel %vm883_vm0, %v1920_v26, %v1924_v40  ;;  %v1989_v36 = vsel %vm988_vm1, %v1984_v15, %v1988_v46  ;;  %v2008_v37 = vsel %vm988_vm1, %v1988_v46, 0.0 }
 0x29f   : > { %9357 = vst [vmem:[#allocation116_spill] sm:$0xff] %v7738_v49  ;;  %v1927_v21 = vsel %vm883_vm0, %v1922_v30, %v1926_v0  ;;  %v7749_v43 = vmul.f32 %v1925_v52, %v7044_v34  ;;  %v7752_v56 = vmul.f32 %v1989_v36, %v9359_v7  ;;  %v7755_v6 = vmul.f32 %v2008_v37, %v7022_v38 }
 0x2a0   : > { %v7758_v1 = vmul.f32 %v1927_v21, %v7044_v34  ;;  %v1991_v51 = vsel %vm988_vm1, %v1986_v63, %v1990_v23  ;;  %v2009_v40 = vsel %vm988_vm1, %v1990_v23, 0.0  ;;  %v2215_v26 = vadd.f32 %v7603_v58, %v2164_v11 }
 0x2a1   : > { %9358 = vst [vmem:[#allocation117_spill] sm:$0xff] %v7749_v43  ;;  %9360 = vst [vmem:[#allocation46_spill] sm:$0xff] %v7752_v56  ;;  %v2299_v15 = vmul.f32 %v7362_v8, %v7636_v33  ;;  %v7766_v30 = vmul.f32 %v1991_v51, %v9359_v7  ;;  %v7769_v46 = vmul.f32 %v2009_v40, %v7022_v38 }
 0x2a2   : > { %9361 = vst [vmem:[#allocation118_spill] sm:$0xff] %v7755_v6  ;;  %9362 = vst [vmem:[#allocation119_spill] sm:$0xff] %v7758_v1  ;;  %v2313_v0 = vadd.f32 %v2297_v45, %v7582_v27  ;;  %v2348_v34 = vmul.f32 %v7390_v60, %v7576_v25  ;;  %v2265_v63 = vadd.f32 %v7562_v35, %v2215_v26 }
 0x2a3   : > { %9363 = vst [vmem:[#allocation120_spill] sm:$0xff] %v7766_v30  ;;  %9364 = vst [vmem:[#allocation121_spill] sm:$0xff] %v7769_v46  ;;  %v2350_v23 = vmul.f32 %v7390_v60, %v7626_v16  ;;  %v2400_v58 = vmul.f32 %v7382_v39, %v7605_v42  ;;  %v2448_v7 = vmul.f32 %v7432_v57, %v7636_v33  ;;  %v9371_v46 = vld [vmem:[#allocation77_spill] sm:$0xff] }
 0x2a4   : > { %v2364_v11 = vadd.f32 %v2348_v34, %v2313_v0  ;;  %v2450_v38 = vmul.f32 %v7432_v57, %v7654_v12  ;;  %v3524_v27 = vmul.f32 %v7339_v14, %v7580_v41  ;;  %v3575_v45 = vmul.f32 %v7408_v48, %v7576_v25 }
 0x2a5   : > { %v2315_v35 = vadd.f32 %v2299_v15, %v2265_v63  ;;  %v3639_v52 = vadd.f32 %v7586_v50, %v7573_v55  ;;  %v3673_v36 = vmul.f32 %v7411_v24, %v7580_v41  ;;  %v3675_v37 = vmul.f32 %v7411_v24, %v7636_v33 }
 0x2a6   : > { %v2414_v21 = vadd.f32 %v7566_v18, %v2364_v11  ;;  %v3540_v51 = vadd.f32 %v3524_v27, %v7570_v13  ;;  %v3724_v40 = vmul.f32 %v7422_v44, %v7576_v25  ;;  %v3726_v26 = vmul.f32 %v7422_v44, %v7626_v16 }
 0x2a7   : > { %v2366_v15 = vadd.f32 %v2350_v23, %v2315_v35  ;;  %v3689_v0 = vadd.f32 %v3673_v36, %v3639_v52  ;;  %v3774_v55 = vmul.f32 %v7414_v31, %v7545_v2  ;;  %v3776_v50 = vmul.f32 %v7414_v31, %v7605_v42 }
 0x2a8   : > { %v2464_v34 = vadd.f32 %v2448_v7, %v2414_v21  ;;  %v3591_v63 = vadd.f32 %v3575_v45, %v3540_v51  ;;  %v3824_v18 = vmul.f32 %v7448_v62, %v7636_v33  ;;  %v3826_v13 = vmul.f32 %v7448_v62, %v7654_v12 }
 0x2a9   : > { %v2416_v11 = vadd.f32 %v2400_v58, %v2366_v15  ;;  %v3740_v27 = vadd.f32 %v3724_v40, %v3689_v0  ;;  %v9365_v41 = vrot.slane %v7528_v10, 1  ;;  %v9366_v23 = vrot.slane %v7480_v29, 1 }
 0x2aa   : > { %v2047_v52 = vmul.f32 %v7347_v9, %v7511_v47  ;;  %v3641_v7 = vadd.f32 %v7590_v20, %v3591_v63  ;;  %v2196_v36 = vmul.f32 %v7435_v28, %v7511_v47  ;;  %v2198_v58 = vmul.f32 %v7435_v28, %v7552_v53  ;;  %v9370_v63 = vld [vmem:[#allocation78_spill] sm:$0xff] }
 0x2ab   : > { %v1964_v35 = vsel %vm988_vm1, %v9366_v23, %v9365_v41  ;;  %v2466_v21 = vadd.f32 %v2450_v38, %v2416_v11  ;;  %v3790_v51 = vadd.f32 %v3774_v55, %v3740_v27  ;;  %v9368_v41 = vld [vmem:[#allocation79_spill] sm:$0xff]  ;;  %v9372_v55 = vld [vmem:[#allocation105_spill] sm:$0xff]  ;;  %v3624_v30 = vmul.f32 %v9381_v54, %v7528_v10 }
 0x2ac   : > { %v7816_v45 = vmul.f32 %v1964_v35, %v9313_v61  ;;  %v2113_v40 = vadd.f32 %v7493_v59, %v2047_v52  ;;  %v2246_v15 = vmul.f32 %v9368_v41, %v7480_v29  ;;  %v3691_v0 = vadd.f32 %v3675_v37, %v3641_v7  ;;  %v9369_v23 = vld [vmem:[#allocation75_spill] sm:$0xff] }
 0x2ad   : > { %v2212_v61 = vadd.f32 %v2196_v36, %v9370_v63  ;;  %v2248_v35 = vmul.f32 %v9368_v41, %v7528_v10  ;;  %v2480_v6 = vpack.c.bf16 %v2466_v21, %v2464_v34  ;;  %v3840_v43 = vadd.f32 %v3824_v18, %v3790_v51  ;;  %v9373_v37 = vld [vmem:[#allocation51_spill] sm:$0xff]  ;;  %v9375_v63 = vld [vmem:[#allocation42_spill] sm:$0xff] }
 0x2ae   : > { %9367 = vst [vmem:[#allocation122_spill] sm:$0xff] %v7816_v45  ;;  %v2147_v20 = vmul.f32 %v9369_v23, %v7816_v45  ;;  %v2296_v38 = vmul.f32 %v9371_v46, %v7816_v45  ;;  %v2298_v59 = vmul.f32 %v9371_v46, %v9372_v55  ;;  %v3742_v11 = vadd.f32 %v3726_v26, %v3691_v0  ;;  %v9374_v29 = vld [vmem:[#allocation55_spill] sm:$0xff]  ;;  %v9376_v18 = vld [vmem:[#allocation98_spill] sm:$0xff] }
 0x2af   : > { %v2262_v52 = vadd.f32 %v2246_v15, %v2212_v61  ;;  %v2347_v7 = vmul.f32 %v9373_v37, %v7552_v53  ;;  %2654 = vmatprep.mubr.bf16.mxu1 %v2480_v6  ;;  %v2349_v36 = vmul.f32 %v9373_v37, %v9374_v29  ;;  %v2397_v34 = vmul.f32 %v9375_v63, %v7528_v10  ;;  %v9377_v51 = vld [vmem:[#allocation90_spill] sm:$0xff]  ;;  %v9378_v15 = vld [vmem:[#allocation67_spill] sm:$0xff]  ;;  %v9379_v6 = vld [vmem:[#allocation76_spill] sm:$0xff] }
 0x2b0   : > { %v2163_v27 = vadd.f32 %v2147_v20, %v2113_v40  ;;  %v2399_v21 = vmul.f32 %v9375_v63, %v9376_v18  ;;  %v2447_v3 = vmul.f32 %v9377_v51, %v9372_v55  ;;  %v3792_v1 = vadd.f32 %v3776_v50, %v3742_v11  ;;  %v9380_v61 = vld [vmem:[#allocation83_spill] sm:$0xff] }
 0x2b1   : > { %v2312_v40 = vadd.f32 %v2296_v38, %v2262_v52  ;;  %v2449_v0 = vmul.f32 %v9377_v51, %v9378_v15  ;;  %v3523_v20 = vmul.f32 %v9379_v6, %v7816_v45  ;;  %v3572_v56 = vmul.f32 %v9380_v61, %v7511_v47  ;;  %v9383_v11 = vld [vmem:[#allocation91_spill] sm:$0xff]  ;;  %v9384_v52 = vld [vmem:[#allocation44_spill] sm:$0xff] }
 0x2b2   : > { %v2214_v26 = vadd.f32 %v2198_v58, %v2163_v27  ;;  %v3574_v5 = vmul.f32 %v9380_v61, %v7552_v53  ;;  %v3842_v17 = vadd.f32 %v3826_v13, %v3792_v1  ;;  %v9382_v58 = vld [vmem:[#allocation82_spill] sm:$0xff]  ;;  %v9385_v47 = vld [vmem:[#allocation47_spill] sm:$0xff] }
 0x2b3   : > { %v2363_v50 = vadd.f32 %v2347_v7, %v2312_v40  ;;  %v3672_v38 = vmul.f32 %v9382_v58, %v7816_v45  ;;  %v3539_v27 = vadd.f32 %v3523_v20, %v9383_v11  ;;  %v3588_v49 = vadd.f32 %v3572_v56, %v9384_v52  ;;  %v9388_v52 = vld [vmem:[#allocation85_spill] sm:$0xff] }
 0x2b4   : > { %v2264_v32 = vadd.f32 %v2248_v35, %v2214_v26  ;;  %v3674_v22 = vmul.f32 %v9382_v58, %v9372_v55  ;;  %v3723_v19 = vmul.f32 %v9385_v47, %v7552_v53  ;;  %v3856_v61 = vpack.c.bf16 %v3842_v17, %v3840_v43  ;;  %v9386_v35 = vld [vmem:[#allocation41_spill] sm:$0xff]  ;;  %v9387_v26 = vld [vmem:[#allocation84_spill] sm:$0xff] }
 0x2b5   : > { %v2413_v51 = vadd.f32 %v2397_v34, %v2363_v50  ;;  %v3725_v1 = vmul.f32 %v9385_v47, %v9374_v29  ;;  %v3590_v13 = vadd.f32 %v3574_v5, %v3539_v27  ;;  %v3638_v7 = vadd.f32 %v9386_v35, %v3588_v49  ;;  %v9389_v5 = vld [vmem:[#allocation61_spill] sm:$0xff]  ;;  %v9390_v27 = vld [vmem:[#allocation64_spill] sm:$0xff]  ;;  %v9394_v47 = vld [vmem:[#allocation110_spill] sm:$0xff] }
 0x2b6   : > { %v2314_v6 = vadd.f32 %v2298_v59, %v2264_v32  ;;  %v3773_v40 = vmul.f32 %v9387_v26, %v7528_v10  ;;  %v3775_v56 = vmul.f32 %v9387_v26, %v9376_v18  ;;  %4030 = vmatprep.mubr.bf16.mxu0 %v3856_v61  ;;  %v3823_v17 = vmul.f32 %v9388_v52, %v9372_v55 }
 0x2b7   : > { %v2463_v11 = vadd.f32 %v2447_v3, %v2413_v51  ;;  %v3825_v32 = vmul.f32 %v9388_v52, %v9378_v15  ;;  %v3640_v43 = vadd.f32 %v3624_v30, %v3590_v13  ;;  %v3688_v59 = vadd.f32 %v3672_v38, %v3638_v7  ;;  %v9392_v38 = vld [vmem:[#allocation73_spill] sm:$0xff]  ;;  %v5385_v52 = vld [vmem:[#allocation15 + $0x38] sm:$0xff]  }
 0x2b8   : > { %v2365_v20 = vadd.f32 %v2349_v36, %v2314_v6  ;;  %v2050_v49 = vmul.f32 %v9389_v5, %v7576_v25  ;;  %v2052_v34 = vmul.f32 %v9389_v5, %v7626_v16  ;;  %v2100_v61 = vmul.f32 %v9390_v27, %v7545_v2  ;;  %v9391_v36 = vld [vmem:[#allocation63_spill] sm:$0xff] }
 0x2b9   : > { %v2102_v3 = vmul.f32 %v9390_v27, %v7605_v42  ;;  %v2150_v51 = vmul.f32 %v9391_v36, %v7636_v33  ;;  %v3690_v6 = vadd.f32 %v3674_v22, %v3640_v43  ;;  %v3739_v35 = vadd.f32 %v3723_v19, %v3688_v59  ;;  %v9395_v22 = vld [vmem:[#allocation100_spill] sm:$0xff]  ;;  %v5386_v59 = vld [vmem:[#allocation15 + $0x70] sm:$0xff]  }
 0x2ba   : > { %v2415_v50 = vadd.f32 %v2399_v21, %v2365_v20  ;;  %v2152_v30 = vmul.f32 %v9391_v36, %v7654_v12  ;;  %v2201_v13 = vmul.f32 %v9392_v38, %v7626_v16  ;;  %v2116_v45 = vadd.f32 %v2100_v61, %v2050_v49  ;;  %v9393_v20 = vld [vmem:[#allocation40_spill] sm:$0xff] }
 0x2bb   : > { %v2118_v21 = vadd.f32 %v2102_v3, %v2052_v34  ;;  %v2203_v5 = vmul.f32 %v9392_v38, %v9393_v20  ;;  %v3741_v26 = vadd.f32 %v3725_v1, %v3690_v6  ;;  %v3789_v27 = vadd.f32 %v3773_v40, %v3739_v35  ;;  %v9397_v6 = vld [vmem:[#allocation101_spill] sm:$0xff] }
 0x2bc   : > { %v2465_v7 = vadd.f32 %v2449_v0, %v2415_v50  ;;  %v2251_v58 = vmul.f32 %v9394_v47, %v7605_v42  ;;  %v2253_v19 = vmul.f32 %v9394_v47, %v9395_v22  ;;  %v2166_v36 = vadd.f32 %v2150_v51, %v2116_v45  ;;  %v9396_v50 = vld [vmem:[#allocation109_spill] sm:$0xff] }
 0x2bd   : > { %v2168_v54 = vadd.f32 %v2152_v30, %v2118_v21  ;;  %v2301_v0 = vmul.f32 %v7362_v8, %v7654_v12  ;;  %v3791_v49 = vadd.f32 %v3775_v56, %v3741_v26  ;;  %v3839_v34 = vadd.f32 %v3823_v17, %v3789_v27  ;;  %v5387_v35 = vld [vmem:[#allocation15 + $0x30] sm:$0xff]   ;;  %v9398_v26 = vld [vmem:[#allocation88_spill] sm:$0xff] }
 0x2be   : > { %v2479_v43 = vpack.c.bf16 %v2465_v7, %v2463_v11  ;;  %v2303_v61 = vmul.f32 %v7362_v8, %v9396_v50  ;;  %v2352_v1 = vmul.f32 %v7390_v60, %v9393_v20  ;;  %v2217_v40 = vadd.f32 %v2201_v13, %v2166_v36  ;;  %v5388_v36 = vld [vmem:[#allocation15 + $0x68] sm:$0xff]   ;;  %v9400_v7 = vld [vmem:[#allocation59_spill] sm:$0xff] }
 0x2bf   : > { %v2219_v3 = vadd.f32 %v2203_v5, %v2168_v54  ;;  %v2354_v11 = vmul.f32 %v7390_v60, %v9397_v6  ;;  %v2402_v45 = vmul.f32 %v7382_v39, %v9395_v22  ;;  %v3841_v51 = vadd.f32 %v3825_v32, %v3791_v49  ;;  %v9399_v30 = vld [vmem:[#allocation68_spill] sm:$0xff] }
 0x2c0   : > { %2655 = vmatmul.mubr.bf16.vlgmr.msra.gmra.mxu1 %v2479_v43  ;;  %v2404_v56 = vmul.f32 %v7382_v39, %v9398_v26  ;;  %v2452_v17 = vmul.f32 %v7432_v57, %v9396_v50  ;;  %v2454_v27 = vmul.f32 %v7432_v57, %v7704_v4  ;;  %v2267_v54 = vadd.f32 %v2251_v58, %v2217_v40 }
 0x2c1   : > { %4950 = vmatpush3.bf16.msra.mxu1 %v5385_v52  ;;  %v2269_v5 = vadd.f32 %v2253_v19, %v2219_v3  ;;  %v3426_v13 = vmul.f32 %v9399_v30, %v7576_v25  ;;  %v3428_v52 = vmul.f32 %v9399_v30, %v7626_v16  ;;  %v3855_v32 = vpack.c.bf16 %v3841_v51, %v3839_v34 }
 0x2c2   : > { %4951 = vmatprep.subr.bf16.mxu1 %v5386_v59  ;;  %v3476_v21 = vmul.f32 %v9400_v7, %v7545_v2  ;;  %v3478_v43 = vmul.f32 %v9400_v7, %v7605_v42  ;;  %v3526_v49 = vmul.f32 %v7339_v14, %v7636_v33  ;;  %v2317_v59 = vadd.f32 %v2301_v0, %v2267_v54  ;;  %v5389_v2 = vld [vmem:[#allocation15 + $0x28] sm:$0xff]   ;;  %v9401_v0 = vld [vmem:[#allocation71_spill] sm:$0xff] }
 0x2c3   : > { %v2319_v58 = vadd.f32 %v2303_v61, %v2269_v5  ;;  %v3528_v19 = vmul.f32 %v7339_v14, %v7654_v12  ;;  %v3577_v40 = vmul.f32 %v7408_v48, %v7626_v16  ;;  %4031 = vmatmul.mubr.bf16.vlgmr.msra.gmra.mxu0 %v3855_v32  ;;  %v3579_v51 = vmul.f32 %v7408_v48, %v9393_v20  ;;  %v5390_v54 = vld [vmem:[#allocation15 + $0x60] sm:$0xff]  }
 0x2c4   : > { %v3492_v34 = vadd.f32 %v3476_v21, %v3426_v13  ;;  %v3494_v3 = vadd.f32 %v3478_v43, %v3428_v52  ;;  %v2368_v25 = vadd.f32 %v2352_v1, %v2317_v59  ;;  %v3627_v61 = vmul.f32 %v9401_v0, %v7605_v42  ;;  %v5391_v59 = vld [vmem:[#allocation15 + $0x20] sm:$0xff]  }
 0x2c5   : > { %4952 = vmatpush3.bf16.msra.mxu1 %v5387_v35  ;;  %v2370_v7 = vadd.f32 %v2354_v11, %v2319_v58  ;;  %v7928_v5 = vmul.f32 0.0, %v7390_v60  ;;  %v3629_v35 = vmul.f32 %v9401_v0, %v9395_v22  ;;  %v3677_v13 = vmul.f32 %v7411_v24, %v7654_v12  ;;  %v5394_v12 = vld [vmem:[#allocation15 + $0x50] sm:$0xff]  }
 0x2c6   : > { %4953 = vmatprep.subr.bf16.mxu1 %v5388_v36  ;;  %v3542_v33 = vadd.f32 %v3526_v49, %v3492_v34  ;;  %v3544_v16 = vadd.f32 %v3528_v19, %v3494_v3  ;;  %v2418_v52 = vadd.f32 %v2402_v45, %v2368_v25  ;;  %v3679_v1 = vmul.f32 %v7411_v24, %v9396_v50 }
 0x2c7   : > { %9402 = vst [vmem:[#allocation78_spill] sm:$0xff] %v7928_v5  ;;  %v2420_v32 = vadd.f32 %v2404_v56, %v2370_v7  ;;  %v3728_v11 = vmul.f32 %v7422_v44, %v9393_v20  ;;  %v3730_v43 = vmul.f32 %v7422_v44, %v9397_v6  ;;  %v3778_v49 = vmul.f32 %v7414_v31, %v9395_v22 }
 0x2c8   : > { %v3593_v36 = vadd.f32 %v3577_v40, %v3542_v33  ;;  %v3595_v21 = vadd.f32 %v3579_v51, %v3544_v16  ;;  %v2468_v58 = vadd.f32 %v2452_v17, %v2418_v52  ;;  %v3780_v25 = vmul.f32 %v7414_v31, %v9398_v26  ;;  %v5392_v40 = vld [vmem:[#allocation15 + $0x58] sm:$0xff]  }
 0x2c9   : > { %4954 = vmatpush3.bf16.msra.mxu1 %v5389_v2  ;;  %v2470_v19 = vadd.f32 %v2454_v27, %v2420_v32  ;;  %v3828_v45 = vmul.f32 %v7448_v62, %v9396_v50  ;;  %v2049_v16 = vmul.f32 %v7347_v9, %v7552_v53  ;;  %v2051_v7 = vmul.f32 %v7347_v9, %v9374_v29  ;;  %v9403_v17 = vld [vmem:[#allocation62_spill] sm:$0xff] }
 0x2ca   : > { %4955 = vmatprep.subr.bf16.mxu1 %v5390_v54  ;;  %v3643_v56 = vadd.f32 %v3627_v61, %v3593_v36  ;;  %v3645_v33 = vadd.f32 %v3629_v35, %v3595_v21  ;;  %v2099_v27 = vmul.f32 %v9403_v17, %v7528_v10  ;;  %v2101_v34 = vmul.f32 %v9403_v17, %v9376_v18  ;;  %v5393_v52 = vld [vmem:[#allocation15 + $0x18] sm:$0xff]  }
 0x2cb   : > { %v2482_v2 = vpack.c.bf16 %v2470_v19, %v2468_v58  ;;  %v2149_v3 = vmul.f32 %v9369_v23, %v9372_v55  ;;  %v3830_v54 = vmul.f32 %v7448_v62, %v7704_v4  ;;  %v2151_v35 = vmul.f32 %v9369_v23, %v9378_v15  ;;  %v9404_v58 = vld [vmem:[#allocation106_spill] sm:$0xff] }
 0x2cc   : > { %v3693_v51 = vadd.f32 %v3677_v13, %v3643_v56  ;;  %v3695_v61 = vadd.f32 %v3679_v1, %v3645_v33  ;;  %v2115_v32 = vadd.f32 %v2099_v27, %v2049_v16  ;;  %v2117_v36 = vadd.f32 %v2101_v34, %v2051_v7  ;;  %v9405_v33 = vld [vmem:[#allocation104_spill] sm:$0xff]  ;;  %v9406_v7 = vld [vmem:[#allocation102_spill] sm:$0xff] }
 0x2cd   : > { %4956 = vmatpush3.bf16.msra.mxu1 %v5391_v59  ;;  %2662 = vmatprep.mubr.bf16.mxu1 %v2482_v2  ;;  %v2200_v21 = vmul.f32 %v7435_v28, %v9374_v29  ;;  %v2202_v19 = vmul.f32 %v7435_v28, %v9404_v58  ;;  %v2250_v56 = vmul.f32 %v9368_v41, %v9376_v18 }
 0x2ce   : > { %v3744_v13 = vadd.f32 %v3728_v11, %v3693_v51  ;;  %v3746_v1 = vadd.f32 %v3730_v43, %v3695_v61  ;;  %v2252_v42 = vmul.f32 %v9368_v41, %v9405_v33  ;;  %4957 = vmatprep.subr.bf16.mxu1 %v5392_v40  ;;  %v2165_v59 = vadd.f32 %v2149_v3, %v2115_v32  ;;  %v9407_v43 = vld [vmem:[#allocation87_spill] sm:$0xff]  ;;  %v5395_v61 = vld [vmem:[#allocation15 + $0x10] sm:$0xff]  }
 0x2cf   : > { %v2167_v2 = vadd.f32 %v2151_v35, %v2117_v36  ;;  %v2300_v16 = vmul.f32 %v9371_v46, %v9378_v15  ;;  %v2302_v27 = vmul.f32 %v9371_v46, %v9406_v7  ;;  %v2351_v11 = vmul.f32 %v9373_v37, %v9404_v58  ;;  %v9408_v35 = vld [vmem:[#allocation60_spill] sm:$0xff]  ;;  %v9410_v46 = vld [vmem:[#allocation66_spill] sm:$0xff] }
 0x2d0   : > { %v3794_v34 = vadd.f32 %v3778_v49, %v3744_v13  ;;  %v3796_v5 = vadd.f32 %v3780_v25, %v3746_v1  ;;  %v2353_v51 = vmul.f32 %v9373_v37, %v9407_v43  ;;  %v2216_v41 = vadd.f32 %v2200_v21, %v2165_v59  ;;  %v5396_v36 = vld [vmem:[#allocation15 + $0x48] sm:$0xff]   ;;  %v9409_v13 = vld [vmem:[#allocation90_spill] sm:$0xff] }
 0x2d1   : > { %4958 = vmatpush3.bf16.msra.mxu1 %v5393_v52  ;;  %v2218_v40 = vadd.f32 %v2202_v19, %v2167_v2  ;;  %v2401_v3 = vmul.f32 %v9375_v63, %v9405_v33  ;;  %v2403_v32 = vmul.f32 %v9375_v63, %v9408_v35  ;;  %v2451_v1 = vmul.f32 %v9409_v13, %v9406_v7  ;;  %v9411_v19 = vld [vmem:[#allocation69_spill] sm:$0xff] }
 0x2d2   : > { %4959 = vmatprep.subr.bf16.mxu1 %v5394_v12  ;;  %v3844_v49 = vadd.f32 %v3828_v45, %v3794_v34  ;;  %v3846_v25 = vadd.f32 %v3830_v54, %v3796_v5  ;;  %v3425_v37 = vmul.f32 %v9410_v46, %v7552_v53  ;;  %v2266_v52 = vadd.f32 %v2250_v56, %v2216_v41  ;;  %v9412_v5 = vld [vmem:[#allocation76_spill] sm:$0xff]  ;;  %v9413_v56 = vld [vmem:[#allocation39_spill] sm:$0xff] }
 0x2d3   : > { %v2268_v28 = vadd.f32 %v2252_v42, %v2218_v40  ;;  %v3427_v21 = vmul.f32 %v9410_v46, %v9374_v29  ;;  %v3475_v59 = vmul.f32 %v9411_v19, %v7528_v10  ;;  %v3477_v12 = vmul.f32 %v9411_v19, %v9376_v18  ;;  %v5397_v34 = vld [vmem:[#allocation15 + $0x8] sm:$0xff]   ;;  %v5398_v10 = vld [vmem:[#allocation15 + $0x40] sm:$0xff]  }
 0x2d4   : > { %v3858_v2 = vpack.c.bf16 %v3846_v25, %v3844_v49  ;;  %v3525_v45 = vmul.f32 %v9412_v5, %v9372_v55  ;;  %v3527_v54 = vmul.f32 %v9412_v5, %v9378_v15  ;;  %v2316_v41 = vadd.f32 %v2300_v16, %v2266_v52  ;;  %v9414_v25 = vld [vmem:[#allocation83_spill] sm:$0xff]  ;;  %v9415_v5 = vld [vmem:[#allocation72_spill] sm:$0xff] }
 0x2d5   : > { %4960 = vmatpush3.bf16.msra.mxu1 %v5395_v61  ;;  %v2318_v42 = vadd.f32 %v2302_v27, %v2268_v28  ;;  %v2453_v40 = vmul.f32 %v9409_v13, %v9413_v56  ;;  %v3491_v53 = vadd.f32 %v3475_v59, %v3425_v37  ;;  %v3493_v49 = vadd.f32 %v3477_v12, %v3427_v21  ;;  %v9417_v59 = vld [vmem:[#allocation47_spill] sm:$0xff] }
 0x2d6   : > { %4961 = vmatprep.subr.bf16.mxu1 %v5396_v36  ;;  %4038 = vmatprep.mubr.bf16.mxu0 %v3858_v2  ;;  %v3576_v19 = vmul.f32 %v9414_v25, %v9374_v29  ;;  %v3578_v55 = vmul.f32 %v9414_v25, %v9404_v58  ;;  %v3626_v61 = vmul.f32 %v9415_v5, %v9376_v18  ;;  %v9416_v36 = vld [vmem:[#allocation82_spill] sm:$0xff]  ;;  %v5399_v12 = vld [vmem:[#allocation15] sm:$0xff]  }
 0x2d7   : > { %v2367_v46 = vadd.f32 %v2351_v11, %v2316_v41  ;;  %v2369_v16 = vadd.f32 %v2353_v51, %v2318_v42  ;;  %v3541_v28 = vadd.f32 %v3525_v45, %v3491_v53  ;;  %v3628_v27 = vmul.f32 %v9415_v5, %v9405_v33  ;;  %v9418_v45 = vld [vmem:[#allocation84_spill] sm:$0xff]  ;;  %v9419_v42 = vld [vmem:[#allocation85_spill] sm:$0xff] }
 0x2d8   : > { %v3543_v37 = vadd.f32 %v3527_v54, %v3493_v49  ;;  %v3676_v52 = vmul.f32 %v9416_v36, %v9378_v15  ;;  %v3678_v21 = vmul.f32 %v9416_v36, %v9406_v7  ;;  %v3727_v2 = vmul.f32 %v9417_v59, %v9404_v58 }
 0x2d9   : > { %4962 = vmatpush3.bf16.msra.mxu1 %v5397_v34  ;;  %v2417_v29 = vadd.f32 %v2401_v3, %v2367_v46  ;;  %v2419_v18 = vadd.f32 %v2403_v32, %v2369_v16  ;;  %v3592_v11 = vadd.f32 %v3576_v19, %v3541_v28  ;;  %v3729_v53 = vmul.f32 %v9417_v59, %v9407_v43  ;;  %v9420_v46 = vld [vmem:[#allocation61_spill] sm:$0xff] }
 0x2da   : > { %4963 = vmatprep.subr.bf16.mxu1 %v5398_v10  ;;  %v3594_v51 = vadd.f32 %v3578_v55, %v3543_v37  ;;  %v3777_v54 = vmul.f32 %v9418_v45, %v9405_v33  ;;  %v3779_v41 = vmul.f32 %v9418_v45, %v9408_v35  ;;  %v3827_v49 = vmul.f32 %v9419_v42, %v9406_v7  ;;  %v9421_v55 = vld [vmem:[#allocation64_spill] sm:$0xff] }
 0x2db   : > { %v2467_v15 = vadd.f32 %v2451_v1, %v2417_v29  ;;  %v2469_v34 = vadd.f32 %v2453_v40, %v2419_v18  ;;  %v3642_v36 = vadd.f32 %v3626_v61, %v3592_v11  ;;  %v2054_v3 = vmul.f32 %v9420_v46, %v9393_v20  ;;  %v9422_v29 = vld [vmem:[#allocation63_spill] sm:$0xff] }
 0x2dc   : > { %v3644_v32 = vadd.f32 %v3628_v27, %v3594_v51  ;;  %v2056_v10 = vmul.f32 %v9420_v46, %v9397_v6  ;;  %v2104_v19 = vmul.f32 %v9421_v55, %v9395_v22  ;;  %v2106_v16 = vmul.f32 %v9421_v55, %v9398_v26 }
 0x2dd   : > { %4964 = vmatpush3.bf16.msra.mxu1 %v5399_v12  ;;  %v2481_v28 = vpack.c.bf16 %v2469_v34, %v2467_v15  ;;  %v3692_v37 = vadd.f32 %v3676_v52, %v3642_v36  ;;  %v2154_v18 = vmul.f32 %v9422_v29, %v9396_v50  ;;  %v2156_v1 = vmul.f32 %v9422_v29, %v7704_v4  ;;  %v9423_v12 = vld [vmem:[#allocation57_spill] sm:$0xff] }
 0x2de   : > { %v3694_v40 = vadd.f32 %v3678_v21, %v3644_v32  ;;  %v3829_v61 = vmul.f32 %v9419_v42, %v9413_v56  ;;  %v2120_v27 = vadd.f32 %v2104_v19, %v2054_v3  ;;  %v2122_v11 = vadd.f32 %v2106_v16, %v2056_v10  ;;  %v9424_v21 = vld [vmem:[#allocation108_spill] sm:$0xff] }
 0x2df   : > { %2663 = vmatmul.mubr.bf16.gmra.mxu1 %v2481_v28  ;;  %v3743_v51 = vadd.f32 %v3727_v2, %v3692_v37  ;;  %v2205_v55 = vmul.f32 %v9392_v38, %v9397_v6  ;;  %v2207_v15 = vmul.f32 %v9392_v38, %v9423_v12  ;;  %v2255_v36 = vmul.f32 %v9394_v47, %v9398_v26  ;;  %v9425_v2 = vld [vmem:[#allocation116_spill] sm:$0xff]  ;;  %v9426_v38 = vld [vmem:[#allocation115_spill] sm:$0xff] }
 0x2e0   : > { %v3745_v52 = vadd.f32 %v3729_v53, %v3694_v40  ;;  %v2170_v34 = vadd.f32 %v2154_v18, %v2120_v27  ;;  %v2172_v29 = vadd.f32 %v2156_v1, %v2122_v11  ;;  %v2257_v32 = vmul.f32 %v9394_v47, %v9424_v21 }
 0x2e1   : > { %v3793_v46 = vadd.f32 %v3777_v54, %v3743_v51  ;;  %v2305_v3 = vmul.f32 %v7362_v8, %v7704_v4  ;;  %v2307_v10 = vmul.f32 %v7362_v8, %v9425_v2  ;;  %v2356_v19 = vmul.f32 %v7390_v60, %v9423_v12  ;;  %v9427_v54 = vld [vmem:[#allocation112_spill] sm:$0xff] }
 0x2e2   : > { %v3795_v16 = vadd.f32 %v3779_v41, %v3745_v52  ;;  %v2221_v28 = vadd.f32 %v2205_v55, %v2170_v34  ;;  %v2223_v37 = vadd.f32 %v2207_v15, %v2172_v29  ;;  %v2358_v53 = vmul.f32 %v7390_v60, %v9426_v38 }
 0x2e3   : > { %v3843_v18 = vadd.f32 %v3827_v49, %v3793_v46  ;;  %v2406_v1 = vmul.f32 %v7382_v39, %v9424_v21  ;;  %v2408_v40 = vmul.f32 %v7382_v39, %v9427_v54  ;;  %v2456_v27 = vmul.f32 %v7432_v57, %v9425_v2  ;;  %v9428_v49 = vld [vmem:[#allocation59_spill] sm:$0xff] }
 0x2e4   : > { %v3845_v11 = vadd.f32 %v3829_v61, %v3795_v16  ;;  %v2271_v51 = vadd.f32 %v2255_v36, %v2221_v28  ;;  %v2273_v8 = vadd.f32 %v2257_v32, %v2223_v37  ;;  %v3430_v41 = vmul.f32 %v9399_v30, %v9393_v20  ;;  %v9429_v32 = vld [vmem:[#allocation120_spill] sm:$0xff] }
 0x2e5   : > { %v3432_v55 = vmul.f32 %v9399_v30, %v9397_v6  ;;  %v3480_v46 = vmul.f32 %v9428_v49, %v9395_v22  ;;  %v3482_v29 = vmul.f32 %v9428_v49, %v9398_v26  ;;  %v3530_v15 = vmul.f32 %v7339_v14, %v9396_v50 }
 0x2e6   : > { %v3857_v52 = vpack.c.bf16 %v3845_v11, %v3843_v18  ;;  %v2321_v34 = vadd.f32 %v2305_v3, %v2271_v51  ;;  %v2323_v61 = vadd.f32 %v2307_v10, %v2273_v8  ;;  %v3532_v36 = vmul.f32 %v7339_v14, %v7704_v4 }
 0x2e7   : > { %v2458_v16 = vmul.f32 %v7432_v57, %v9429_v32  ;;  %v3496_v28 = vadd.f32 %v3480_v46, %v3430_v41  ;;  %v3498_v37 = vadd.f32 %v3482_v29, %v3432_v55  ;;  %v3581_v22 = vmul.f32 %v7408_v48, %v9397_v6 }
 0x2e8   : > { %4039 = vmatmul.mubr.bf16.gmra.mxu0 %v3857_v52  ;;  %v2372_v20 = vadd.f32 %v2356_v19, %v2321_v34  ;;  %v2374_v49 = vadd.f32 %v2358_v53, %v2323_v61  ;;  %v3583_v50 = vmul.f32 %v7408_v48, %v9423_v12  ;;  %v3631_v8 = vmul.f32 %v9401_v0, %v9398_v26 }
 0x2e9   : > { %v3546_v3 = vadd.f32 %v3530_v15, %v3496_v28  ;;  %v3548_v10 = vadd.f32 %v3532_v36, %v3498_v37  ;;  %v3633_v18 = vmul.f32 %v9401_v0, %v9424_v21  ;;  %v3681_v11 = vmul.f32 %v7411_v24, %v7704_v4 }
 0x2ea   : > { %v2422_v51 = vadd.f32 %v2406_v1, %v2372_v20  ;;  %v2424_v41 = vadd.f32 %v2408_v40, %v2374_v49  ;;  %v3683_v19 = vmul.f32 %v7411_v24, %v9425_v2  ;;  %v3732_v53 = vmul.f32 %v7422_v44, %v9423_v12 }
 0x2eb   : > { %v3597_v55 = vadd.f32 %v3581_v22, %v3546_v3  ;;  %v3599_v46 = vadd.f32 %v3583_v50, %v3548_v10  ;;  %v3734_v29 = vmul.f32 %v7422_v44, %v9426_v38  ;;  %v3782_v15 = vmul.f32 %v7414_v31, %v9424_v21 }
 0x2ec   : > { %v2472_v52 = vadd.f32 %v2456_v27, %v2422_v51  ;;  %v2474_v34 = vadd.f32 %v2458_v16, %v2424_v41  ;;  %v3784_v20 = vmul.f32 %v7414_v31, %v9427_v54  ;;  %v3832_v1 = vmul.f32 %v7448_v62, %v9425_v2  ;;  %v9430_v51 = vld [vmem:[#allocation80_spill] sm:$0xff] }
 0x2ed   : > { %v3647_v40 = vadd.f32 %v3631_v8, %v3597_v55  ;;  %v3649_v49 = vadd.f32 %v3633_v18, %v3599_v46  ;;  %v2053_v22 = vmul.f32 %v7347_v9, %v9404_v58  ;;  %v2055_v50 = vmul.f32 %v7347_v9, %v9407_v43  ;;  %v9431_v55 = vld [vmem:[#allocation38_spill] sm:$0xff] }
 0x2ee   : > { %v2484_v61 = vpack.c.bf16 %v2474_v34, %v2472_v52  ;;  %v2103_v36 = vmul.f32 %v9403_v17, %v9405_v33  ;;  %v2105_v27 = vmul.f32 %v9403_v17, %v9408_v35  ;;  %v2153_v16 = vmul.f32 %v9369_v23, %v9406_v7 }
 0x2ef   : > { %v3697_v28 = vadd.f32 %v3681_v11, %v3647_v40  ;;  %v3699_v37 = vadd.f32 %v3683_v19, %v3649_v49  ;;  %v3834_v8 = vmul.f32 %v7448_v62, %v9429_v32  ;;  %v2155_v3 = vmul.f32 %v9369_v23, %v9413_v56  ;;  %v9432_v11 = vld [vmem:[#allocation79_spill] sm:$0xff]  ;;  %v9433_v40 = vld [vmem:[#allocation49_spill] sm:$0xff] }
 0x2f0   : > { %2670 = vmatprep.mubr.bf16.mxu1 %v2484_v61  ;;  %v2119_v10 = vadd.f32 %v2103_v36, %v2053_v22  ;;  %v2121_v18 = vadd.f32 %v2105_v27, %v2055_v50  ;;  %v2204_v41 = vmul.f32 %v9430_v51, %v9407_v43  ;;  %v2206_v46 = vmul.f32 %v9430_v51, %v9431_v55  ;;  %v9434_v61 = vld [vmem:[#allocation77_spill] sm:$0xff]  ;;  %v9435_v50 = vld [vmem:[#allocation54_spill] sm:$0xff]  ;;  %v9436_v51 = vld [vmem:[#allocation51_spill] sm:$0xff] }
 0x2f1   : > { %v3748_v52 = vadd.f32 %v3732_v53, %v3697_v28  ;;  %v3750_v34 = vadd.f32 %v3734_v29, %v3699_v37  ;;  %v2254_v19 = vmul.f32 %v9432_v11, %v9408_v35  ;;  %v2256_v49 = vmul.f32 %v9432_v11, %v9433_v40  ;;  %v9437_v29 = vld [vmem:[#allocation43_spill] sm:$0xff] }
 0x2f2   : > { %v2169_v4 = vadd.f32 %v2153_v16, %v2119_v10  ;;  %v2171_v26 = vadd.f32 %v2155_v3, %v2121_v18  ;;  %v2304_v22 = vmul.f32 %v9434_v61, %v9413_v56  ;;  %v2306_v36 = vmul.f32 %v9434_v61, %v9435_v50  ;;  %v9438_v3 = vld [vmem:[#allocation111_spill] sm:$0xff] }
 0x2f3   : > { %v3798_v27 = vadd.f32 %v3782_v15, %v3748_v52  ;;  %v3800_v6 = vadd.f32 %v3784_v20, %v3750_v34  ;;  %v2355_v53 = vmul.f32 %v9436_v51, %v9431_v55  ;;  %v2357_v28 = vmul.f32 %v9436_v51, %v9437_v29  ;;  %v9439_v20 = vld [vmem:[#allocation66_spill] sm:$0xff] }
 0x2f4   : > { %v2220_v37 = vadd.f32 %v2204_v41, %v2169_v4  ;;  %v2222_v23 = vadd.f32 %v2206_v46, %v2171_v26  ;;  %v2405_v16 = vmul.f32 %v9375_v63, %v9433_v40  ;;  %v2407_v10 = vmul.f32 %v9375_v63, %v9438_v3  ;;  %v9440_v26 = vld [vmem:[#allocation69_spill] sm:$0xff] }
 0x2f5   : > { %v3848_v18 = vadd.f32 %v3832_v1, %v3798_v27  ;;  %v3850_v11 = vadd.f32 %v3834_v8, %v3800_v6  ;;  %v2455_v15 = vmul.f32 %v9409_v13, %v9435_v50  ;;  %v3429_v52 = vmul.f32 %v9439_v20, %v9404_v58  ;;  %v9441_v6 = vld [vmem:[#allocation76_spill] sm:$0xff] }
 0x2f6   : > { %v2270_v34 = vadd.f32 %v2254_v19, %v2220_v37  ;;  %v2272_v61 = vadd.f32 %v2256_v49, %v2222_v23  ;;  %v3431_v4 = vmul.f32 %v9439_v20, %v9407_v43  ;;  %v3479_v41 = vmul.f32 %v9440_v26, %v9405_v33  ;;  %v9442_v19 = vld [vmem:[#allocation46_spill] sm:$0xff] }
 0x2f7   : > { %v3860_v46 = vpack.c.bf16 %v3850_v11, %v3848_v18  ;;  %v3481_v63 = vmul.f32 %v9440_v26, %v9408_v35  ;;  %v3529_v1 = vmul.f32 %v9441_v6, %v9406_v7  ;;  %v3531_v8 = vmul.f32 %v9441_v6, %v9413_v56 }
 0x2f8   : > { %v2320_v27 = vadd.f32 %v2304_v22, %v2270_v34  ;;  %v2322_v58 = vadd.f32 %v2306_v36, %v2272_v61  ;;  %v2457_v23 = vmul.f32 %v9409_v13, %v9442_v19  ;;  %v3495_v49 = vadd.f32 %v3479_v41, %v3429_v52  ;;  %v5400_v22 = vld [vmem:[%s8791_s15 + $0x38] sm:$0xff]   ;;  %v5401_v61 = vld [vmem:[%s8791_s15 + $0x30] sm:$0xff]   ;;  %v9443_v41 = vld [vmem:[#allocation82_spill] sm:$0xff] }
 0x2f9   : > { %4046 = vmatprep.mubr.bf16.mxu0 %v3860_v46  ;;  %v3497_v37 = vadd.f32 %v3481_v63, %v3431_v4  ;;  %v3580_v11 = vmul.f32 %v9414_v25, %v9407_v43  ;;  %v3582_v18 = vmul.f32 %v9414_v25, %v9431_v55  ;;  %v3630_v7 = vmul.f32 %v9415_v5, %v9408_v35 }
 0x2fa   : > { %v2371_v36 = vadd.f32 %v2355_v53, %v2320_v27  ;;  %v2373_v52 = vadd.f32 %v2357_v28, %v2322_v58  ;;  %v3545_v63 = vadd.f32 %v3529_v1, %v3495_v49  ;;  %v3632_v34 = vmul.f32 %v9415_v5, %v9433_v40  ;;  %5085 = vmatprep.subr.bf16.mxu0 %v5400_v22 }
 0x2fb   : > { %v3547_v4 = vadd.f32 %v3531_v8, %v3497_v37  ;;  %v3680_v46 = vmul.f32 %v9443_v41, %v9413_v56  ;;  %v3682_v35 = vmul.f32 %v9443_v41, %v9435_v50  ;;  %v3731_v43 = vmul.f32 %v9417_v59, %v9431_v55  ;;  %5086 = vmatpush3.bf16.msra.mxu0 %v5400_v22  ;;  %v9445_v22 = vld [vmem:[#allocation64_spill] sm:$0xff]  ;;  %v9446_v56 = vld [vmem:[#allocation63_spill] sm:$0xff] }
 0x2fc   : > { %v2421_v33 = vadd.f32 %v2405_v16, %v2371_v36  ;;  %v2423_v25 = vadd.f32 %v2407_v10, %v2373_v52  ;;  %v3596_v6 = vadd.f32 %v3580_v11, %v3545_v63  ;;  %v3733_v58 = vmul.f32 %v9417_v59, %v9437_v29  ;;  %5087 = vmatprep.subr.bf16.mxu0 %v5401_v61  ;;  %v9444_v10 = vld [vmem:[#allocation61_spill] sm:$0xff] }
 0x2fd   : > { %v3598_v53 = vadd.f32 %v3582_v18, %v3547_v4  ;;  %v3781_v28 = vmul.f32 %v9418_v45, %v9433_v40  ;;  %v3783_v1 = vmul.f32 %v9418_v45, %v9438_v3  ;;  %v3831_v8 = vmul.f32 %v9419_v42, %v9435_v50 }
 0x2fe   : > { %v2471_v27 = vadd.f32 %v2455_v15, %v2421_v33  ;;  %v2473_v49 = vadd.f32 %v2457_v23, %v2423_v25  ;;  %v3646_v16 = vadd.f32 %v3630_v7, %v3596_v6  ;;  %v2058_v37 = vmul.f32 %v9444_v10, %v9423_v12 }
 0x2ff   : > { %v3648_v11 = vadd.f32 %v3632_v34, %v3598_v53  ;;  %v2060_v18 = vmul.f32 %v9444_v10, %v9426_v38  ;;  %v2108_v36 = vmul.f32 %v9445_v22, %v9424_v21  ;;  %v2110_v52 = vmul.f32 %v9445_v22, %v9427_v54  ;;  %5088 = vmatpush3.bf16.msra.mxu0 %v5401_v61  ;;  %v9447_v53 = vld [vmem:[#allocation73_spill] sm:$0xff] }
 0x300   : > { %v2483_v63 = vpack.c.bf16 %v2473_v49, %v2471_v27  ;;  %v3696_v4 = vadd.f32 %v3680_v46, %v3646_v16  ;;  %v2158_v33 = vmul.f32 %v9446_v56, %v9425_v2  ;;  %v2160_v7 = vmul.f32 %v9446_v56, %v9429_v32  ;;  %v9448_v27 = vld [vmem:[#allocation119_spill] sm:$0xff] }
 0x301   : > { %v3698_v25 = vadd.f32 %v3682_v35, %v3648_v11  ;;  %v3833_v15 = vmul.f32 %v9419_v42, %v9442_v19  ;;  %v2124_v6 = vadd.f32 %v2108_v36, %v2058_v37  ;;  %v2126_v23 = vadd.f32 %v2110_v52, %v2060_v18  ;;  %v9449_v35 = vld [vmem:[#allocation114_spill] sm:$0xff] }
 0x302   : > { %2671 = vmatmul.mubr.bf16.gmra.mxu1 %v2483_v63  ;;  %v3747_v34 = vadd.f32 %v3731_v43, %v3696_v4  ;;  %v2209_v10 = vmul.f32 %v9447_v53, %v9426_v38  ;;  %v2211_v46 = vmul.f32 %v9447_v53, %v9448_v27  ;;  %v2259_v49 = vmul.f32 %v9394_v47, %v9427_v54  ;;  %v9450_v37 = vld [vmem:[#allocation70_spill] sm:$0xff]  ;;  %v9451_v43 = vld [vmem:[#allocation121_spill] sm:$0xff]  ;;  %v5402_v63 = vld [vmem:[%s8791_s15 + $0x28] sm:$0xff]  }
 0x303   : > { %v3749_v16 = vadd.f32 %v3733_v58, %v3698_v25  ;;  %v2174_v56 = vadd.f32 %v2158_v33, %v2124_v6  ;;  %v2176_v61 = vadd.f32 %v2160_v7, %v2126_v23  ;;  %v2261_v11 = vmul.f32 %v9394_v47, %v9449_v35  ;;  %5089 = vmatprep.subr.bf16.mxu0 %v5402_v63  ;;  %v9452_v53 = vld [vmem:[#allocation59_spill] sm:$0xff] }
 0x304   : > { %v3797_v22 = vadd.f32 %v3781_v28, %v3747_v34  ;;  %v2309_v18 = vmul.f32 %v9450_v37, %v9429_v32  ;;  %v2311_v36 = vmul.f32 %v9450_v37, %v9451_v43  ;;  %v2360_v52 = vmul.f32 %v7390_v60, %v9448_v27  ;;  %5090 = vmatpush3.bf16.msra.mxu0 %v5402_v63  ;;  %v9453_v63 = vld [vmem:[#allocation78_spill] sm:$0xff] }
 0x305   : > { %v3799_v58 = vadd.f32 %v3783_v1, %v3749_v16  ;;  %v2225_v4 = vadd.f32 %v2209_v10, %v2174_v56  ;;  %v2227_v33 = vadd.f32 %v2211_v46, %v2176_v61  ;;  %v2410_v47 = vmul.f32 %v7382_v39, %v9449_v35 }
 0x306   : > { %v3847_v28 = vadd.f32 %v3831_v8, %v3797_v22  ;;  %v2412_v7 = vmul.f32 0.0, %v7382_v39  ;;  %v2460_v25 = vmul.f32 %v7432_v57, %v9451_v43  ;;  %v3434_v6 = vmul.f32 %v9399_v30, %v9423_v12 }
 0x307   : > { %v3849_v60 = vadd.f32 %v3833_v15, %v3799_v58  ;;  %v2275_v23 = vadd.f32 %v2259_v49, %v2225_v4  ;;  %v2277_v34 = vadd.f32 %v2261_v11, %v2227_v33  ;;  %v3436_v1 = vmul.f32 %v9399_v30, %v9426_v38 }
 0x308   : > { %v3484_v10 = vmul.f32 %v9452_v53, %v9424_v21  ;;  %v3486_v39 = vmul.f32 %v9452_v53, %v9427_v54  ;;  %v3534_v8 = vmul.f32 %v7339_v14, %v9425_v2  ;;  %v3536_v46 = vmul.f32 %v7339_v14, %v9429_v32 }
 0x309   : > { %v3859_v16 = vpack.c.bf16 %v3849_v60, %v3847_v28  ;;  %v2325_v15 = vadd.f32 %v2309_v18, %v2275_v23  ;;  %v2327_v49 = vadd.f32 %v2311_v36, %v2277_v34  ;;  %v2462_v56 = vmul.f32 0.0, %v7432_v57  ;;  %v5403_v60 = vld [vmem:[%s8791_s15 + $0x20] sm:$0xff]  }
 0x30a   : > { %v3500_v61 = vadd.f32 %v3484_v10, %v3434_v6  ;;  %v3502_v30 = vadd.f32 %v3486_v39, %v3436_v1  ;;  %v3585_v11 = vmul.f32 %v7408_v48, %v9426_v38  ;;  %v3587_v22 = vmul.f32 %v7408_v48, %v9448_v27  ;;  %5091 = vmatprep.subr.bf16.mxu0 %v5403_v60 }
 0x30b   : > { %4047 = vmatmul.mubr.bf16.gmra.mxu0 %v3859_v16  ;;  %v2376_v37 = vadd.f32 %v2360_v52, %v2325_v15  ;;  %v2378_v58 = vadd.f32 %v9453_v63, %v2327_v49  ;;  %v3635_v14 = vmul.f32 %v9401_v0, %v9427_v54  ;;  %v3637_v18 = vmul.f32 %v9401_v0, %v9449_v35 }
 0x30c   : > { %v3550_v36 = vadd.f32 %v3534_v8, %v3500_v61  ;;  %v3552_v57 = vadd.f32 %v3536_v46, %v3502_v30  ;;  %v3685_v4 = vmul.f32 %v7411_v24, %v9429_v32  ;;  %v3687_v33 = vmul.f32 %v7411_v24, %v9451_v43  ;;  %5092 = vmatpush3.bf16.msra.mxu0 %v5403_v60 }
 0x30d   : > { %v2426_v28 = vadd.f32 %v2410_v47, %v2376_v37  ;;  %v2428_v48 = vadd.f32 %v2412_v7, %v2378_v58  ;;  %v3736_v52 = vmul.f32 %v7422_v44, %v9448_v27  ;;  %v3738_v6 = vmul.f32 0.0, %v7422_v44  ;;  %v9456_v37 = vld [vmem:[#allocation117_spill] sm:$0xff]  ;;  %v9496_v27 = vld [vmem:[#allocation100_spill] sm:$0xff] }
 0x30e   : > { %v3601_v0 = vadd.f32 %v3585_v11, %v3550_v36  ;;  %v3603_v23 = vadd.f32 %v3587_v22, %v3552_v57  ;;  %v3786_v34 = vmul.f32 %v7414_v31, %v9449_v35  ;;  %v3788_v1 = vmul.f32 0.0, %v7414_v31  ;;  %v9455_v11 = vld [vmem:[#allocation80_spill] sm:$0xff]  ;;  %v9458_v57 = vld [vmem:[#allocation113_spill] sm:$0xff] }
 0x30f   : > { %v2476_v53 = vadd.f32 %v2460_v25, %v2426_v28  ;;  %v2478_v24 = vadd.f32 %v2462_v56, %v2428_v48  ;;  %v3836_v47 = vmul.f32 %v7448_v62, %v9451_v43  ;;  %v2057_v7 = vmul.f32 %v7347_v9, %v9431_v55  ;;  %v9454_v25 = vld [vmem:[#allocation75_spill] sm:$0xff]  ;;  %v9460_v48 = vld [vmem:[#allocation118_spill] sm:$0xff]  ;;  %v9490_v35 = vld [vmem:[#allocation45_spill] sm:$0xff] }
 0x310   : > { %v3651_v44 = vadd.f32 %v3635_v14, %v3601_v0  ;;  %v3653_v10 = vadd.f32 %v3637_v18, %v3603_v23  ;;  %v2059_v39 = vmul.f32 %v7347_v9, %v9437_v29  ;;  %v2107_v8 = vmul.f32 %v9403_v17, %v9433_v40 }
 0x311   : > { %v2486_v46 = vpack.c.bf16 %v2478_v24, %v2476_v53  ;;  %v2109_v31 = vmul.f32 %v9403_v17, %v9438_v3  ;;  %v2157_v16 = vmul.f32 %v9454_v25, %v9435_v50  ;;  %v2159_v15 = vmul.f32 %v9454_v25, %v9442_v19  ;;  %v9457_v17 = vld [vmem:[#allocation79_spill] sm:$0xff] }
 0x312   : > { %v3701_v49 = vadd.f32 %v3685_v4, %v3651_v44  ;;  %v3703_v56 = vadd.f32 %v3687_v33, %v3653_v10  ;;  %v3838_v61 = vmul.f32 0.0, %v7448_v62  ;;  %v2123_v30 = vadd.f32 %v2107_v8, %v2057_v7  ;;  %v9459_v62 = vld [vmem:[#allocation77_spill] sm:$0xff]  ;;  %v9461_v7 = vld [vmem:[#allocation42_spill] sm:$0xff] }
 0x313   : > { %2678 = vmatprep.mubr.bf16.mxu1 %v2486_v46  ;;  %v2125_v9 = vadd.f32 %v2109_v31, %v2059_v39  ;;  %v2208_v22 = vmul.f32 %v9455_v11, %v9437_v29  ;;  %v2210_v63 = vmul.f32 %v9455_v11, %v9456_v37  ;;  %v2258_v58 = vmul.f32 %v9457_v17, %v9438_v3 }
 0x314   : > { %v3752_v14 = vadd.f32 %v3736_v52, %v3701_v49  ;;  %v3754_v18 = vadd.f32 %v3738_v6, %v3703_v56  ;;  %v2173_v36 = vadd.f32 %v2157_v16, %v2123_v30  ;;  %v2260_v4 = vmul.f32 %v9457_v17, %v9458_v57  ;;  %v9462_v56 = vld [vmem:[#allocation76_spill] sm:$0xff] }
 0x315   : > { %v2175_v33 = vadd.f32 %v2159_v15, %v2125_v9  ;;  %v2308_v28 = vmul.f32 %v9459_v62, %v9442_v19  ;;  %v2310_v60 = vmul.f32 %v9459_v62, %v9460_v48  ;;  %v2359_v0 = vmul.f32 %v9436_v51, %v9456_v37 }
 0x316   : > { %v3802_v23 = vadd.f32 %v3786_v34, %v3752_v14  ;;  %v3804_v53 = vadd.f32 %v3788_v1, %v3754_v18  ;;  %v2224_v24 = vadd.f32 %v2208_v22, %v2173_v36  ;;  %v2361_v52 = vmul.f32 0.0, %v9436_v51 }
 0x317   : > { %v2226_v6 = vadd.f32 %v2210_v63, %v2175_v33  ;;  %v2409_v44 = vmul.f32 %v9461_v7, %v9458_v57  ;;  %v2411_v10 = vmul.f32 0.0, %v9461_v7  ;;  %v2459_v39 = vmul.f32 %v9409_v13, %v9460_v48  ;;  %v9463_v63 = vld [vmem:[#allocation83_spill] sm:$0xff] }
 0x318   : > { %v3852_v8 = vadd.f32 %v3836_v47, %v3802_v23  ;;  %v3854_v46 = vadd.f32 %v3838_v61, %v3804_v53  ;;  %v2274_v31 = vadd.f32 %v2258_v58, %v2224_v24  ;;  %v3433_v25 = vmul.f32 %v9439_v20, %v9431_v55 }
 0x319   : > { %v2276_v34 = vadd.f32 %v2260_v4, %v2226_v6  ;;  %v3435_v1 = vmul.f32 %v9439_v20, %v9437_v29  ;;  %v3483_v51 = vmul.f32 %v9440_v26, %v9433_v40  ;;  %v3485_v16 = vmul.f32 %v9440_v26, %v9438_v3 }
 0x31a   : > { %v3862_v15 = vpack.c.bf16 %v3854_v46, %v3852_v8  ;;  %v2324_v49 = vadd.f32 %v2308_v28, %v2274_v31  ;;  %v3533_v47 = vmul.f32 %v9462_v56, %v9435_v50  ;;  %v3535_v61 = vmul.f32 %v9462_v56, %v9442_v19  ;;  %v9464_v46 = vld [vmem:[#allocation33_spill] sm:$0xff]  ;;  %v9465_v31 = vld [vmem:[#allocation74_spill] sm:$0xff]  ;;  %v9468_v56 = vld [vmem:[#allocation32_spill] sm:$0xff] }
 0x31b   : > { %v2326_v30 = vadd.f32 %v2310_v60, %v2276_v34  ;;  %v2461_v9 = vmul.f32 0.0, %v9409_v13  ;;  %v3499_v11 = vadd.f32 %v3483_v51, %v3433_v25  ;;  %v3501_v22 = vadd.f32 %v3485_v16, %v3435_v1  ;;  %v9466_v34 = vld [vmem:[#allocation37_spill] sm:$0xff]  ;;  %v9467_v1 = vld [vmem:[#allocation35_spill] sm:$0xff] }
 0x31c   : > { %4054 = vmatprep.mubr.bf16.mxu0 %v3862_v15  ;;  %v2375_v20 = vadd.f32 %v2359_v0, %v2324_v49  ;;  %v3584_v17 = vmul.f32 %v9463_v63, %v9437_v29  ;;  %v3586_v26 = vmul.f32 %v9463_v63, %v9456_v37  ;;  %v3634_v58 = vmul.f32 %v9415_v5, %v9438_v3 }
 0x31d   : > { %v2377_v14 = vadd.f32 %v2361_v52, %v2326_v30  ;;  %v3549_v18 = vadd.f32 %v3533_v47, %v3499_v11  ;;  %v3551_v36 = vadd.f32 %v3535_v61, %v3501_v22  ;;  %v3636_v4 = vmul.f32 %v9415_v5, %v9458_v57  ;;  %v9469_v61 = vld [vmem:[#allocation36_spill] sm:$0xff]  ;;  %v9470_v11 = vld [vmem:[#allocation34_spill] sm:$0xff] }
 0x31e   : > { %v2425_v13 = vadd.f32 %v2409_v44, %v2375_v20  ;;  %v3684_v33 = vmul.f32 %v9443_v41, %v9442_v19  ;;  %v3686_v62 = vmul.f32 %v9443_v41, %v9460_v48  ;;  %v3735_v28 = vmul.f32 %v9417_v59, %v9456_v37  ;;  %v8306_v41 = vld [vmem:[#allocation13] sm:$0x77] }
 0x31f   : > { %v2427_v60 = vadd.f32 %v2411_v10, %v2377_v14  ;;  %v3600_v0 = vadd.f32 %v3584_v17, %v3549_v18  ;;  %v3602_v23 = vadd.f32 %v3586_v26, %v3551_v36  ;;  %v3737_v53 = vmul.f32 0.0, %v9417_v59  ;;  %v9488_v37 = vld [vmem:[#allocation89_spill] sm:$0xff] }
 0x320   : > { %v2475_v24 = vadd.f32 %v2459_v39, %v2425_v13  ;;  %v3785_v52 = vmul.f32 %v9418_v45, %v9458_v57  ;;  %v3787_v5 = vmul.f32 0.0, %v9418_v45  ;;  %v3837_v6 = vmul.f32 0.0, %v9419_v42  ;;  %v8313_v39 = vld [vmem:[#allocation13 + $0x8] sm:$0x77] }
 0x321   : > { %v2477_v7 = vadd.f32 %v2461_v9, %v2427_v60  ;;  %v3650_v44 = vadd.f32 %v3634_v58, %v3600_v0  ;;  %v3652_v8 = vadd.f32 %v3636_v4, %v3602_v23  ;;  %v2722_v10 = vrot.slane %v8306_v41, %v9464_v46  ;;  %v9471_v58 = vld [vmem:[#allocation56_spill] sm:$0xff]  ;;  %v9472_v4 = vld [vmem:[#allocation95_spill] sm:$0xff]  ;;  %v9473_v23 = vld [vmem:[#allocation94_spill] sm:$0xff] }
 0x322   : > { %v2784_v25 = vmul.f32 0.0, %v9465_v31  ;;  %v2822_v59 = vrot.slane %v8306_v41, %v9466_v34  ;;  %v2873_v45 = vrot.slane %v8313_v39, %v9464_v46  ;;  %v2923_v51 = vrot.slane %v8313_v39, %v9467_v1 }
 0x323   : > { %v2485_v16 = vpack.c.bf16 %v2477_v7, %v2475_v24  ;;  %v3700_v15 = vadd.f32 %v3684_v33, %v3650_v44  ;;  %v3702_v49 = vadd.f32 %v3686_v62, %v3652_v8  ;;  %v8320_v47 = vrot.slane %v2722_v10, %v9468_v56  ;;  %v9474_v24 = vld [vmem:[#allocation103_spill] sm:$0xff]  ;;  %v9475_v44 = vld [vmem:[#allocation81_spill] sm:$0xff] }
 0x324   : > { %v8323_v30 = vrot.slane %v2822_v59, %v9469_v61  ;;  %v8326_v9 = vrot.slane %v2873_v45, %v9468_v56  ;;  %v8329_v22 = vrot.slane %v2923_v51, %v9470_v11  ;;  %v2973_v20 = vrot.slane %v8313_v39, %v9466_v34  ;;  %v9476_v51 = vld [vmem:[#allocation92_spill] sm:$0xff] }
 0x325   : > { %2679 = vmatmul.mubr.bf16.gmra.mxu1 %v2485_v16  ;;  %v3751_v63 = vadd.f32 %v3735_v28, %v3700_v15  ;;  %v3753_v17 = vadd.f32 %v3737_v53, %v3702_v49  ;;  %v2734_v26 = vmul.f32 0.0, %v8320_v47  ;;  %v2736_v14 = vmul.f32 %v8320_v47, %v9471_v58  ;;  %v8343_v28 = vld [vmem:[#allocation13 + $0x10] sm:$0x77] }
 0x326   : > { %v3835_v18 = vmul.f32 %v9419_v42, %v9460_v48  ;;  %v2834_v36 = vmul.f32 0.0, %v8323_v30  ;;  %v2836_v13 = vmul.f32 %v8323_v30, %v9472_v4  ;;  %v2885_v33 = vmul.f32 %v8326_v9, %v9471_v58  ;;  %v9478_v58 = vld [vmem:[#allocation86_spill] sm:$0xff] }
 0x327   : > { %v3801_v62 = vadd.f32 %v3785_v52, %v3751_v63  ;;  %v3803_v60 = vadd.f32 %v3787_v5, %v3753_v17  ;;  %v2800_v0 = vadd.f32 %v2784_v25, %v2734_v26  ;;  %v2802_v53 = vadd.f32 %v9473_v23, %v2736_v14  ;;  %v5404_v52 = vld [vmem:[%s8791_s15 + $0x18] sm:$0xff]   ;;  %v9477_v26 = vld [vmem:[#allocation96_spill] sm:$0xff] }
 0x328   : > { %v2887_v7 = vmul.f32 %v8326_v9, %v9474_v24  ;;  %v2935_v42 = vmul.f32 %v8329_v22, %v9475_v44  ;;  %v8351_v8 = vrot.slane %v2973_v20, %v9469_v61  ;;  %v3024_v10 = vrot.slane %v8343_v28, %v9464_v46  ;;  %5093 = vmatprep.subr.bf16.mxu0 %v5404_v52 }
 0x329   : > { %v3851_v5 = vadd.f32 %v3835_v18, %v3801_v62  ;;  %v3853_v25 = vadd.f32 %v3837_v6, %v3803_v60  ;;  %v2850_v59 = vadd.f32 %v2834_v36, %v2800_v0  ;;  %v2852_v45 = vadd.f32 %v2836_v13, %v2802_v53  ;;  %5094 = vmatpush3.bf16.msra.mxu0 %v5404_v52  ;;  %v9479_v18 = vld [vmem:[#allocation52_spill] sm:$0xff]  ;;  %v9480_v13 = vld [vmem:[#allocation53_spill] sm:$0xff]  ;;  %v9481_v0 = vld [vmem:[#allocation58_spill] sm:$0xff] }
 0x32a   : > { %v2937_v16 = vmul.f32 %v8329_v22, %v9476_v51  ;;  %v2985_v15 = vmul.f32 %v8351_v8, %v9472_v4  ;;  %v8363_v49 = vrot.slane %v3024_v10, %v9468_v56  ;;  %v3074_v46 = vrot.slane %v8343_v28, %v9467_v1  ;;  %v9482_v53 = vld [vmem:[#allocation99_spill] sm:$0xff] }
 0x32b   : > { %v3861_v20 = vpack.c.bf16 %v3853_v25, %v3851_v5  ;;  %v2901_v63 = vadd.f32 %v2885_v33, %v2850_v59  ;;  %v2903_v17 = vadd.f32 %v2887_v7, %v2852_v45  ;;  %v3124_v6 = vrot.slane %v8343_v28, %v9466_v34  ;;  %v9483_v25 = vld [vmem:[#allocation48_spill] sm:$0xff] }
 0x32c   : > { %v2801_v14 = vadd.f32 %v9478_v58, %v9477_v26  ;;  %v2987_v36 = vmul.f32 %v8351_v8, %v9479_v18  ;;  %v8374_v4 = vrot.slane %v3074_v46, %v9470_v11  ;;  %v2733_v62 = vmul.f32 0.0, %v9480_v13  ;;  %v9484_v26 = vld [vmem:[#allocation107_spill] sm:$0xff] }
 0x32d   : > { %4055 = vmatmul.mubr.bf16.gmra.mxu0 %v3861_v20  ;;  %v2951_v1 = vadd.f32 %v2935_v42, %v2901_v63  ;;  %v2953_v60 = vadd.f32 %v2937_v16, %v2903_v17  ;;  %v8378_v33 = vrot.slane %v3124_v6, %v9469_v61  ;;  %v2783_v34 = vmul.f32 0.0, %v9481_v0  ;;  %v5405_v6 = vld [vmem:[%s8791_s15 + $0x10] sm:$0xff]  }
 0x32e   : > { %v3036_v23 = vmul.f32 %v8363_v49, %v9474_v24  ;;  %v3038_v7 = vmul.f32 %v8363_v49, %v9482_v53  ;;  %v2818_v44 = vrot.slane %v8306_v41, %v9469_v61  ;;  %v2869_v10 = vrot.slane %v8313_v39, %v9468_v56  ;;  %5095 = vmatprep.subr.bf16.mxu0 %v5405_v6 }
 0x32f   : > { %v3001_v52 = vadd.f32 %v2985_v15, %v2951_v1  ;;  %v3003_v42 = vadd.f32 %v2987_v36, %v2953_v60  ;;  %v3086_v5 = vmul.f32 %v8374_v4, %v9476_v51  ;;  %v3088_v59 = vmul.f32 %v8374_v4, %v9483_v25  ;;  %v9486_v60 = vld [vmem:[#allocation93_spill] sm:$0xff]  ;;  %5096 = vmatpush3.bf16.msra.mxu0 %v5405_v6 }
 0x330   : > { %v3136_v45 = vmul.f32 %v8378_v33, %v9479_v18  ;;  %v2799_v16 = vadd.f32 %v2783_v34, %v2733_v62  ;;  %v8396_v46 = vrot.slane %v2818_v44, %v9469_v61  ;;  %v8399_v41 = vrot.slane %v2869_v10, %v9468_v56  ;;  %v9485_v62 = vld [vmem:[#allocation122_spill] sm:$0xff] }
 0x331   : > { %v3052_v20 = vadd.f32 %v3036_v23, %v3001_v52  ;;  %v3054_v63 = vadd.f32 %v3038_v7, %v3003_v42  ;;  %v2969_v15 = vrot.slane %v8313_v39, %v9469_v61  ;;  %v3020_v17 = vrot.slane %v8343_v28, %v9468_v56  ;;  %v9487_v7 = vld [vmem:[#allocation97_spill] sm:$0xff] }
 0x332   : > { %v3138_v58 = vmul.f32 %v8378_v33, %v9484_v26  ;;  %v2833_v36 = vmul.f32 0.0, %v8396_v46  ;;  %v2835_v1 = vmul.f32 %v8396_v46, %v9485_v62  ;;  %v2884_v34 = vmul.f32 %v8399_v41, %v9486_v60  ;;  %v9489_v60 = vld [vmem:[#allocation65_spill] sm:$0xff] }
 0x333   : > { %v3102_v23 = vadd.f32 %v3086_v5, %v3052_v20  ;;  %v3104_v39 = vadd.f32 %v3088_v59, %v3054_v63  ;;  %v2886_v44 = vmul.f32 %v8399_v41, %v9487_v7  ;;  %v8418_v10 = vrot.slane %v2969_v15, %v9469_v61 }
 0x334   : > { %v2849_v52 = vadd.f32 %v2833_v36, %v2799_v16  ;;  %v2851_v42 = vadd.f32 %v2835_v1, %v2801_v14  ;;  %v3070_v48 = vrot.slane %v8343_v28, %v9470_v11  ;;  %v3120_v57 = vrot.slane %v8343_v28, %v9469_v61 }
 0x335   : > { %v2934_v5 = vmul.f32 %v9489_v60, %v9488_v37  ;;  %v3152_v59 = vadd.f32 %v3136_v45, %v3102_v23  ;;  %v3154_v20 = vadd.f32 %v3138_v58, %v3104_v39  ;;  %v8427_v63 = vrot.slane %v3020_v17, %v9468_v56  ;;  %v9491_v58 = vld [vmem:[#allocation105_spill] sm:$0xff]  ;;  %v9493_v23 = vld [vmem:[#allocation98_spill] sm:$0xff] }
 0x336   : > { %v2900_v15 = vadd.f32 %v2884_v34, %v2849_v52  ;;  %v2902_v43 = vadd.f32 %v2886_v44, %v2851_v42  ;;  %v2936_v14 = vmul.f32 %v9489_v60, %v9490_v35  ;;  %v2984_v16 = vmul.f32 %v8418_v10, %v9485_v62 }
 0x337   : > { %v3168_v36 = vpack.c.bf16 %v3154_v20, %v3152_v59  ;;  %v8434_v28 = vrot.slane %v3070_v48, %v9470_v11  ;;  %v8437_v6 = vrot.slane %v3120_v57, %v9469_v61  ;;  %v2738_v37 = vmul.f32 %v8320_v47, %v9474_v24  ;;  %v9492_v48 = vld [vmem:[#allocation55_spill] sm:$0xff] }
 0x338   : > { %v2950_v45 = vadd.f32 %v2934_v5, %v2900_v15  ;;  %v2952_v17 = vadd.f32 %v2936_v14, %v2902_v43  ;;  %v2986_v1 = vmul.f32 %v8418_v10, %v9491_v58  ;;  %v2740_v34 = vmul.f32 %v8320_v47, %v9482_v53  ;;  %v9494_v15 = vld [vmem:[#allocation67_spill] sm:$0xff] }
 0x339   : > { %3342 = vmatprep.mubr.bf16.mxu1 %v3168_v36  ;;  %v3035_v62 = vmul.f32 %v8427_v63, %v9487_v7  ;;  %v3037_v11 = vmul.f32 %v8427_v63, %v9492_v48  ;;  %v3085_v57 = vmul.f32 %v8434_v28, %v9490_v35  ;;  %v2788_v61 = vmul.f32 %v9465_v31, %v9476_v51 }
 0x33a   : > { %v3000_v43 = vadd.f32 %v2984_v16, %v2950_v45  ;;  %v3002_v24 = vadd.f32 %v2986_v1, %v2952_v17  ;;  %v3087_v39 = vmul.f32 %v8434_v28, %v9493_v23  ;;  %v2790_v44 = vmul.f32 %v9465_v31, %v9483_v25  ;;  %v9495_v17 = vld [vmem:[#allocation40_spill] sm:$0xff] }
 0x33b   : > { %v3135_v52 = vmul.f32 %v8437_v6, %v9491_v58  ;;  %v2804_v42 = vadd.f32 %v2788_v61, %v2738_v37  ;;  %v2838_v5 = vmul.f32 %v8323_v30, %v9479_v18  ;;  %v2840_v59 = vmul.f32 %v8323_v30, %v9484_v26 }
 0x33c   : > { %v3051_v20 = vadd.f32 %v3035_v62, %v3000_v43  ;;  %v3053_v51 = vadd.f32 %v3037_v11, %v3002_v24  ;;  %v3137_v14 = vmul.f32 %v8437_v6, %v9494_v15  ;;  %v2806_v16 = vadd.f32 %v2790_v44, %v2740_v34  ;;  %v9497_v43 = vld [vmem:[#allocation109_spill] sm:$0xff] }
 0x33d   : > { %v2854_v36 = vadd.f32 %v2838_v5, %v2804_v42  ;;  %v2889_v45 = vmul.f32 %v8326_v9, %v9482_v53  ;;  %v2891_v1 = vmul.f32 %v8326_v9, %v9495_v17  ;;  %v2939_v37 = vmul.f32 %v8329_v22, %v9483_v25  ;;  %v9498_v25 = vld [vmem:[#allocation101_spill] sm:$0xff] }
 0x33e   : > { %v3101_v18 = vadd.f32 %v3085_v57, %v3051_v20  ;;  %v3103_v61 = vadd.f32 %v3087_v39, %v3053_v51  ;;  %v2856_v56 = vadd.f32 %v2840_v59, %v2806_v16  ;;  %v2941_v62 = vmul.f32 %v8329_v22, %v9496_v27 }
 0x33f   : > { %v2905_v11 = vadd.f32 %v2889_v45, %v2854_v36  ;;  %v2989_v34 = vmul.f32 %v8351_v8, %v9484_v26  ;;  %v2991_v24 = vmul.f32 %v8351_v8, %v9497_v43  ;;  %v3040_v53 = vmul.f32 %v8363_v49, %v9495_v17  ;;  %v9499_v36 = vld [vmem:[#allocation88_spill] sm:$0xff] }
 0x340   : > { %v3151_v44 = vadd.f32 %v3135_v52, %v3101_v18  ;;  %v3153_v42 = vadd.f32 %v3137_v14, %v3103_v61  ;;  %v2907_v5 = vadd.f32 %v2891_v1, %v2856_v56  ;;  %v3042_v57 = vmul.f32 %v8363_v49, %v9498_v25 }
 0x341   : > { %v2955_v39 = vadd.f32 %v2939_v37, %v2905_v11  ;;  %v3090_v59 = vmul.f32 %v8374_v4, %v9496_v27  ;;  %v2737_v20 = vmul.f32 %v9480_v13, %v9487_v7  ;;  %v2739_v26 = vmul.f32 %v9480_v13, %v9492_v48  ;;  %v9500_v11 = vld [vmem:[#allocation50_spill] sm:$0xff] }
 0x342   : > { %v3167_v51 = vpack.c.bf16 %v3153_v42, %v3151_v44  ;;  %v2957_v16 = vadd.f32 %v2941_v62, %v2907_v5  ;;  %v2787_v52 = vmul.f32 %v9481_v0, %v9490_v35  ;;  %v2789_v56 = vmul.f32 %v9481_v0, %v9493_v23  ;;  %v9501_v42 = vld [vmem:[#allocation106_spill] sm:$0xff] }
 0x343   : > { %v3005_v14 = vadd.f32 %v2989_v34, %v2955_v39  ;;  %v3092_v45 = vmul.f32 %v8374_v4, %v9499_v36  ;;  %v2837_v1 = vmul.f32 %v8396_v46, %v9491_v58  ;;  %v2839_v7 = vmul.f32 %v8396_v46, %v9494_v15 }
 0x344   : > { %3343 = vmatmul.mubr.bf16.vlgmr.msra.gmra.mxu1 %v3167_v51  ;;  %v3007_v37 = vadd.f32 %v2991_v24, %v2957_v16  ;;  %v3140_v18 = vmul.f32 %v8378_v33, %v9497_v43  ;;  %v2803_v61 = vadd.f32 %v2787_v52, %v2737_v20  ;;  %v2805_v35 = vadd.f32 %v2789_v56, %v2739_v26  ;;  %v9502_v16 = vld [vmem:[#allocation104_spill] sm:$0xff]  ;;  %v9503_v26 = vld [vmem:[#allocation102_spill] sm:$0xff] }
 0x345   : > { %v3056_v62 = vadd.f32 %v3040_v53, %v3005_v14  ;;  %v3142_v34 = vmul.f32 %v8378_v33, %v9500_v11  ;;  %v2888_v44 = vmul.f32 %v8399_v41, %v9492_v48  ;;  %v2890_v58 = vmul.f32 %v8399_v41, %v9501_v42 }
 0x346   : > { %v3058_v5 = vadd.f32 %v3042_v57, %v3007_v37  ;;  %v2853_v39 = vadd.f32 %v2837_v1, %v2803_v61  ;;  %v2855_v19 = vadd.f32 %v2839_v7, %v2805_v35  ;;  %v2938_v24 = vmul.f32 %v9489_v60, %v9493_v23  ;;  %v9504_v7 = vld [vmem:[#allocation87_spill] sm:$0xff] }
 0x347   : > { %v3106_v51 = vadd.f32 %v3090_v59, %v3056_v62  ;;  %v2940_v20 = vmul.f32 %v9489_v60, %v9502_v16  ;;  %v2988_v53 = vmul.f32 %v8418_v10, %v9494_v15  ;;  %v2990_v52 = vmul.f32 %v8418_v10, %v9503_v26 }
 0x348   : > { %v3108_v48 = vadd.f32 %v3092_v45, %v3058_v5  ;;  %v2904_v56 = vadd.f32 %v2888_v44, %v2853_v39  ;;  %v2906_v14 = vadd.f32 %v2890_v58, %v2855_v19  ;;  %v3039_v57 = vmul.f32 %v8427_v63, %v9501_v42  ;;  %v9505_v39 = vld [vmem:[#allocation60_spill] sm:$0xff] }
 0x349   : > { %v3156_v1 = vadd.f32 %v3140_v18, %v3106_v51  ;;  %v3041_v23 = vmul.f32 %v8427_v63, %v9504_v7  ;;  %v3089_v59 = vmul.f32 %v8434_v28, %v9502_v16  ;;  %v2742_v37 = vmul.f32 %v8320_v47, %v9495_v17  ;;  %v5406_v17 = vld [vmem:[%s8791_s15 + $0x8] sm:$0xff]  }
 0x34a   : > { %v3158_v15 = vadd.f32 %v3142_v34, %v3108_v48  ;;  %v2954_v61 = vadd.f32 %v2938_v24, %v2904_v56  ;;  %v2956_v35 = vadd.f32 %v2940_v20, %v2906_v14  ;;  %v2744_v45 = vmul.f32 %v8320_v47, %v9498_v25  ;;  %v9506_v51 = vld [vmem:[#allocation39_spill] sm:$0xff]  ;;  %5097 = vmatprep.subr.bf16.mxu0 %v5406_v17 }
 0x34b   : > { %v2792_v19 = vmul.f32 %v9465_v31, %v9496_v27  ;;  %v2794_v18 = vmul.f32 %v9465_v31, %v9499_v36  ;;  %v2842_v62 = vmul.f32 %v8323_v30, %v9497_v43  ;;  %v2844_v44 = vmul.f32 %v8323_v30, %v9500_v11  ;;  %5098 = vmatpush3.bf16.msra.mxu0 %v5406_v17 }
 0x34c   : > { %v3170_v34 = vpack.c.bf16 %v3158_v15, %v3156_v1  ;;  %v3004_v58 = vadd.f32 %v2988_v53, %v2954_v61  ;;  %v3006_v5 = vadd.f32 %v2990_v52, %v2956_v35  ;;  %v3091_v24 = vmul.f32 %v8434_v28, %v9505_v39 }
 0x34d   : > { %v3139_v27 = vmul.f32 %v8437_v6, %v9503_v26  ;;  %v3141_v20 = vmul.f32 %v8437_v6, %v9506_v51  ;;  %v2808_v43 = vadd.f32 %v2792_v19, %v2742_v37  ;;  %v2810_v48 = vadd.f32 %v2794_v18, %v2744_v45 }
 0x34e   : > { %3350 = vmatprep.mubr.bf16.mxu1 %v3170_v34  ;;  %v3055_v56 = vadd.f32 %v3039_v57, %v3004_v58  ;;  %v3057_v14 = vadd.f32 %v3041_v23, %v3006_v5  ;;  %v2893_v1 = vmul.f32 %v8326_v9, %v9498_v25  ;;  %v2895_v53 = vmul.f32 %v8326_v9, %v9423_v12 }
 0x34f   : > { %v2858_v52 = vadd.f32 %v2842_v62, %v2808_v43  ;;  %v2860_v15 = vadd.f32 %v2844_v44, %v2810_v48  ;;  %v2943_v61 = vmul.f32 %v8329_v22, %v9499_v36  ;;  %v2945_v35 = vmul.f32 %v8329_v22, %v9424_v21 }
 0x350   : > { %v3105_v37 = vadd.f32 %v3089_v59, %v3055_v56  ;;  %v3107_v45 = vadd.f32 %v3091_v24, %v3057_v14  ;;  %v2993_v57 = vmul.f32 %v8351_v8, %v9500_v11  ;;  %v2995_v25 = vmul.f32 %v8351_v8, %v9425_v2 }
 0x351   : > { %v2909_v23 = vadd.f32 %v2893_v1, %v2858_v52  ;;  %v2911_v19 = vadd.f32 %v2895_v53, %v2860_v15  ;;  %v3044_v18 = vmul.f32 %v8363_v49, %v9423_v12  ;;  %v3046_v36 = vmul.f32 %v8363_v49, %v9426_v38 }
 0x352   : > { %v3155_v62 = vadd.f32 %v3139_v27, %v3105_v37  ;;  %v3157_v44 = vadd.f32 %v3141_v20, %v3107_v45  ;;  %v3094_v59 = vmul.f32 %v8374_v4, %v9424_v21  ;;  %v2741_v17 = vmul.f32 %v9480_v13, %v9501_v42  ;;  %v5407_v42 = vld [vmem:[%s8791_s15] sm:$0xff]  }
 0x353   : > { %v2959_v11 = vadd.f32 %v2943_v61, %v2909_v23  ;;  %v2961_v34 = vadd.f32 %v2945_v35, %v2911_v19  ;;  %v2743_v58 = vmul.f32 %v9480_v13, %v9504_v7  ;;  %v2791_v5 = vmul.f32 %v9481_v0, %v9502_v16  ;;  %5099 = vmatprep.subr.bf16.mxu0 %v5407_v42 }
 0x354   : > { %v3169_v24 = vpack.c.bf16 %v3157_v44, %v3155_v62  ;;  %v2793_v43 = vmul.f32 %v9481_v0, %v9505_v39  ;;  %v2841_v27 = vmul.f32 %v8396_v46, %v9503_v26  ;;  %v2843_v20 = vmul.f32 %v8396_v46, %v9506_v51  ;;  %5100 = vmatpush3.bf16.msra.mxu0 %v5407_v42 }
 0x355   : > { %v3009_v48 = vadd.f32 %v2993_v57, %v2959_v11  ;;  %v3011_v56 = vadd.f32 %v2995_v25, %v2961_v34  ;;  %v3096_v14 = vmul.f32 %v8374_v4, %v9427_v54  ;;  %v2807_v16 = vadd.f32 %v2791_v5, %v2741_v17 }
 0x356   : > { %3351 = vmatmul.mubr.bf16.gmra.mxu1 %v3169_v24  ;;  %v3144_v1 = vmul.f32 %v8378_v33, %v9425_v2  ;;  %v3146_v26 = vmul.f32 %v8378_v33, %v9429_v32  ;;  %v2809_v53 = vadd.f32 %v2793_v43, %v2743_v58  ;;  %v2892_v52 = vmul.f32 %v8399_v41, %v9504_v7 }
 0x357   : > { %v3060_v15 = vadd.f32 %v3044_v18, %v3009_v48  ;;  %v3062_v61 = vadd.f32 %v3046_v36, %v3011_v56  ;;  %v2857_v35 = vadd.f32 %v2841_v27, %v2807_v16  ;;  %v2894_v37 = vmul.f32 %v8399_v41, %v9431_v55 }
 0x358   : > { %v2859_v45 = vadd.f32 %v2843_v20, %v2809_v53  ;;  %v2942_v57 = vmul.f32 %v9489_v60, %v9505_v39  ;;  %v2944_v25 = vmul.f32 %v9489_v60, %v9433_v40  ;;  %v2992_v23 = vmul.f32 %v8418_v10, %v9506_v51 }
 0x359   : > { %v3110_v19 = vadd.f32 %v3094_v59, %v3060_v15  ;;  %v3112_v7 = vadd.f32 %v3096_v14, %v3062_v61  ;;  %v2908_v18 = vadd.f32 %v2892_v52, %v2857_v35  ;;  %v2994_v36 = vmul.f32 %v8418_v10, %v9435_v50  ;;  %v9508_v52 = vld [vmem:[#allocation119_spill] sm:$0xff] }
 0x35a   : > { %v2910_v62 = vadd.f32 %v2894_v37, %v2859_v45  ;;  %v3043_v44 = vmul.f32 %v8427_v63, %v9431_v55  ;;  %v3045_v39 = vmul.f32 %v8427_v63, %v9437_v29  ;;  %v3093_v17 = vmul.f32 %v8434_v28, %v9433_v40  ;;  %v9509_v37 = vld [vmem:[#allocation114_spill] sm:$0xff] }
 0x35b   : > { %v3160_v11 = vadd.f32 %v3144_v1, %v3110_v19  ;;  %v3162_v34 = vadd.f32 %v3146_v26, %v3112_v7  ;;  %v2958_v51 = vadd.f32 %v2942_v57, %v2908_v18  ;;  %v2746_v59 = vmul.f32 %v8320_v47, %v9423_v12 }
 0x35c   : > { %v2960_v58 = vadd.f32 %v2944_v25, %v2910_v62  ;;  %v2748_v5 = vmul.f32 %v8320_v47, %v9426_v38  ;;  %v2796_v24 = vmul.f32 %v9465_v31, %v9424_v21  ;;  %v2798_v43 = vmul.f32 %v9465_v31, %v9427_v54  ;;  %v9507_v31 = vld [vmem:[#allocation46_spill] sm:$0xff] }
 0x35d   : > { %v3172_v27 = vpack.c.bf16 %v3162_v34, %v3160_v11  ;;  %v3008_v20 = vadd.f32 %v2992_v23, %v2958_v51  ;;  %v2846_v42 = vmul.f32 %v8323_v30, %v9425_v2  ;;  %v2848_v48 = vmul.f32 %v8323_v30, %v9429_v32 }
 0x35e   : > { %v3010_v56 = vadd.f32 %v2994_v36, %v2960_v58  ;;  %v3095_v12 = vmul.f32 %v8434_v28, %v9438_v3  ;;  %v2812_v14 = vadd.f32 %v2796_v24, %v2746_v59  ;;  %v2814_v47 = vadd.f32 %v2798_v43, %v2748_v5 }
 0x35f   : > { %3358 = vmatprep.mubr.bf16.mxu1 %v3172_v27  ;;  %v3059_v16 = vadd.f32 %v3043_v44, %v3008_v20  ;;  %v3143_v21 = vmul.f32 %v8437_v6, %v9435_v50  ;;  %v3145_v1 = vmul.f32 %v8437_v6, %v9507_v31  ;;  %v2897_v2 = vmul.f32 %v8326_v9, %v9426_v38  ;;  %v9510_v38 = vld [vmem:[#allocation121_spill] sm:$0xff] }
 0x360   : > { %v3061_v26 = vadd.f32 %v3045_v39, %v3010_v56  ;;  %v2862_v53 = vadd.f32 %v2846_v42, %v2812_v14  ;;  %v2864_v30 = vadd.f32 %v2848_v48, %v2814_v47  ;;  %v2899_v15 = vmul.f32 %v8326_v9, %v9508_v52  ;;  %v9511_v27 = vld [vmem:[#allocation117_spill] sm:$0xff] }
 0x361   : > { %v3109_v61 = vadd.f32 %v3093_v17, %v3059_v16  ;;  %v2947_v35 = vmul.f32 %v8329_v22, %v9427_v54  ;;  %v2949_v45 = vmul.f32 %v8329_v22, %v9509_v37  ;;  %v2997_v57 = vmul.f32 %v8351_v8, %v9429_v32  ;;  %v9512_v14 = vld [vmem:[#allocation113_spill] sm:$0xff] }
 0x362   : > { %v3111_v25 = vadd.f32 %v3095_v12, %v3061_v26  ;;  %v2913_v23 = vadd.f32 %v2897_v2, %v2862_v53  ;;  %v2915_v19 = vadd.f32 %v2899_v15, %v2864_v30  ;;  %v2999_v7 = vmul.f32 %v8351_v8, %v9510_v38  ;;  %v9513_v2 = vld [vmem:[#allocation118_spill] sm:$0xff] }
 0x363   : > { %v3159_v18 = vadd.f32 %v3143_v21, %v3109_v61  ;;  %v3048_v9 = vmul.f32 %v8363_v49, %v9508_v52  ;;  %v3050_v36 = vmul.f32 0.0, %v8363_v49  ;;  %v3100_v54 = vmul.f32 0.0, %v8374_v4  ;;  %v5408_v53 = vld [vmem:[#allocation18 + $0x38] sm:$0xff]  }
 0x364   : > { %v3161_v62 = vadd.f32 %v3145_v1, %v3111_v25  ;;  %v2963_v44 = vadd.f32 %v2947_v35, %v2913_v23  ;;  %v2965_v22 = vadd.f32 %v2949_v45, %v2915_v19  ;;  %v2745_v32 = vmul.f32 %v9480_v13, %v9431_v55  ;;  %5061 = vmatprep.subr.bf16.mxu1 %v5408_v53 }
 0x365   : > { %v2747_v39 = vmul.f32 %v9480_v13, %v9437_v29  ;;  %v2795_v8 = vmul.f32 %v9481_v0, %v9433_v40  ;;  %v2797_v17 = vmul.f32 %v9481_v0, %v9438_v3  ;;  %v2845_v49 = vmul.f32 %v8396_v46, %v9435_v50  ;;  %5062 = vmatpush3.bf16.msra.mxu1 %v5408_v53 }
 0x366   : > { %v3171_v11 = vpack.c.bf16 %v3161_v62, %v3159_v18  ;;  %v3013_v34 = vadd.f32 %v2997_v57, %v2963_v44  ;;  %v3015_v51 = vadd.f32 %v2999_v7, %v2965_v22  ;;  %v2847_v59 = vmul.f32 %v8396_v46, %v9507_v31  ;;  %v8672_v7 = vld [vmem:[%s9514_s6] ss:$0 sm:$0xff] }
 0x367   : > { %v2811_v58 = vadd.f32 %v2795_v8, %v2745_v32  ;;  %v2813_v55 = vadd.f32 %v2797_v17, %v2747_v39  ;;  %v3098_v40 = vmul.f32 %v8374_v4, %v9509_v37  ;;  %v3150_v24 = vmul.f32 0.0, %v8378_v33  ;;  %v5411_v39 = vld [vmem:[#allocation18 + $0x20] sm:$0xff]  }
 0x368   : > { %3359 = vmatmul.mubr.bf16.gmra.mxu1 %v3171_v11  ;;  %v3064_v5 = vadd.f32 %v3048_v9, %v3013_v34  ;;  %v3066_v13 = vadd.f32 %v3050_v36, %v3015_v51  ;;  %v2896_v50 = vmul.f32 %v8399_v41, %v9437_v29  ;;  %v2898_v20 = vmul.f32 %v8399_v41, %v9511_v27  ;;  %v5412_v11 = vld [vmem:[#allocation18 + $0x18] sm:$0xff]   ;;  %v5413_v51 = vld [vmem:[#allocation18 + $0x10] sm:$0xff]  }
 0x369   : > { %v2861_v0 = vadd.f32 %v2845_v49, %v2811_v58  ;;  %v2863_v43 = vadd.f32 %v2847_v59, %v2813_v55  ;;  %v3148_v48 = vmul.f32 %v8378_v33, %v9510_v38  ;;  %v2946_v4 = vmul.f32 %v9489_v60, %v9438_v3 }
 0x36a   : > { %v3114_v42 = vadd.f32 %v3098_v40, %v3064_v5  ;;  %v3116_v46 = vadd.f32 %v3100_v54, %v3066_v13  ;;  %v2948_v47 = vmul.f32 %v9489_v60, %v9512_v14  ;;  %v2996_v29 = vmul.f32 %v8418_v10, %v9507_v31  ;;  %v5410_v54 = vld [vmem:[#allocation18 + $0x28] sm:$0xff]  }
 0x36b   : > { %v2912_v56 = vadd.f32 %v2896_v50, %v2861_v0  ;;  %v2914_v12 = vadd.f32 %v2898_v20, %v2863_v43  ;;  %v2998_v26 = vmul.f32 %v8418_v10, %v9513_v2  ;;  %v3049_v33 = vmul.f32 0.0, %v8427_v63  ;;  %v5414_v43 = vld [vmem:[#allocation18 + $0x8] sm:$0xff]  }
 0x36c   : > { %v3164_v16 = vadd.f32 %v3148_v48, %v3114_v42  ;;  %v3166_v21 = vadd.f32 %v3150_v24, %v3116_v46  ;;  %v3047_v3 = vmul.f32 %v8427_v63, %v9511_v27  ;;  %v3099_v60 = vmul.f32 0.0, %v8434_v28  ;;  %v5409_v63 = vld [vmem:[#allocation18 + $0x30] sm:$0xff]   ;;  %v5415_v46 = vld [vmem:[#allocation18] sm:$0xff]  }
 0x36d   : > { %v2962_v1 = vadd.f32 %v2946_v4, %v2912_v56  ;;  %v2964_v41 = vadd.f32 %v2948_v47, %v2914_v12  ;;  %v3097_v35 = vmul.f32 %v8434_v28, %v9512_v14  ;;  %v3149_v10 = vmul.f32 0.0, %v8437_v6  ;;  %5063 = vmatprep.subr.bf16.mxu1 %v5409_v63  ;;  %v8678_v12 = vld [vmem:[#allocation19 + $0x18] sm:$0xff]  }
 0x36e   : > { %v3174_v30 = vpack.c.bf16 %v3166_v21, %v3164_v16  ;;  %v3147_v57 = vmul.f32 %v8437_v6, %v9513_v2  ;;  %5064 = vmatpush3.bf16.msra.mxu1 %v5409_v63 }
 0x36f   : > { %v3012_v52 = vadd.f32 %v2996_v29, %v2962_v1  ;;  %v3014_v15 = vadd.f32 %v2998_v26, %v2964_v41  ;;  %5065 = vmatprep.subr.bf16.mxu1 %v5410_v54 }
 0x370   : > { %3366 = vmatprep.mubr.bf16.mxu1 %v3174_v30 }
 0x371   : > { %v3063_v31 = vadd.f32 %v3047_v3, %v3012_v52  ;;  %v3065_v61 = vadd.f32 %v3049_v33, %v3014_v15 }
 0x372   : > { %5066 = vmatpush3.bf16.msra.mxu1 %v5410_v54 }
 0x373   : > { %v3113_v37 = vadd.f32 %v3097_v35, %v3063_v31  ;;  %v3115_v45 = vadd.f32 %v3099_v60, %v3065_v61  ;;  %5067 = vmatprep.subr.bf16.mxu1 %v5411_v39 }
 0x375   : > { %v3163_v25 = vadd.f32 %v3147_v57, %v3113_v37  ;;  %v3165_v23 = vadd.f32 %v3149_v10, %v3115_v45 }
 0x376   : > { %5068 = vmatpush3.bf16.msra.mxu1 %v5411_v39 }
 0x377   : > { %v3173_v19 = vpack.c.bf16 %v3165_v23, %v3163_v25  ;;  %5069 = vmatprep.subr.bf16.mxu1 %v5412_v11  ;;  %v8685_v23 = vld [vmem:[#allocation16] ss:$0 sm:$0xff] }
 0x379   : > { %3367 = vmatmul.mubr.bf16.gmra.mxu1 %v3173_v19 }
 0x37a   : > { %5070 = vmatpush3.bf16.msra.mxu1 %v5412_v11 }
 0x37b   : > { %5071 = vmatprep.subr.bf16.mxu1 %v5413_v51 }
 0x37e   : > { %5072 = vmatpush3.bf16.msra.mxu1 %v5413_v51 }
 0x37f   : > { %5073 = vmatprep.subr.bf16.mxu1 %v5414_v43 }
 0x380   : > { %v4925_v38 = vpop.f32.mrf.mxu1 }
 0x382   : > { %v4926_v28 = vpop.f32.mrf.mxu1  ;;  %5074 = vmatpush3.bf16.msra.mxu1 %v5414_v43 }
 0x383   : > { %v4927_v18 = vadd.f32 %v4926_v28, %v4925_v38  ;;  %5075 = vmatprep.subr.bf16.mxu1 %v5415_v46  ;;  %v8687_v28 = vpop.f32.mrf.mxu0 }
 0x384   : > { %v4928_v9 = vpop.f32.mrf.mxu1 }
 0x385   : > { %v2657_v36 = vadd.f32 %v4927_v18, %v8672_v7 }
 0x386   : > { %v4929_v6 = vpop.f32.mrf.mxu1  ;;  %5076 = vmatpush3.bf16.msra.mxu1 %v5415_v46 }
 0x387   : > { %v4930_v62 = vadd.f32 %v4929_v6, %v4928_v9  ;;  %v2695_v44 = vmul.f32 0.1, %v2657_v36  ;;  %vm2687_vm0 = vcmp.gt.f32.partialorder %v2657_v36, 0.0  ;;  %5109 = vmatprep.subr.bf16.mxu1 %v8678_v12 }
 0x389   : > { %v2660_v22 = vadd.f32 %v4930_v62, %v8672_v7  ;;  %v2703_v8 = vsel %vm2687_vm0, %v2657_v36, %v2695_v44 }
 0x38b   : > { %vm2688_vm1 = vcmp.gt.f32.partialorder %v2660_v22, 0.0  ;;  %v2696_v32 = vmul.f32 0.1, %v2660_v22 }
 0x38d   : > { %v2704_v17 = vsel %vm2688_vm1, %v2660_v22, %v2696_v32 }
 0x38e   : > { %v4087_v49 = vpack.c.bf16 %v2704_v17, %v2703_v8 }
 0x390   : > { %5101 = vmatprep.mubr.bf16.mxu0 %v4087_v49 }
 0x39f   : > { %v4931_v34 = vpop.f32.mrf.mxu1 }
 0x3a1   : > { %v4932_v59 = vpop.f32.mrf.mxu1 }
 0x3a2   : > { %v4933_v58 = vadd.f32 %v4932_v59, %v4931_v34 }
 0x3a3   : > { %v4934_v55 = vpop.f32.mrf.mxu1 }
 0x3a4   : > { %v2665_v5 = vadd.f32 %v4933_v58, %v8672_v7 }
 0x3a5   : > { %v4935_v13 = vpop.f32.mrf.mxu1 }
 0x3a6   : > { %v4936_v40 = vadd.f32 %v4935_v13, %v4934_v55  ;;  %v2697_v24 = vmul.f32 0.1, %v2665_v5  ;;  %vm2689_vm4 = vcmp.gt.f32.partialorder %v2665_v5, 0.0 }
 0x3a8   : > { %v2668_v0 = vadd.f32 %v4936_v40, %v8672_v7  ;;  %v2705_v27 = vsel %vm2689_vm4, %v2665_v5, %v2697_v24  ;;  %vm4389_vm4 = vcmask 523264  }
 0x3aa   : > { %vm2690_vm5 = vcmp.gt.f32.partialorder %v2668_v0, 0.0  ;;  %v2698_v50 = vmul.f32 0.1, %v2668_v0 }
 0x3ac   : > { %v2706_v20 = vsel %vm2690_vm5, %v2668_v0, %v2698_v50 }
 0x3ad   : > { %v4088_v42 = vpack.c.bf16 %v2706_v20, %v2705_v27  ;;  %v5417_v20 = vld [vmem:[#allocation19 + $0x10] sm:$0xff]  }
 0x3af   : > { %5102 = vmatmul.mubr.bf16.vlgmr.msra.gmra.mxu0 %v4088_v42 }
 0x3c2   : > { %v4937_v48 = vpop.f32.mrf.mxu1 }
 0x3c4   : > { %v4938_v56 = vpop.f32.mrf.mxu1 }
 0x3c5   : > { %v4939_v4 = vadd.f32 %v4938_v56, %v4937_v48  ;;  %v5418_v48 = vld [vmem:[#allocation19 + $0x8] sm:$0xff]  }
 0x3c6   : > { %v4940_v14 = vpop.f32.mrf.mxu1 }
 0x3c7   : > { %v2673_v47 = vadd.f32 %v4939_v4, %v8672_v7 }
 0x3c8   : > { %v4941_v16 = vpop.f32.mrf.mxu1 }
 0x3c9   : > { %v4942_v21 = vadd.f32 %v4941_v16, %v4940_v14  ;;  %v2699_v29 = vmul.f32 0.1, %v2673_v47  ;;  %vm2691_vm6 = vcmp.gt.f32.partialorder %v2673_v47, 0.0  ;;  %v5419_v16 = vld [vmem:[#allocation19] sm:$0xff]  }
 0x3cb   : > { %v2676_v1 = vadd.f32 %v4942_v21, %v8672_v7  ;;  %v2707_v2 = vsel %vm2691_vm6, %v2673_v47, %v2699_v29 }
 0x3cd   : > { %vm2692_vm7 = vcmp.gt.f32.partialorder %v2676_v1, 0.0  ;;  %v2700_v41 = vmul.f32 0.1, %v2676_v1 }
 0x3cf   : > { %v2708_v26 = vsel %vm2692_vm7, %v2676_v1, %v2700_v41 }
 0x3d0   : > { %v4089_v33 = vpack.c.bf16 %v2708_v26, %v2707_v2 }
 0x3d2   : > { %5105 = vmatprep.mubr.bf16.mxu0 %v4089_v33 }
 0x3e5   : > { %v4943_v53 = vpop.f32.mrf.mxu1 }
 0x3e7   : > { %v4944_v30 = vpop.f32.mrf.mxu1 }
 0x3e8   : > { %v4945_v52 = vadd.f32 %v4944_v30, %v4943_v53 }
 0x3e9   : > { %v4946_v15 = vpop.f32.mrf.mxu1 }
 0x3ea   : > { %v2681_v3 = vadd.f32 %v4945_v52, %v8672_v7 }
 0x3eb   : > { %v4947_v60 = vpop.f32.mrf.mxu1 }
 0x3ec   : > { %v4948_v31 = vadd.f32 %v4947_v60, %v4946_v15  ;;  %v2701_v61 = vmul.f32 0.1, %v2681_v3  ;;  %vm2693_vm8 = vcmp.gt.f32.partialorder %v2681_v3, 0.0 }
 0x3ee   : > { %v2684_v35 = vadd.f32 %v4948_v31, %v8672_v7  ;;  %v2709_v37 = vsel %vm2693_vm8, %v2681_v3, %v2701_v61  ;;  %v8690_v7 = vpop.f32.mrf.mxu0 }
 0x3ef   : > { %v5007_v61 = vadd.f32 %v8690_v7, %v8687_v28 }
 0x3f0   : > { %vm2694_vm9 = vcmp.gt.f32.partialorder %v2684_v35, 0.0  ;;  %v2702_v10 = vmul.f32 0.1, %v2684_v35  ;;  %v5008_v44 = vpop.f32.mrf.mxu0 }
 0x3f2   : > { %v2710_v45 = vsel %vm2694_vm9, %v2684_v35, %v2702_v10  ;;  %v5009_v8 = vpop.f32.mrf.mxu0  ;;  %v4855_v10 = vld [vmem:[%s9515_s28] ss:$0 sm:$0xff] }
 0x3f3   : > { %v4090_v57 = vpack.c.bf16 %v2710_v45, %v2709_v37  ;;  %v5010_v3 = vadd.f32 %v5009_v8, %v5008_v44 }
 0x3f4   : > { %v8693_v11 = vpop.f32.mrf.mxu0 }
 0x3f5   : > { %5106 = vmatmul.mubr.bf16.gmra.mxu0 %v4090_v57  ;;  %v4036_v45 = vadd.f32 %v5010_v3, %v4855_v10 }
 0x3f6   : > { %v5012_v55 = vpop.f32.mrf.mxu0 }
 0x3f7   : > { %vm4064_vm2 = vcmp.gt.f32.partialorder %v4036_v45, 0.0  ;;  %v5013_v28 = vadd.f32 %v5012_v55, %v8693_v11 }
 0x3f8   : > { %v5014_v24 = vpop.f32.mrf.mxu0 }
 0x3fa   : > { %v5015_v42 = vpop.f32.mrf.mxu0 }
 0x3fc   : > { %v5017_v56 = vpop.f32.mrf.mxu0 }
 0x3fe   : > { %v5018_v21 = vpop.f32.mrf.mxu0 }
 0x400   : > { %v5020_v2 = vpop.f32.mrf.mxu0 }
 0x402   : > { %v5021_v53 = vpop.f32.mrf.mxu0 }
 0x404   : > { %v4965_v25 = vpop.f32.mrf.mxu1  ;;  %v5023_v60 = vpop.f32.mrf.mxu0 }
 0x406   : > { %v4966_v63 = vpop.f32.mrf.mxu1  ;;  %v5024_v57 = vpop.f32.mrf.mxu0 }
 0x407   : > { %v4967_v19 = vadd.f32 %v4966_v63, %v4965_v25 }
 0x408   : > { %v4968_v38 = vpop.f32.mrf.mxu1 }
 0x409   : > { %v3345_v18 = vadd.f32 %v4967_v19, %v8685_v23  ;;  %v4033_v19 = vadd.f32 %v5007_v61, %v4855_v10 }
 0x40a   : > { %v4969_v9 = vpop.f32.mrf.mxu1 }
 0x40b   : > { %v4970_v36 = vadd.f32 %v4969_v9, %v4968_v38  ;;  %v3383_v54 = vmul.f32 0.1, %v3345_v18  ;;  %vm3375_vm10 = vcmp.gt.f32.partialorder %v3345_v18, 0.0  ;;  %v4071_v44 = vmul.f32 0.1, %v4033_v19 }
 0x40c   : > { %vm4063_vm0 = vcmp.gt.f32.partialorder %v4033_v19, 0.0 }
 0x40d   : > { %v3348_v6 = vadd.f32 %v4970_v36, %v8685_v23  ;;  %v3391_v22 = vsel %vm3375_vm10, %v3345_v18, %v3383_v54  ;;  %v5016_v18 = vadd.f32 %v5015_v42, %v5014_v24  ;;  %v4072_v36 = vmul.f32 0.1, %v4036_v45 }
 0x40e   : > { %v5022_v54 = vadd.f32 %v5021_v53, %v5020_v2 }
 0x40f   : > { %vm3376_vm11 = vcmp.gt.f32.partialorder %v3348_v6, 0.0  ;;  %v3384_v62 = vmul.f32 0.1, %v3348_v6  ;;  %v4080_v8 = vsel %vm4064_vm2, %v4036_v45, %v4072_v36 }
 0x411   : > { %v3392_v32 = vsel %vm3376_vm11, %v3348_v6, %v3384_v62  ;;  %v5026_v6 = vpop.f32.mrf.mxu0 }
 0x412   : > { %v4107_v39 = vpack.c.bf16 %v3392_v32, %v3391_v22  ;;  %v5019_v22 = vadd.f32 %v5018_v21, %v5017_v56  ;;  %v4044_v32 = vadd.f32 %v5016_v18, %v4855_v10 }
 0x414   : > { %5077 = vmatprep.mubr.bf16.mxu1 %v4107_v39  ;;  %v4074_v11 = vmul.f32 0.1, %v4044_v32  ;;  %vm4066_vm5 = vcmp.gt.f32.partialorder %v4044_v32, 0.0 }
 0x416   : > { %v4971_v17 = vpop.f32.mrf.mxu1 }
 0x418   : > { %v4972_v49 = vpop.f32.mrf.mxu1 }
 0x419   : > { %v4973_v34 = vadd.f32 %v4972_v49, %v4971_v17  ;;  %v4052_v17 = vadd.f32 %v5022_v54, %v4855_v10  ;;  %v5027_v49 = vpop.f32.mrf.mxu0 }
 0x41a   : > { %v4974_v51 = vpop.f32.mrf.mxu1  ;;  %v5028_v55 = vadd.f32 %v5027_v49, %v5026_v6 }
 0x41b   : > { %v3353_v59 = vadd.f32 %v4973_v34, %v8685_v23  ;;  %v4041_v34 = vadd.f32 %v5013_v28, %v4855_v10  ;;  %vm4068_vm6 = vcmp.gt.f32.partialorder %v4052_v17, 0.0 }
 0x41c   : > { %v4975_v58 = vpop.f32.mrf.mxu1 }
 0x41d   : > { %v4976_v5 = vadd.f32 %v4975_v58, %v4974_v51  ;;  %v3385_v13 = vmul.f32 0.1, %v3353_v59  ;;  %vm3377_vm12 = vcmp.gt.f32.partialorder %v3353_v59, 0.0  ;;  %v4079_v58 = vsel %vm4063_vm0, %v4033_v19, %v4071_v44 }
 0x41e   : > { %v4073_v24 = vmul.f32 0.1, %v4041_v34  ;;  %vm4065_vm7 = vcmp.gt.f32.partialorder %v4041_v34, 0.0 }
 0x41f   : > { %v3356_v40 = vadd.f32 %v4976_v5, %v8685_v23  ;;  %v3393_v43 = vsel %vm3377_vm12, %v3353_v59, %v3385_v13  ;;  %v4049_v5 = vadd.f32 %v5019_v22, %v4855_v10 }
 0x420   : > { %v4081_v42 = vsel %vm4065_vm7, %v4041_v34, %v4073_v24 }
 0x421   : > { %vm3378_vm13 = vcmp.gt.f32.partialorder %v3356_v40, 0.0  ;;  %v3386_v0 = vmul.f32 0.1, %v3356_v40  ;;  %vm4067_vm8 = vcmp.gt.f32.partialorder %v4049_v5, 0.0 }
 0x423   : > { %v3394_v50 = vsel %vm3378_vm13, %v3356_v40, %v3386_v0  ;;  %v4076_v40 = vmul.f32 0.1, %v4052_v17  ;;  %v5025_v0 = vadd.f32 %v5024_v57, %v5023_v60 }
 0x424   : > { %v4108_v27 = vpack.c.bf16 %v3394_v50, %v3393_v43  ;;  %v4075_v43 = vmul.f32 0.1, %v4049_v5  ;;  %v4082_v50 = vsel %vm4066_vm5, %v4044_v32, %v4074_v11 }
 0x426   : > { %5078 = vmatmul.mubr.bf16.vlgmr.msra.gmra.mxu1 %v4108_v27  ;;  %v4060_v27 = vadd.f32 %v5028_v55, %v4855_v10  ;;  %v4083_v56 = vsel %vm4067_vm8, %v4049_v5, %v4075_v43 }
 0x427   : > { %5110 = vmatpush3.bf16.msra.mxu1 %v8678_v12 }
 0x428   : > { %v4977_v46 = vpop.f32.mrf.mxu1  ;;  %5111 = vmatprep.subr.bf16.mxu1 %v5417_v20  ;;  %vm4070_vm9 = vcmp.gt.f32.partialorder %v4060_v27, 0.0 }
 0x42a   : > { %v4978_v4 = vpop.f32.mrf.mxu1 }
 0x42b   : > { %v4979_v14 = vadd.f32 %v4978_v4, %v4977_v46  ;;  %5112 = vmatpush3.bf16.msra.mxu1 %v5417_v20  ;;  %v4084_v20 = vsel %vm4068_vm6, %v4052_v17, %v4076_v40  ;;  %v4057_v46 = vadd.f32 %v5025_v0, %v4855_v10  ;;  %v4078_v4 = vmul.f32 0.1, %v4060_v27  ;;  %v4896_v10 = vld [vmem:[#allocation21] ss:$0 sm:$0xff] }
 0x42c   : > { %v4980_v47 = vpop.f32.mrf.mxu1  ;;  %5113 = vmatprep.subr.bf16.mxu1 %v5418_v48 }
 0x42d   : > { %v3361_v29 = vadd.f32 %v4979_v14, %v8685_v23  ;;  %v4355_v14 = vpack.c.bf16 %v4084_v20, %v4083_v56  ;;  %vm4069_vm10 = vcmp.gt.f32.partialorder %v4057_v46, 0.0 }
 0x42e   : > { %v4981_v1 = vpop.f32.mrf.mxu1 }
 0x42f   : > { %v4982_v41 = vadd.f32 %v4981_v1, %v4980_v47  ;;  %5114 = vmatpush3.bf16.msra.mxu1 %v5418_v48  ;;  %v3387_v26 = vmul.f32 0.1, %v3361_v29  ;;  %vm3379_vm14 = vcmp.gt.f32.partialorder %v3361_v29, 0.0  ;;  %v4354_v48 = vpack.c.bf16 %v4082_v50, %v4081_v42 }
 0x430   : > { %5115 = vmatprep.subr.bf16.mxu1 %v5419_v16  ;;  %v4077_v47 = vmul.f32 0.1, %v4057_v46 }
 0x431   : > { %v3364_v12 = vadd.f32 %v4982_v41, %v8685_v23  ;;  %v3395_v30 = vsel %vm3379_vm14, %v3361_v29, %v3387_v26 }
 0x432   : > { %v4085_v21 = vsel %vm4069_vm10, %v4057_v46, %v4077_v47 }
 0x433   : > { %vm3380_vm15 = vcmp.gt.f32.partialorder %v3364_v12, 0.0  ;;  %v3388_v33 = vmul.f32 0.1, %v3364_v12  ;;  %5116 = vmatpush3.bf16.msra.mxu1 %v5419_v16  ;;  %v4086_v16 = vsel %vm4070_vm9, %v4060_v27, %v4078_v4  ;;  %v4490_v4 = vld [vmem:[#allocation22] sm:$0x1] }
 0x434   : > { %v4356_v29 = vpack.c.bf16 %v4086_v16, %v4085_v21  ;;  %vm4491_vm11 = vcmp.gt.f32.partialorder %v4490_v4, 0.0 }
 0x435   : > { %v3396_v52 = vsel %vm3380_vm15, %v3364_v12, %v3388_v33 }
 0x436   : > { %v4109_v15 = vpack.c.bf16 %v3396_v52, %v3395_v30 }
 0x438   : > { %5081 = vmatprep.mubr.bf16.mxu1 %v4109_v15 }
 0x439   : > { %v4983_v31 = vpop.f32.mrf.mxu1 }
 0x43b   : > { %v4984_v35 = vpop.f32.mrf.mxu1 }
 0x43c   : > { %v4985_v37 = vadd.f32 %v4984_v35, %v4983_v31 }
 0x43d   : > { %v4986_v25 = vpop.f32.mrf.mxu1 }
 0x43e   : > { %v3369_v63 = vadd.f32 %v4985_v37, %v8685_v23 }
 0x43f   : > { %v4987_v38 = vpop.f32.mrf.mxu1 }
 0x440   : > { %v4988_v9 = vadd.f32 %v4987_v38, %v4986_v25  ;;  %v3389_v7 = vmul.f32 0.1, %v3369_v63  ;;  %vm3381_vm3 = vcmp.gt.f32.partialorder %v3369_v63, 0.0 }
 0x442   : > { %v3372_v62 = vadd.f32 %v4988_v9, %v8685_v23  ;;  %v3397_v51 = vsel %vm3381_vm3, %v3369_v63, %v3389_v7  ;;  %v4353_v23 = vpack.c.bf16 %v4080_v8, %v4079_v58 }
 0x444   : > { %vm3382_vm1 = vcmp.gt.f32.partialorder %v3372_v62, 0.0  ;;  %v3390_v39 = vmul.f32 0.1, %v3372_v62 }
 0x446   : > { %v3398_v59 = vsel %vm3382_vm1, %v3372_v62, %v3390_v39 }
 0x447   : > { %v4110_v13 = vpack.c.bf16 %v3398_v59, %v3397_v51 }
 0x449   : > { %5082 = vmatmul.mubr.bf16.gmra.mxu1 %v4110_v13 }
 0x44a   : > { %5117 = vmatprep.mubr.msk.bf16.mxu1 %vm4389_vm4, %v4353_v23 }
 0x451   : > { %5118 = vmatmul.mubr.msk.bf16.vlgmr.msra.gmra.mxu1 %vm4389_vm4, %v4354_v48 }
 0x452   : > { %5121 = vmatprep.mubr.msk.bf16.mxu1 %vm4389_vm4, %v4355_v14 }
 0x459   : > { %5122 = vmatmul.mubr.msk.bf16.gmra.mxu1 %vm4389_vm4, %v4356_v29 }
 0x46f   : > { %v5103_v2 = vpop.f32.mrf.mxu0 }
 0x471   : > { %v4322_v12 = vpop.f32.mrf.mxu0 }
 0x473   : > { %v5104_v30 = vpop.f32.mrf.mxu0 }
 0x475   : > { %v4325_v3 = vpop.f32.mrf.mxu0 }
 0x4b5   : > { %v5107_v31 = vpop.f32.mrf.mxu0 }
 0x4b7   : > { %v4338_v25 = vpop.f32.mrf.mxu0 }
 0x4b9   : > { %v5108_v62 = vpop.f32.mrf.mxu0 }
 0x4bb   : > { %v4341_v58 = vpop.f32.mrf.mxu0 }
 0x4e6   : > { %v5079_v1 = vpop.f32.mrf.mxu1 }
 0x4e7   : > { %v4331_v61 = vadd.f32 %v5103_v2, %v5079_v1 }
 0x4e8   : > { %v4209_v41 = vpop.f32.mrf.mxu1 }
 0x4e9   : > { %v4323_v37 = vadd.f32 %v4322_v12, %v4209_v41  ;;  %v9516_v41 = vmov 0  }
 0x4ea   : > { %v5080_v26 = vpop.f32.mrf.mxu1  ;;  %v4540_v2 = vsel %vm4491_vm11, 1, %v9516_v41 }
 0x4eb   : > { %v4334_v63 = vadd.f32 %v5104_v30, %v5080_v26  ;;  %v9517_v30 = vld [vmem:[#allocation32_spill] sm:$0xff] }
 0x4ec   : > { %v4212_v33 = vpop.f32.mrf.mxu1 }
 0x4ed   : > { %v4326_v9 = vadd.f32 %v4325_v3, %v4212_v33 }
 0x509   : > { %v5083_v53 = vpop.f32.mrf.mxu1 }
 0x50a   : > { %v4347_v28 = vadd.f32 %v5107_v31, %v5083_v53 }
 0x50b   : > { %v4225_v52 = vpop.f32.mrf.mxu1 }
 0x50c   : > { %v4339_v39 = vadd.f32 %v4338_v25, %v4225_v52  ;;  %v4544_v52 = vrot.slane %v4540_v2, %v9517_v30 }
 0x50d   : > { %v5084_v15 = vpop.f32.mrf.mxu1 }
 0x50e   : > { %v4350_v51 = vadd.f32 %v5108_v62, %v5084_v15  ;;  %vm8734_vm12 = vcmp.eq.s32.totalorder %v4544_v52, 1 }
 0x50f   : > { %v4228_v60 = vpop.f32.mrf.mxu1 }
 0x510   : > { %v4342_v55 = vadd.f32 %v4341_v58, %v4228_v60 }
 0x511   : > { %v5119_v35 = vpop.f32.mrf.mxu1 }
 0x512   : > { %v4469_v45 = vadd.f32 %v5119_v35, %v4331_v61 }
 0x513   : > { %v4436_v57 = vpop.f32.mrf.mxu1 }
 0x514   : > { %v8712_v19 = vadd.f32 %v4896_v10, %v4469_v45  ;;  %v4467_v38 = vadd.f32 %v4436_v57, %v4323_v37 }
 0x515   : > { %v5120_v18 = vpop.f32.mrf.mxu1 }
 0x516   : > { %v4899_v36 = vmul.f32 -1.442695, %v8712_v19  ;;  %v8715_v54 = vadd.f32 %v4896_v10, %v4467_v38  ;;  %v4470_v6 = vadd.f32 %v5120_v18, %v4334_v63 }
 0x517   : > { %v4439_v7 = vpop.f32.mrf.mxu1 }
 0x518   : > { %5420 = vpow2.f32 %v4899_v36  ;;  %v4897_v44 = vmul.f32 -1.442695, %v8715_v54  ;;  %v8718_v22 = vadd.f32 %v4896_v10, %v4470_v6  ;;  %v4468_v32 = vadd.f32 %v4439_v7, %v4326_v9 }
 0x519   : > { %v5123_v8 = vpop.f32.mrf.mxu1 }
 0x51a   : > { %5422 = vpow2.f32 %v4897_v44  ;;  %v4900_v17 = vmul.f32 -1.442695, %v8718_v22  ;;  %v8721_v49 = vadd.f32 %v4896_v10, %v4468_v32  ;;  %v4473_v34 = vadd.f32 %v5123_v8, %v4347_v28 }
 0x51b   : > { %v4452_v59 = vpop.f32.mrf.mxu1 }
 0x51c   : > { %5424 = vpow2.f32 %v4900_v17  ;;  %v4898_v5 = vmul.f32 -1.442695, %v8721_v49  ;;  %v8724_v13 = vadd.f32 %v4896_v10, %v4473_v34  ;;  %v4471_v11 = vadd.f32 %v4452_v59, %v4339_v39 }
 0x51d   : > { %v5124_v23 = vpop.f32.mrf.mxu1 }
 0x51e   : > { %5426 = vpow2.f32 %v4898_v5  ;;  %v4903_v40 = vmul.f32 -1.442695, %v8724_v13  ;;  %v8727_v24 = vadd.f32 %v4896_v10, %v4471_v11  ;;  %v4474_v0 = vadd.f32 %v5124_v23, %v4350_v51 }
 0x51f   : > { %v4455_v43 = vpop.f32.mrf.mxu1 }
 0x520   : > { %5428 = vpow2.f32 %v4903_v40  ;;  %v4901_v50 = vmul.f32 -1.442695, %v8727_v24  ;;  %v4489_v27 = vadd.f32 %v4896_v10, %v4474_v0  ;;  %v4472_v20 = vadd.f32 %v4455_v43, %v4342_v55 }
 0x522   : > { %5430 = vpow2.f32 %v4901_v50  ;;  %v4904_v42 = vmul.f32 -1.442695, %v4489_v27  ;;  %v4487_v46 = vadd.f32 %v4896_v10, %v4472_v20 }
 0x524   : > { %5432 = vpow2.f32 %v4904_v42  ;;  %v4902_v48 = vmul.f32 -1.442695, %v4487_v46 }
 0x525   : > { %v5421_v56 = vpop.eup %5420 }
 0x526   : > { %v4518_v14 = vadd.f32 1.0, %v5421_v56  ;;  %5434 = vpow2.f32 %v4902_v48 }
 0x527   : > { %v5423_v47 = vpop.eup %5422 }
 0x528   : > { %5436 = vrcp.f32 %v4518_v14  ;;  %v4516_v16 = vadd.f32 1.0, %v5423_v47 }
 0x529   : > { %v5425_v21 = vpop.eup %5424 }
 0x52a   : > { %5438 = vrcp.f32 %v4516_v16  ;;  %v4519_v29 = vadd.f32 1.0, %v5425_v21 }
 0x52b   : > { %v5427_v1 = vpop.eup %5426 }
 0x52c   : > { %5440 = vrcp.f32 %v4519_v29  ;;  %v4517_v26 = vadd.f32 1.0, %v5427_v1 }
 0x52d   : > { %v5429_v12 = vpop.eup %5428 }
 0x52e   : > { %5442 = vrcp.f32 %v4517_v26  ;;  %v4522_v33 = vadd.f32 1.0, %v5429_v12 }
 0x52f   : > { %v5431_v53 = vpop.eup %5430 }
 0x530   : > { %5444 = vrcp.f32 %v4522_v33  ;;  %v4520_v15 = vadd.f32 1.0, %v5431_v53 }
 0x531   : > { %v5433_v3 = vpop.eup %5432 }
 0x532   : > { %5446 = vrcp.f32 %v4520_v15  ;;  %v4523_v60 = vadd.f32 1.0, %v5433_v3 }
 0x533   : > { %v5435_v31 = vpop.eup %5434 }
 0x534   : > { %5448 = vrcp.f32 %v4523_v60  ;;  %v4521_v35 = vadd.f32 1.0, %v5435_v31 }
 0x535   : > { %v5437_v10 = vpop.eup %5436 }
 0x536   : > { %v4548_v37 = vsel %vm8734_vm12, %v5437_v10, %v8712_v19  ;;  %5450 = vrcp.f32 %v4521_v35 }
 0x537   : > { %v5439_v45 = vpop.eup %5438  ;;  %4556 = vst [vmem:[%s830_s25 + $0x10] sm:$0xff] %v4548_v37 }
 0x538   : > { %v4546_v57 = vsel %vm8734_vm12, %v5439_v45, %v8715_v54 }
 0x539   : > { %v5441_v25 = vpop.eup %5440  ;;  %4554 = vst [vmem:[%s830_s25] sm:$0xff] %v4546_v57 }
 0x53a   : > { %v4549_v63 = vsel %vm8734_vm12, %v5441_v25, %v8718_v22 }
 0x53b   : > { %v5443_v38 = vpop.eup %5442  ;;  %4557 = vst [vmem:[%s830_s25 + $0x18] sm:$0xff] %v4549_v63 }
 0x53c   : > { %v4547_v18 = vsel %vm8734_vm12, %v5443_v38, %v8721_v49 }
 0x53d   : > { %v5445_v19 = vpop.eup %5444  ;;  %4555 = vst [vmem:[%s830_s25 + $0x8] sm:$0xff] %v4547_v18 }
 0x53e   : > { %v4552_v9 = vsel %vm8734_vm12, %v5445_v19, %v8724_v13 }
 0x53f   : > { %v5447_v36 = vpop.eup %5446  ;;  %4560 = vst [vmem:[%s830_s25 + $0x30] sm:$0xff] %v4552_v9 }
 0x540   : > { %v4550_v54 = vsel %vm8734_vm12, %v5447_v36, %v8727_v24 }
 0x541   : > { %v5449_v6 = vpop.eup %5448  ;;  %4558 = vst [vmem:[%s830_s25 + $0x20] sm:$0xff] %v4550_v54 }
 0x542   : > { %v4553_v28 = vsel %vm8734_vm12, %v5449_v6, %v4489_v27 }
 0x543   : > { %v5451_v7 = vpop.eup %5450  ;;  %4561 = vst [vmem:[%s830_s25 + $0x38] sm:$0xff] %v4553_v28 }
 0x544   : > { %v4551_v62 = vsel %vm8734_vm12, %v5451_v7, %v4487_v46 }
 0x545   : > { %4559 = vst [vmem:[%s830_s25 + $0x28] sm:$0xff] %v4551_v62 }
 0x546 PF: > { %p37_p5 = scmp.ge.s32.totalorder %s6187_s0, 4   ;;  %s9521_s1 = smov %s5874_s22 }
 0x547   : > { %s9522_s22 = smov %s5878_s23  ;;  %s9523_s23 = smov %s6198_s30 }
 0x548   : > { %s9524_s24 = smov %s6187_s0  ;;  %39 = sbr.rel (!%p37_p5) target bundleno = 22 (0x16), region = 192 }
 0x54d   :  { %4583 = vsyncpa [#allocation3], 1 }
 0x54e   :  { %4585 = vsyncpa [#allocation3 + $0x1], 1 }
 0x54f   :  { %4586 = vsyncpa [#allocation5], 1 }
 0x550   :  { %4587 = vsyncpa [#allocation8], 1 }
 0x551   :  { %4588 = vsyncpa [#allocation11], 1 }
 0x552   :  { %4589 = vsyncpa [#allocation14], 1 }
 0x553   :  { %4590 = vsyncpa [#allocation17], 1 }
 0x554   :  { %4591 = vsyncpa [#allocation20], 1 }
 0x555   :  { %4592 = vsyncpa [#allocation23], 1 }

</bundles_post_ra>
